<compile_context>
chip_gen: v7x
topology: tpu7x:2x2x1
jax: 0.10.0
libtpu: 0.0.40
codegen_flags: <defaults>
</compile_context>

<pallas_src>
import functools
import math

import numpy as np
import jax
import jax.numpy as jnp
from jax import lax
from jax.experimental import pallas as pl
from jax.experimental.pallas import tpu as pltpu


def _pad128(n):
    return ((n + 127) // 128) * 128


_SQRT1_2 = 1.0 / math.sqrt(2.0)


def _erf(x):
    # Abramowitz & Stegun 7.1.26 (max abs err ~1.5e-7); only exp/mul/add/where.
    ax = jnp.abs(x)
    t = 1.0 / (1.0 + 0.3275911 * ax)
    poly = ((((1.061405429 * t - 1.453152027) * t + 1.421413741) * t
             - 0.284496736) * t + 0.254829592) * t
    y = 1.0 - poly * jnp.exp(-ax * ax)
    return jnp.where(x >= 0.0, y, -y)


def _gelu(x):  # erf-based GELU (torch.nn.GELU default)
    return 0.5 * x * (1.0 + _erf(x * _SQRT1_2))


# ----------------------------------------------------------------------------
# Fused whole-model Pallas kernel
# ----------------------------------------------------------------------------

def _grp_fused_kernel(
    # data
    image_ref, state_ref, text_ref, mask_ref,
    # token construction params
    img_w_ref, img_b_ref, state_w_ref, state_b_ref, action_tok_ref, pos_ref,
    # per-layer (stacked over depth) transformer params
    ln1_g_ref, ln1_b_ref, wqkv_ref, wo_ref,
    ln2_g_ref, ln2_b_ref, ff_w1_ref, ff_b1_ref, ff_w2_ref, ff_b2_ref,
    # final transformer LayerNorm
    fin_g_ref, fin_b_ref,
    # action head
    head_g_ref, head_b_ref, head_w1_ref, head_b1_ref, head_w2_ref, head_b2_ref,
    # output (lane-dense padded)
    o_ref,
    *, B, S, Tt, Ti, na, heads, dim_head, inner, depth, eps, scale,
):
    f32 = jnp.float32

    def layer_norm(xv, g, beta):
        mu = jnp.mean(xv, axis=-1, keepdims=True)
        xc = xv - mu
        var = jnp.mean(xc * xc, axis=-1, keepdims=True)
        return xc * lax.rsqrt(var + eps) * g + beta

    # ---------------- token assembly (values stay in vregs/VMEM) ----------
    pos = pos_ref[...]                                                    # (S, dim)
    img_tok = (jnp.dot(image_ref[...], img_w_ref[...],
                       preferred_element_type=f32) + img_b_ref[...])      # (B*Ti, dim)
    state_tok = (jnp.dot(state_ref[...], state_w_ref[...],
                         preferred_element_type=f32) + state_b_ref[...])  # (B, dim)
    text = text_ref[...]                                                  # (B*Tt, dim)
    act_tok = action_tok_ref[...]                                         # (na, dim)

    rows = []
    for bi in range(B):
        rows.append(text[bi * Tt:(bi + 1) * Tt, :] + pos[0:Tt, :])
        rows.append(img_tok[bi * Ti:(bi + 1) * Ti, :] + pos[Tt:Tt + Ti, :])
        rows.append(state_tok[bi:bi + 1, :] + pos[Tt + Ti:Tt + Ti + 1, :])
        rows.append(act_tok + pos[Tt + Ti + 1:S, :])
    x = jnp.concatenate(rows, axis=0)                                     # (B*S, dim)

    mask = mask_ref[...]                                                  # (S, S)

    # ---------------- transformer layers (statically unrolled) ------------
    for li in range(depth):
        h1 = layer_norm(x, ln1_g_ref[li], ln1_b_ref[li])
        # Single pre-folded QKV projection for the whole residual stream.
        qkv = jnp.dot(h1, wqkv_ref[li], preferred_element_type=f32)       # (B*S, 3*inner)

        outs = []
        for bi in range(B):
            r0, r1 = bi * S, (bi + 1) * S
            head_outs = []
            for hi in range(heads):
                c0 = hi * dim_head
                qb = qkv[r0:r1, c0:c0 + dim_head]
                kb = qkv[r0:r1, inner + c0:inner + c0 + dim_head]
                vb = qkv[r0:r1, 2 * inner + c0:2 * inner + c0 + dim_head]
                s = (lax.dot_general(qb, kb, (((1,), (1,)), ((), ())),
                                     preferred_element_type=f32) * scale + mask)
                s = s - jnp.max(s, axis=-1, keepdims=True)
                p = jnp.exp(s)
                p = p * pl.reciprocal(jnp.sum(p, axis=-1, keepdims=True),
                                      approx=True)
                head_outs.append(jnp.dot(p, vb, preferred_element_type=f32))
            outs.append(jnp.concatenate(head_outs, axis=-1))
        attn = jnp.concatenate(outs, axis=0)                              # (B*S, inner)

        # Pre-folded output projection (mha_Wo @ to_out_W) + residual.
        x = x + jnp.dot(attn, wo_ref[li], preferred_element_type=f32)

        # FeedForward block + residual.
        h2 = layer_norm(x, ln2_g_ref[li], ln2_b_ref[li])
        h2 = jnp.dot(h2, ff_w1_ref[li], preferred_element_type=f32) + ff_b1_ref[li]
        h2 = _gelu(h2)
        x = x + jnp.dot(h2, ff_w2_ref[li], preferred_element_type=f32) + ff_b2_ref[li]

    # ---------------- final LayerNorm + action head (all batches at once) --
    x = layer_norm(x, fin_g_ref[...], fin_b_ref[...])
    act_in = jnp.concatenate(
        [x[bi * S + (S - na):(bi + 1) * S, :] for bi in range(B)], axis=0)  # (B*na, dim)
    t = layer_norm(act_in, head_g_ref[...], head_b_ref[...])
    t = _gelu(jnp.dot(t, head_w1_ref[...], preferred_element_type=f32)
              + head_b1_ref[...])
    t = jnp.dot(t, head_w2_ref[...], preferred_element_type=f32) + head_b2_ref[...]
    o_ref[...] = t.astype(o_ref.dtype)                                    # (B*na, 128)


# ----------------------------------------------------------------------------
# Parameters (deterministic synthetic init) and positional embedding
# ----------------------------------------------------------------------------

def create_sinusoidal_pos_embedding(num_positions, dimension):
    pos = np.arange(num_positions)[:, None].astype(np.float64)
    hid = np.arange(dimension)[None, :]
    angle = pos / np.power(10000.0, 2.0 * (hid // 2) / dimension)
    table = np.zeros((num_positions, dimension), dtype=np.float64)
    table[:, 0::2] = np.sin(angle[:, 0::2])
    table[:, 1::2] = np.cos(angle[:, 1::2])
    return jnp.asarray(table, dtype=jnp.float32)


def init_params(key, cfg):
    def nrm(k, shape, scale=0.02):
        return scale * jax.random.normal(k, shape, dtype=jnp.float32)

    dim = cfg["dim"]
    inner = cfg["heads"] * cfg["dim_head"]
    keys = iter(jax.random.split(key, 256))

    params = {
        "img_proj_w": nrm(next(keys), (cfg["img_dim"], dim)),
        "img_proj_b": nrm(next(keys), (dim,)),
        "state_proj_w": nrm(next(keys), (cfg["state_dim"], dim)),
        "state_proj_b": nrm(next(keys), (dim,)),
        "action_token": nrm(next(keys), (cfg["num_action_tokens"], dim)),
        "pos_embedding": create_sinusoidal_pos_embedding(
            cfg["num_text_tokens"] + cfg["num_img_tokens"]
            + cfg["num_state_tokens"] + cfg["num_action_tokens"], dim),
        "final_ln_g": jnp.ones((dim,), jnp.float32),
        "final_ln_b": jnp.zeros((dim,), jnp.float32),
        "head_ln_g": jnp.ones((dim,), jnp.float32),
        "head_ln_b": jnp.zeros((dim,), jnp.float32),
        "head_w1": nrm(next(keys), (dim, dim)),
        "head_b1": nrm(next(keys), (dim,)),
        "head_w2": nrm(next(keys), (dim, cfg["action_dim"])),
        "head_b2": nrm(next(keys), (cfg["action_dim"],)),
        "layers": [],
    }
    for _ in range(cfg["depth"]):
        layer = {
            "attn_ln_g": jnp.ones((dim,), jnp.float32),
            "attn_ln_b": jnp.zeros((dim,), jnp.float32),
            "to_qkv_w": nrm(next(keys), (dim, 3 * inner)),        # bias=False
            "mha_wq": nrm(next(keys), (inner, inner)),            # MHA in_proj (no bias)
            "mha_wk": nrm(next(keys), (inner, inner)),
            "mha_wv": nrm(next(keys), (inner, inner)),
            "mha_wo": nrm(next(keys), (inner, inner)),            # MHA out_proj (no bias)
            "to_out_w": nrm(next(keys), (inner, dim)),            # bias=False
            "ff_ln_g": jnp.ones((dim,), jnp.float32),
            "ff_ln_b": jnp.zeros((dim,), jnp.float32),
            "ff_w1": nrm(next(keys), (dim, cfg["mlp_dim"])),
            "ff_b1": nrm(next(keys), (cfg["mlp_dim"],)),
            "ff_w2": nrm(next(keys), (cfg["mlp_dim"], dim)),
            "ff_b2": nrm(next(keys), (dim,)),
        }
        params["layers"].append(layer)
    return params


def fold_params(params, cfg):
    """Pre-fold chained no-bias projections & pad/stack for the fused kernel.

    Done once, outside the forward path.  Mathematically exact (no bias or
    nonlinearity between the folded matmuls).
    """
    dim = cfg["dim"]
    inner = cfg["heads"] * cfg["dim_head"]
    action_dim = cfg["action_dim"]
    npad = _pad128(action_dim)

    def r1(v):
        return jnp.asarray(v, jnp.float32).reshape(1, -1)

    layers = params["layers"]

    def wqkv_eff(l):
        return jnp.concatenate(
            [l["to_qkv_w"][:, :inner] @ l["mha_wq"],
             l["to_qkv_w"][:, inner:2 * inner] @ l["mha_wk"],
             l["to_qkv_w"][:, 2 * inner:] @ l["mha_wv"]], axis=1)        # (dim, 3*inner)

    fused = {
        "img_w": params["img_proj_w"], "img_b": r1(params["img_proj_b"]),
        "state_w": params["state_proj_w"], "state_b": r1(params["state_proj_b"]),
        "action_tok": params["action_token"],
        "pos": params["pos_embedding"],
        "ln1_g": jnp.stack([r1(l["attn_ln_g"]) for l in layers]),
        "ln1_b": jnp.stack([r1(l["attn_ln_b"]) for l in layers]),
        "wqkv": jnp.stack([wqkv_eff(l) for l in layers]),
        "wo": jnp.stack([l["mha_wo"] @ l["to_out_w"] for l in layers]),
        "ln2_g": jnp.stack([r1(l["ff_ln_g"]) for l in layers]),
        "ln2_b": jnp.stack([r1(l["ff_ln_b"]) for l in layers]),
        "ff_w1": jnp.stack([l["ff_w1"] for l in layers]),
        "ff_b1": jnp.stack([r1(l["ff_b1"]) for l in layers]),
        "ff_w2": jnp.stack([l["ff_w2"] for l in layers]),
        "ff_b2": jnp.stack([r1(l["ff_b2"]) for l in layers]),
        "fin_g": r1(params["final_ln_g"]), "fin_b": r1(params["final_ln_b"]),
        "head_g": r1(params["head_ln_g"]), "head_b": r1(params["head_ln_b"]),
        "head_w1": params["head_w1"], "head_b1": r1(params["head_b1"]),
        # Lane-dense (128-wide) padded action projection; sliced in the wrapper.
        "head_w2": jnp.zeros((dim, npad), jnp.float32).at[:, :action_dim].set(
            params["head_w2"]),
        "head_b2": jnp.zeros((1, npad), jnp.float32).at[0, :action_dim].set(
            params["head_b2"]),
    }
    return fused


# ----------------------------------------------------------------------------
# SimpleGRP forward: one fused pallas_call
# ----------------------------------------------------------------------------

def simple_grp_forward(fused, batch, cfg):
    image = batch["image"].astype(jnp.float32)        # (B, Ti, img_dim)
    state = batch["state"].astype(jnp.float32)        # (B, state_dim)
    text = batch["text_tokens"].astype(jnp.float32)   # (B, Tt, dim)
    mask = batch["att_mask"].astype(jnp.float32)      # (S, S)

    B, Ti, img_dim = image.shape
    Tt = text.shape[1]
    dim = cfg["dim"]
    heads, dim_head = cfg["heads"], cfg["dim_head"]
    inner = heads * dim_head
    na = cfg["num_action_tokens"]
    depth = cfg["depth"]
    assert cfg["num_state_tokens"] == 1
    S = Tt + Ti + 1 + na
    npad = _pad128(cfg["action_dim"])

    kernel = functools.partial(
        _grp_fused_kernel,
        B=B, S=S, Tt=Tt, Ti=Ti, na=na, heads=heads, dim_head=dim_head,
        inner=inner, depth=depth, eps=1e-5, scale=1.0 / math.sqrt(dim_head))

    vmem = pl.BlockSpec(memory_space=pltpu.MemorySpace.VMEM)
    inputs = [
        image.reshape(B * Ti, img_dim), state, text.reshape(B * Tt, dim), mask,
        fused["img_w"], fused["img_b"], fused["state_w"], fused["state_b"],
        fused["action_tok"], fused["pos"],
        fused["ln1_g"], fused["ln1_b"], fused["wqkv"], fused["wo"],
        fused["ln2_g"], fused["ln2_b"], fused["ff_w1"], fused["ff_b1"],
        fused["ff_w2"], fused["ff_b2"],
        fused["fin_g"], fused["fin_b"],
        fused["head_g"], fused["head_b"], fused["head_w1"], fused["head_b1"],
        fused["head_w2"], fused["head_b2"],
    ]

    out_padded = pl.pallas_call(
        kernel,
        out_shape=jax.ShapeDtypeStruct((B * na, npad), jnp.float32),
        in_specs=[vmem] * len(inputs),
        out_specs=vmem,
    )(*inputs)

    action_chunk = out_padded[:, :cfg["action_dim"]].reshape(B, na, cfg["action_dim"])
    att_map = ()  # return_att=False path of the reference module
    return action_chunk, att_map


# ----------------------------------------------------------------------------
# Main
# ----------------------------------------------------------------------------

if __name__ == "__main__":
    cfg = dict(
        state_dim=6, action_dim=5, dim=32, depth=2, heads=4, dim_head=8,
        mlp_dim=64, img_dim=16, num_img_tokens=4, num_text_tokens=2,
        num_state_tokens=1, num_action_tokens=3,
    )
    B = 2
    S = (cfg["num_text_tokens"] + cfg["num_img_tokens"]
         + cfg["num_state_tokens"] + cfg["num_action_tokens"])

    root = jax.random.PRNGKey(0)
    k_param, k_img, k_state, k_text = jax.random.split(root, 4)

    params = init_params(k_param, cfg)
    fused = fold_params(params, cfg)

    # Additive float attention mask (causal), same semantics as a torch float attn_mask.
    causal = jnp.tril(jnp.ones((S, S), jnp.float32))
    att_mask = jnp.where(causal > 0, 0.0, -1e9).astype(jnp.float32)

    batch = {
        "image": jax.random.normal(k_img, (B, cfg["num_img_tokens"], cfg["img_dim"]),
                                   dtype=jnp.float32),
        "state": jax.random.normal(k_state, (B, cfg["state_dim"]), dtype=jnp.float32),
        "text_tokens": jax.random.normal(k_text, (B, cfg["num_text_tokens"], cfg["dim"]),
                                         dtype=jnp.float32),
        "att_mask": att_mask,
    }

    action_chunk, att_map = simple_grp_forward(fused, batch, cfg)
    action_chunk = jax.block_until_ready(action_chunk)
    assert action_chunk.shape == (B, cfg["num_action_tokens"], cfg["action_dim"])
    assert bool(jnp.all(jnp.isfinite(action_chunk)))
    print("KERNEL_OK")
</pallas_src>

<mosaic_0001>
module attributes {stable_mosaic.version = 11 : i64} {
  func.func @_grp_fused_kernel(%arg0: memref<8x16xf32, #tpu.memory_space<vmem>>, %arg1: memref<2x6xf32, #tpu.memory_space<vmem>>, %arg2: memref<4x32xf32, #tpu.memory_space<vmem>>, %arg3: memref<10x10xf32, #tpu.memory_space<vmem>>, %arg4: memref<16x32xf32, #tpu.memory_space<vmem>>, %arg5: memref<1x32xf32, #tpu.memory_space<vmem>>, %arg6: memref<6x32xf32, #tpu.memory_space<vmem>>, %arg7: memref<1x32xf32, #tpu.memory_space<vmem>>, %arg8: memref<3x32xf32, #tpu.memory_space<vmem>>, %arg9: memref<10x32xf32, #tpu.memory_space<vmem>>, %arg10: memref<2x1x32xf32, #tpu.memory_space<vmem>>, %arg11: memref<2x1x32xf32, #tpu.memory_space<vmem>>, %arg12: memref<2x32x96xf32, #tpu.memory_space<vmem>>, %arg13: memref<2x32x32xf32, #tpu.memory_space<vmem>>, %arg14: memref<2x1x32xf32, #tpu.memory_space<vmem>>, %arg15: memref<2x1x32xf32, #tpu.memory_space<vmem>>, %arg16: memref<2x32x64xf32, #tpu.memory_space<vmem>>, %arg17: memref<2x1x64xf32, #tpu.memory_space<vmem>>, %arg18: memref<2x64x32xf32, #tpu.memory_space<vmem>>, %arg19: memref<2x1x32xf32, #tpu.memory_space<vmem>>, %arg20: memref<1x32xf32, #tpu.memory_space<vmem>>, %arg21: memref<1x32xf32, #tpu.memory_space<vmem>>, %arg22: memref<1x32xf32, #tpu.memory_space<vmem>>, %arg23: memref<1x32xf32, #tpu.memory_space<vmem>>, %arg24: memref<32x32xf32, #tpu.memory_space<vmem>>, %arg25: memref<1x32xf32, #tpu.memory_space<vmem>>, %arg26: memref<32x128xf32, #tpu.memory_space<vmem>>, %arg27: memref<1x128xf32, #tpu.memory_space<vmem>>, %arg28: memref<6x128xf32, #tpu.memory_space<vmem>>) attributes {dimension_semantics = [], scalar_prefetch = 0 : i64, scratch_operands = 0 : i64, tpu.core_type = #tpu.core_type<tc>} {
    %c0 = arith.constant 0 : index
    %c0_0 = arith.constant 0 : index
    %0 = vector.load %arg9[%c0, %c0_0] : memref<10x32xf32, #tpu.memory_space<vmem>>, vector<10x32xf32>
    %c0_1 = arith.constant 0 : index
    %c0_2 = arith.constant 0 : index
    %1 = vector.load %arg0[%c0_1, %c0_2] : memref<8x16xf32, #tpu.memory_space<vmem>>, vector<8x16xf32>
    %c0_3 = arith.constant 0 : index
    %c0_4 = arith.constant 0 : index
    %2 = vector.load %arg4[%c0_3, %c0_4] : memref<16x32xf32, #tpu.memory_space<vmem>>, vector<16x32xf32>
    %cst = arith.constant dense<0.000000e+00> : vector<8x32xf32>
    %3 = tpu.matmul %1, %2, %cst {dimension_numbers = #tpu.dot_dimension_numbers<[1], [0], [0], [1], [0, 0, 1, 1], [], []>} : vector<8x16xf32>, vector<16x32xf32>, vector<8x32xf32> -> vector<8x32xf32>
    %c0_5 = arith.constant 0 : index
    %c0_6 = arith.constant 0 : index
    %4 = vector.load %arg5[%c0_5, %c0_6] : memref<1x32xf32, #tpu.memory_space<vmem>>, vector<1x32xf32>
    %5 = vector.broadcast %4 : vector<1x32xf32> to vector<8x32xf32>
    %6 = arith.addf %3, %5 : vector<8x32xf32>
    %c0_7 = arith.constant 0 : index
    %c0_8 = arith.constant 0 : index
    %7 = vector.load %arg1[%c0_7, %c0_8] : memref<2x6xf32, #tpu.memory_space<vmem>>, vector<2x6xf32>
    %c0_9 = arith.constant 0 : index
    %c0_10 = arith.constant 0 : index
    %8 = vector.load %arg6[%c0_9, %c0_10] : memref<6x32xf32, #tpu.memory_space<vmem>>, vector<6x32xf32>
    %cst_11 = arith.constant dense<0.000000e+00> : vector<2x32xf32>
    %9 = tpu.matmul %7, %8, %cst_11 {dimension_numbers = #tpu.dot_dimension_numbers<[1], [0], [0], [1], [0, 0, 1, 1], [], []>} : vector<2x6xf32>, vector<6x32xf32>, vector<2x32xf32> -> vector<2x32xf32>
    %c0_12 = arith.constant 0 : index
    %c0_13 = arith.constant 0 : index
    %10 = vector.load %arg7[%c0_12, %c0_13] : memref<1x32xf32, #tpu.memory_space<vmem>>, vector<1x32xf32>
    %11 = vector.broadcast %10 : vector<1x32xf32> to vector<2x32xf32>
    %12 = arith.addf %9, %11 : vector<2x32xf32>
    %c0_14 = arith.constant 0 : index
    %c0_15 = arith.constant 0 : index
    %13 = vector.load %arg2[%c0_14, %c0_15] : memref<4x32xf32, #tpu.memory_space<vmem>>, vector<4x32xf32>
    %c0_16 = arith.constant 0 : index
    %c0_17 = arith.constant 0 : index
    %14 = vector.load %arg8[%c0_16, %c0_17] : memref<3x32xf32, #tpu.memory_space<vmem>>, vector<3x32xf32>
    %15 = vector.extract_strided_slice %13 {offsets = [0, 0], sizes = [2, 32], strides = [1, 1]} : vector<4x32xf32> to vector<2x32xf32>
    %16 = vector.extract_strided_slice %0 {offsets = [0, 0], sizes = [2, 32], strides = [1, 1]} : vector<10x32xf32> to vector<2x32xf32>
    %17 = arith.addf %15, %16 : vector<2x32xf32>
    %18 = vector.extract_strided_slice %6 {offsets = [0, 0], sizes = [4, 32], strides = [1, 1]} : vector<8x32xf32> to vector<4x32xf32>
    %19 = vector.extract_strided_slice %0 {offsets = [2, 0], sizes = [4, 32], strides = [1, 1]} : vector<10x32xf32> to vector<4x32xf32>
    %20 = arith.addf %18, %19 : vector<4x32xf32>
    %21 = vector.extract_strided_slice %12 {offsets = [0, 0], sizes = [1, 32], strides = [1, 1]} : vector<2x32xf32> to vector<1x32xf32>
    %22 = vector.extract_strided_slice %0 {offsets = [6, 0], sizes = [1, 32], strides = [1, 1]} : vector<10x32xf32> to vector<1x32xf32>
    %23 = arith.addf %21, %22 : vector<1x32xf32>
    %24 = vector.extract_strided_slice %0 {offsets = [7, 0], sizes = [3, 32], strides = [1, 1]} : vector<10x32xf32> to vector<3x32xf32>
    %25 = arith.addf %14, %24 : vector<3x32xf32>
    %26 = vector.extract_strided_slice %13 {offsets = [2, 0], sizes = [2, 32], strides = [1, 1]} : vector<4x32xf32> to vector<2x32xf32>
    %27 = vector.extract_strided_slice %0 {offsets = [0, 0], sizes = [2, 32], strides = [1, 1]} : vector<10x32xf32> to vector<2x32xf32>
    %28 = arith.addf %26, %27 : vector<2x32xf32>
    %29 = vector.extract_strided_slice %6 {offsets = [4, 0], sizes = [4, 32], strides = [1, 1]} : vector<8x32xf32> to vector<4x32xf32>
    %30 = vector.extract_strided_slice %0 {offsets = [2, 0], sizes = [4, 32], strides = [1, 1]} : vector<10x32xf32> to vector<4x32xf32>
    %31 = arith.addf %29, %30 : vector<4x32xf32>
    %32 = vector.extract_strided_slice %12 {offsets = [1, 0], sizes = [1, 32], strides = [1, 1]} : vector<2x32xf32> to vector<1x32xf32>
    %33 = vector.extract_strided_slice %0 {offsets = [6, 0], sizes = [1, 32], strides = [1, 1]} : vector<10x32xf32> to vector<1x32xf32>
    %34 = arith.addf %32, %33 : vector<1x32xf32>
    %35 = vector.extract_strided_slice %0 {offsets = [7, 0], sizes = [3, 32], strides = [1, 1]} : vector<10x32xf32> to vector<3x32xf32>
    %36 = arith.addf %14, %35 : vector<3x32xf32>
    %37 = tpu.concatenate %17, %20, %23, %25, %28, %31, %34, %36 in 0 : vector<2x32xf32>, vector<4x32xf32>, vector<1x32xf32>, vector<3x32xf32>, vector<2x32xf32>, vector<4x32xf32>, vector<1x32xf32>, vector<3x32xf32> -> vector<20x32xf32>
    %c0_18 = arith.constant 0 : index
    %c0_19 = arith.constant 0 : index
    %38 = vector.load %arg3[%c0_18, %c0_19] : memref<10x10xf32, #tpu.memory_space<vmem>>, vector<10x10xf32>
    %c0_20 = arith.constant 0 : index
    %c0_21 = arith.constant 0 : index
    %c0_22 = arith.constant 0 : index
    %39 = vector.load %arg10[%c0_20, %c0_21, %c0_22] : memref<2x1x32xf32, #tpu.memory_space<vmem>>, vector<1x1x32xf32>
    %40 = vector.shape_cast %39 : vector<1x1x32xf32> to vector<1x32xf32>
    %c0_23 = arith.constant 0 : index
    %c0_24 = arith.constant 0 : index
    %c0_25 = arith.constant 0 : index
    %41 = vector.load %arg11[%c0_23, %c0_24, %c0_25] : memref<2x1x32xf32, #tpu.memory_space<vmem>>, vector<1x1x32xf32>
    %42 = vector.shape_cast %41 : vector<1x1x32xf32> to vector<1x32xf32>
    %cst_26 = arith.constant dense<0.000000e+00> : vector<20xf32>
    %43 = vector.multi_reduction <add>, %37, %cst_26 [1] : vector<20x32xf32> to vector<20xf32>
    %44 = vector.shape_cast %43 : vector<20xf32> to vector<20x1xf32>
    %cst_27 = arith.constant 3.200000e+01 : f32
    %45 = vector.broadcast %cst_27 : f32 to vector<20x1xf32>
    %46 = arith.divf %44, %45 : vector<20x1xf32>
    %47 = vector.broadcast %46 : vector<20x1xf32> to vector<20x32xf32>
    %48 = arith.subf %37, %47 : vector<20x32xf32>
    %49 = arith.mulf %48, %48 : vector<20x32xf32>
    %cst_28 = arith.constant dense<0.000000e+00> : vector<20xf32>
    %50 = vector.multi_reduction <add>, %49, %cst_28 [1] : vector<20x32xf32> to vector<20xf32>
    %51 = vector.shape_cast %50 : vector<20xf32> to vector<20x1xf32>
    %cst_29 = arith.constant 3.200000e+01 : f32
    %52 = vector.broadcast %cst_29 : f32 to vector<20x1xf32>
    %53 = arith.divf %51, %52 : vector<20x1xf32>
    %cst_30 = arith.constant 9.99999974E-6 : f32
    %54 = vector.broadcast %cst_30 : f32 to vector<20x1xf32>
    %55 = arith.addf %53, %54 : vector<20x1xf32>
    %56 = math.rsqrt %55 : vector<20x1xf32>
    %57 = vector.broadcast %56 : vector<20x1xf32> to vector<20x32xf32>
    %58 = arith.mulf %48, %57 : vector<20x32xf32>
    %59 = vector.broadcast %40 : vector<1x32xf32> to vector<20x32xf32>
    %60 = arith.mulf %58, %59 : vector<20x32xf32>
    %61 = vector.broadcast %42 : vector<1x32xf32> to vector<20x32xf32>
    %62 = arith.addf %60, %61 : vector<20x32xf32>
    %c0_31 = arith.constant 0 : index
    %c0_32 = arith.constant 0 : index
    %c0_33 = arith.constant 0 : index
    %63 = vector.load %arg12[%c0_31, %c0_32, %c0_33] : memref<2x32x96xf32, #tpu.memory_space<vmem>>, vector<1x32x96xf32>
    %64 = vector.shape_cast %63 : vector<1x32x96xf32> to vector<32x96xf32>
    %cst_34 = arith.constant dense<0.000000e+00> : vector<20x96xf32>
    %65 = tpu.matmul %62, %64, %cst_34 {dimension_numbers = #tpu.dot_dimension_numbers<[1], [0], [0], [1], [0, 0, 1, 1], [], []>} : vector<20x32xf32>, vector<32x96xf32>, vector<20x96xf32> -> vector<20x96xf32>
    %66 = vector.extract_strided_slice %65 {offsets = [0, 0], sizes = [10, 8], strides = [1, 1]} : vector<20x96xf32> to vector<10x8xf32>
    %67 = vector.extract_strided_slice %65 {offsets = [0, 32], sizes = [10, 8], strides = [1, 1]} : vector<20x96xf32> to vector<10x8xf32>
    %68 = vector.extract_strided_slice %65 {offsets = [0, 64], sizes = [10, 8], strides = [1, 1]} : vector<20x96xf32> to vector<10x8xf32>
    %cst_35 = arith.constant dense<0.000000e+00> : vector<10x10xf32>
    %69 = tpu.matmul %66, %67, %cst_35 {dimension_numbers = #tpu.dot_dimension_numbers<[1], [1], [0], [0], [0, 0, 1, 0], [], []>} : vector<10x8xf32>, vector<10x8xf32>, vector<10x10xf32> -> vector<10x10xf32>
    %cst_36 = arith.constant 0.353553385 : f32
    %70 = vector.broadcast %cst_36 : f32 to vector<10x10xf32>
    %71 = arith.mulf %69, %70 : vector<10x10xf32>
    %72 = arith.addf %71, %38 : vector<10x10xf32>
    %cst_37 = arith.constant dense<0xFF800000> : vector<10xf32>
    %73 = vector.multi_reduction <maximumf>, %72, %cst_37 [1] : vector<10x10xf32> to vector<10xf32>
    %74 = vector.shape_cast %73 : vector<10xf32> to vector<10x1xf32>
    %75 = vector.broadcast %74 : vector<10x1xf32> to vector<10x10xf32>
    %76 = arith.subf %72, %75 : vector<10x10xf32>
    %77 = math.exp %76 : vector<10x10xf32>
    %cst_38 = arith.constant dense<0.000000e+00> : vector<10xf32>
    %78 = vector.multi_reduction <add>, %77, %cst_38 [1] : vector<10x10xf32> to vector<10xf32>
    %79 = vector.shape_cast %78 : vector<10xf32> to vector<10x1xf32>
    %80 = tpu.reciprocal %79 {approx = true} : vector<10x1xf32> -> vector<10x1xf32>
    %81 = vector.broadcast %80 : vector<10x1xf32> to vector<10x10xf32>
    %82 = arith.mulf %77, %81 : vector<10x10xf32>
    %cst_39 = arith.constant dense<0.000000e+00> : vector<10x8xf32>
    %83 = tpu.matmul %82, %68, %cst_39 {dimension_numbers = #tpu.dot_dimension_numbers<[1], [0], [0], [1], [0, 0, 1, 1], [], []>} : vector<10x10xf32>, vector<10x8xf32>, vector<10x8xf32> -> vector<10x8xf32>
    %84 = vector.extract_strided_slice %65 {offsets = [0, 8], sizes = [10, 8], strides = [1, 1]} : vector<20x96xf32> to vector<10x8xf32>
    %85 = vector.extract_strided_slice %65 {offsets = [0, 40], sizes = [10, 8], strides = [1, 1]} : vector<20x96xf32> to vector<10x8xf32>
    %86 = vector.extract_strided_slice %65 {offsets = [0, 72], sizes = [10, 8], strides = [1, 1]} : vector<20x96xf32> to vector<10x8xf32>
    %cst_40 = arith.constant dense<0.000000e+00> : vector<10x10xf32>
    %87 = tpu.matmul %84, %85, %cst_40 {dimension_numbers = #tpu.dot_dimension_numbers<[1], [1], [0], [0], [0, 0, 1, 0], [], []>} : vector<10x8xf32>, vector<10x8xf32>, vector<10x10xf32> -> vector<10x10xf32>
    %cst_41 = arith.constant 0.353553385 : f32
    %88 = vector.broadcast %cst_41 : f32 to vector<10x10xf32>
    %89 = arith.mulf %87, %88 : vector<10x10xf32>
    %90 = arith.addf %89, %38 : vector<10x10xf32>
    %cst_42 = arith.constant dense<0xFF800000> : vector<10xf32>
    %91 = vector.multi_reduction <maximumf>, %90, %cst_42 [1] : vector<10x10xf32> to vector<10xf32>
    %92 = vector.shape_cast %91 : vector<10xf32> to vector<10x1xf32>
    %93 = vector.broadcast %92 : vector<10x1xf32> to vector<10x10xf32>
    %94 = arith.subf %90, %93 : vector<10x10xf32>
    %95 = math.exp %94 : vector<10x10xf32>
    %cst_43 = arith.constant dense<0.000000e+00> : vector<10xf32>
    %96 = vector.multi_reduction <add>, %95, %cst_43 [1] : vector<10x10xf32> to vector<10xf32>
    %97 = vector.shape_cast %96 : vector<10xf32> to vector<10x1xf32>
    %98 = tpu.reciprocal %97 {approx = true} : vector<10x1xf32> -> vector<10x1xf32>
    %99 = vector.broadcast %98 : vector<10x1xf32> to vector<10x10xf32>
    %100 = arith.mulf %95, %99 : vector<10x10xf32>
    %cst_44 = arith.constant dense<0.000000e+00> : vector<10x8xf32>
    %101 = tpu.matmul %100, %86, %cst_44 {dimension_numbers = #tpu.dot_dimension_numbers<[1], [0], [0], [1], [0, 0, 1, 1], [], []>} : vector<10x10xf32>, vector<10x8xf32>, vector<10x8xf32> -> vector<10x8xf32>
    %102 = vector.extract_strided_slice %65 {offsets = [0, 16], sizes = [10, 8], strides = [1, 1]} : vector<20x96xf32> to vector<10x8xf32>
    %103 = vector.extract_strided_slice %65 {offsets = [0, 48], sizes = [10, 8], strides = [1, 1]} : vector<20x96xf32> to vector<10x8xf32>
    %104 = vector.extract_strided_slice %65 {offsets = [0, 80], sizes = [10, 8], strides = [1, 1]} : vector<20x96xf32> to vector<10x8xf32>
    %cst_45 = arith.constant dense<0.000000e+00> : vector<10x10xf32>
    %105 = tpu.matmul %102, %103, %cst_45 {dimension_numbers = #tpu.dot_dimension_numbers<[1], [1], [0], [0], [0, 0, 1, 0], [], []>} : vector<10x8xf32>, vector<10x8xf32>, vector<10x10xf32> -> vector<10x10xf32>
    %cst_46 = arith.constant 0.353553385 : f32
    %106 = vector.broadcast %cst_46 : f32 to vector<10x10xf32>
    %107 = arith.mulf %105, %106 : vector<10x10xf32>
    %108 = arith.addf %107, %38 : vector<10x10xf32>
    %cst_47 = arith.constant dense<0xFF800000> : vector<10xf32>
    %109 = vector.multi_reduction <maximumf>, %108, %cst_47 [1] : vector<10x10xf32> to vector<10xf32>
    %110 = vector.shape_cast %109 : vector<10xf32> to vector<10x1xf32>
    %111 = vector.broadcast %110 : vector<10x1xf32> to vector<10x10xf32>
    %112 = arith.subf %108, %111 : vector<10x10xf32>
    %113 = math.exp %112 : vector<10x10xf32>
    %cst_48 = arith.constant dense<0.000000e+00> : vector<10xf32>
    %114 = vector.multi_reduction <add>, %113, %cst_48 [1] : vector<10x10xf32> to vector<10xf32>
    %115 = vector.shape_cast %114 : vector<10xf32> to vector<10x1xf32>
    %116 = tpu.reciprocal %115 {approx = true} : vector<10x1xf32> -> vector<10x1xf32>
    %117 = vector.broadcast %116 : vector<10x1xf32> to vector<10x10xf32>
    %118 = arith.mulf %113, %117 : vector<10x10xf32>
    %cst_49 = arith.constant dense<0.000000e+00> : vector<10x8xf32>
    %119 = tpu.matmul %118, %104, %cst_49 {dimension_numbers = #tpu.dot_dimension_numbers<[1], [0], [0], [1], [0, 0, 1, 1], [], []>} : vector<10x10xf32>, vector<10x8xf32>, vector<10x8xf32> -> vector<10x8xf32>
    %120 = vector.extract_strided_slice %65 {offsets = [0, 24], sizes = [10, 8], strides = [1, 1]} : vector<20x96xf32> to vector<10x8xf32>
    %121 = vector.extract_strided_slice %65 {offsets = [0, 56], sizes = [10, 8], strides = [1, 1]} : vector<20x96xf32> to vector<10x8xf32>
    %122 = vector.extract_strided_slice %65 {offsets = [0, 88], sizes = [10, 8], strides = [1, 1]} : vector<20x96xf32> to vector<10x8xf32>
    %cst_50 = arith.constant dense<0.000000e+00> : vector<10x10xf32>
    %123 = tpu.matmul %120, %121, %cst_50 {dimension_numbers = #tpu.dot_dimension_numbers<[1], [1], [0], [0], [0, 0, 1, 0], [], []>} : vector<10x8xf32>, vector<10x8xf32>, vector<10x10xf32> -> vector<10x10xf32>
    %cst_51 = arith.constant 0.353553385 : f32
    %124 = vector.broadcast %cst_51 : f32 to vector<10x10xf32>
    %125 = arith.mulf %123, %124 : vector<10x10xf32>
    %126 = arith.addf %125, %38 : vector<10x10xf32>
    %cst_52 = arith.constant dense<0xFF800000> : vector<10xf32>
    %127 = vector.multi_reduction <maximumf>, %126, %cst_52 [1] : vector<10x10xf32> to vector<10xf32>
    %128 = vector.shape_cast %127 : vector<10xf32> to vector<10x1xf32>
    %129 = vector.broadcast %128 : vector<10x1xf32> to vector<10x10xf32>
    %130 = arith.subf %126, %129 : vector<10x10xf32>
    %131 = math.exp %130 : vector<10x10xf32>
    %cst_53 = arith.constant dense<0.000000e+00> : vector<10xf32>
    %132 = vector.multi_reduction <add>, %131, %cst_53 [1] : vector<10x10xf32> to vector<10xf32>
    %133 = vector.shape_cast %132 : vector<10xf32> to vector<10x1xf32>
    %134 = tpu.reciprocal %133 {approx = true} : vector<10x1xf32> -> vector<10x1xf32>
    %135 = vector.broadcast %134 : vector<10x1xf32> to vector<10x10xf32>
    %136 = arith.mulf %131, %135 : vector<10x10xf32>
    %cst_54 = arith.constant dense<0.000000e+00> : vector<10x8xf32>
    %137 = tpu.matmul %136, %122, %cst_54 {dimension_numbers = #tpu.dot_dimension_numbers<[1], [0], [0], [1], [0, 0, 1, 1], [], []>} : vector<10x10xf32>, vector<10x8xf32>, vector<10x8xf32> -> vector<10x8xf32>
    %138 = tpu.concatenate %83, %101, %119, %137 in 1 : vector<10x8xf32>, vector<10x8xf32>, vector<10x8xf32>, vector<10x8xf32> -> vector<10x32xf32>
    %139 = vector.extract_strided_slice %65 {offsets = [10, 0], sizes = [10, 8], strides = [1, 1]} : vector<20x96xf32> to vector<10x8xf32>
    %140 = vector.extract_strided_slice %65 {offsets = [10, 32], sizes = [10, 8], strides = [1, 1]} : vector<20x96xf32> to vector<10x8xf32>
    %141 = vector.extract_strided_slice %65 {offsets = [10, 64], sizes = [10, 8], strides = [1, 1]} : vector<20x96xf32> to vector<10x8xf32>
    %cst_55 = arith.constant dense<0.000000e+00> : vector<10x10xf32>
    %142 = tpu.matmul %139, %140, %cst_55 {dimension_numbers = #tpu.dot_dimension_numbers<[1], [1], [0], [0], [0, 0, 1, 0], [], []>} : vector<10x8xf32>, vector<10x8xf32>, vector<10x10xf32> -> vector<10x10xf32>
    %cst_56 = arith.constant 0.353553385 : f32
    %143 = vector.broadcast %cst_56 : f32 to vector<10x10xf32>
    %144 = arith.mulf %142, %143 : vector<10x10xf32>
    %145 = arith.addf %144, %38 : vector<10x10xf32>
    %cst_57 = arith.constant dense<0xFF800000> : vector<10xf32>
    %146 = vector.multi_reduction <maximumf>, %145, %cst_57 [1] : vector<10x10xf32> to vector<10xf32>
    %147 = vector.shape_cast %146 : vector<10xf32> to vector<10x1xf32>
    %148 = vector.broadcast %147 : vector<10x1xf32> to vector<10x10xf32>
    %149 = arith.subf %145, %148 : vector<10x10xf32>
    %150 = math.exp %149 : vector<10x10xf32>
    %cst_58 = arith.constant dense<0.000000e+00> : vector<10xf32>
    %151 = vector.multi_reduction <add>, %150, %cst_58 [1] : vector<10x10xf32> to vector<10xf32>
    %152 = vector.shape_cast %151 : vector<10xf32> to vector<10x1xf32>
    %153 = tpu.reciprocal %152 {approx = true} : vector<10x1xf32> -> vector<10x1xf32>
    %154 = vector.broadcast %153 : vector<10x1xf32> to vector<10x10xf32>
    %155 = arith.mulf %150, %154 : vector<10x10xf32>
    %cst_59 = arith.constant dense<0.000000e+00> : vector<10x8xf32>
    %156 = tpu.matmul %155, %141, %cst_59 {dimension_numbers = #tpu.dot_dimension_numbers<[1], [0], [0], [1], [0, 0, 1, 1], [], []>} : vector<10x10xf32>, vector<10x8xf32>, vector<10x8xf32> -> vector<10x8xf32>
    %157 = vector.extract_strided_slice %65 {offsets = [10, 8], sizes = [10, 8], strides = [1, 1]} : vector<20x96xf32> to vector<10x8xf32>
    %158 = vector.extract_strided_slice %65 {offsets = [10, 40], sizes = [10, 8], strides = [1, 1]} : vector<20x96xf32> to vector<10x8xf32>
    %159 = vector.extract_strided_slice %65 {offsets = [10, 72], sizes = [10, 8], strides = [1, 1]} : vector<20x96xf32> to vector<10x8xf32>
    %cst_60 = arith.constant dense<0.000000e+00> : vector<10x10xf32>
    %160 = tpu.matmul %157, %158, %cst_60 {dimension_numbers = #tpu.dot_dimension_numbers<[1], [1], [0], [0], [0, 0, 1, 0], [], []>} : vector<10x8xf32>, vector<10x8xf32>, vector<10x10xf32> -> vector<10x10xf32>
    %cst_61 = arith.constant 0.353553385 : f32
    %161 = vector.broadcast %cst_61 : f32 to vector<10x10xf32>
    %162 = arith.mulf %160, %161 : vector<10x10xf32>
    %163 = arith.addf %162, %38 : vector<10x10xf32>
    %cst_62 = arith.constant dense<0xFF800000> : vector<10xf32>
    %164 = vector.multi_reduction <maximumf>, %163, %cst_62 [1] : vector<10x10xf32> to vector<10xf32>
    %165 = vector.shape_cast %164 : vector<10xf32> to vector<10x1xf32>
    %166 = vector.broadcast %165 : vector<10x1xf32> to vector<10x10xf32>
    %167 = arith.subf %163, %166 : vector<10x10xf32>
    %168 = math.exp %167 : vector<10x10xf32>
    %cst_63 = arith.constant dense<0.000000e+00> : vector<10xf32>
    %169 = vector.multi_reduction <add>, %168, %cst_63 [1] : vector<10x10xf32> to vector<10xf32>
    %170 = vector.shape_cast %169 : vector<10xf32> to vector<10x1xf32>
    %171 = tpu.reciprocal %170 {approx = true} : vector<10x1xf32> -> vector<10x1xf32>
    %172 = vector.broadcast %171 : vector<10x1xf32> to vector<10x10xf32>
    %173 = arith.mulf %168, %172 : vector<10x10xf32>
    %cst_64 = arith.constant dense<0.000000e+00> : vector<10x8xf32>
    %174 = tpu.matmul %173, %159, %cst_64 {dimension_numbers = #tpu.dot_dimension_numbers<[1], [0], [0], [1], [0, 0, 1, 1], [], []>} : vector<10x10xf32>, vector<10x8xf32>, vector<10x8xf32> -> vector<10x8xf32>
    %175 = vector.extract_strided_slice %65 {offsets = [10, 16], sizes = [10, 8], strides = [1, 1]} : vector<20x96xf32> to vector<10x8xf32>
    %176 = vector.extract_strided_slice %65 {offsets = [10, 48], sizes = [10, 8], strides = [1, 1]} : vector<20x96xf32> to vector<10x8xf32>
    %177 = vector.extract_strided_slice %65 {offsets = [10, 80], sizes = [10, 8], strides = [1, 1]} : vector<20x96xf32> to vector<10x8xf32>
    %cst_65 = arith.constant dense<0.000000e+00> : vector<10x10xf32>
    %178 = tpu.matmul %175, %176, %cst_65 {dimension_numbers = #tpu.dot_dimension_numbers<[1], [1], [0], [0], [0, 0, 1, 0], [], []>} : vector<10x8xf32>, vector<10x8xf32>, vector<10x10xf32> -> vector<10x10xf32>
    %cst_66 = arith.constant 0.353553385 : f32
    %179 = vector.broadcast %cst_66 : f32 to vector<10x10xf32>
    %180 = arith.mulf %178, %179 : vector<10x10xf32>
    %181 = arith.addf %180, %38 : vector<10x10xf32>
    %cst_67 = arith.constant dense<0xFF800000> : vector<10xf32>
    %182 = vector.multi_reduction <maximumf>, %181, %cst_67 [1] : vector<10x10xf32> to vector<10xf32>
    %183 = vector.shape_cast %182 : vector<10xf32> to vector<10x1xf32>
    %184 = vector.broadcast %183 : vector<10x1xf32> to vector<10x10xf32>
    %185 = arith.subf %181, %184 : vector<10x10xf32>
    %186 = math.exp %185 : vector<10x10xf32>
    %cst_68 = arith.constant dense<0.000000e+00> : vector<10xf32>
    %187 = vector.multi_reduction <add>, %186, %cst_68 [1] : vector<10x10xf32> to vector<10xf32>
    %188 = vector.shape_cast %187 : vector<10xf32> to vector<10x1xf32>
    %189 = tpu.reciprocal %188 {approx = true} : vector<10x1xf32> -> vector<10x1xf32>
    %190 = vector.broadcast %189 : vector<10x1xf32> to vector<10x10xf32>
    %191 = arith.mulf %186, %190 : vector<10x10xf32>
    %cst_69 = arith.constant dense<0.000000e+00> : vector<10x8xf32>
    %192 = tpu.matmul %191, %177, %cst_69 {dimension_numbers = #tpu.dot_dimension_numbers<[1], [0], [0], [1], [0, 0, 1, 1], [], []>} : vector<10x10xf32>, vector<10x8xf32>, vector<10x8xf32> -> vector<10x8xf32>
    %193 = vector.extract_strided_slice %65 {offsets = [10, 24], sizes = [10, 8], strides = [1, 1]} : vector<20x96xf32> to vector<10x8xf32>
    %194 = vector.extract_strided_slice %65 {offsets = [10, 56], sizes = [10, 8], strides = [1, 1]} : vector<20x96xf32> to vector<10x8xf32>
    %195 = vector.extract_strided_slice %65 {offsets = [10, 88], sizes = [10, 8], strides = [1, 1]} : vector<20x96xf32> to vector<10x8xf32>
    %cst_70 = arith.constant dense<0.000000e+00> : vector<10x10xf32>
    %196 = tpu.matmul %193, %194, %cst_70 {dimension_numbers = #tpu.dot_dimension_numbers<[1], [1], [0], [0], [0, 0, 1, 0], [], []>} : vector<10x8xf32>, vector<10x8xf32>, vector<10x10xf32> -> vector<10x10xf32>
    %cst_71 = arith.constant 0.353553385 : f32
    %197 = vector.broadcast %cst_71 : f32 to vector<10x10xf32>
    %198 = arith.mulf %196, %197 : vector<10x10xf32>
    %199 = arith.addf %198, %38 : vector<10x10xf32>
    %cst_72 = arith.constant dense<0xFF800000> : vector<10xf32>
    %200 = vector.multi_reduction <maximumf>, %199, %cst_72 [1] : vector<10x10xf32> to vector<10xf32>
    %201 = vector.shape_cast %200 : vector<10xf32> to vector<10x1xf32>
    %202 = vector.broadcast %201 : vector<10x1xf32> to vector<10x10xf32>
    %203 = arith.subf %199, %202 : vector<10x10xf32>
    %204 = math.exp %203 : vector<10x10xf32>
    %cst_73 = arith.constant dense<0.000000e+00> : vector<10xf32>
    %205 = vector.multi_reduction <add>, %204, %cst_73 [1] : vector<10x10xf32> to vector<10xf32>
    %206 = vector.shape_cast %205 : vector<10xf32> to vector<10x1xf32>
    %207 = tpu.reciprocal %206 {approx = true} : vector<10x1xf32> -> vector<10x1xf32>
    %208 = vector.broadcast %207 : vector<10x1xf32> to vector<10x10xf32>
    %209 = arith.mulf %204, %208 : vector<10x10xf32>
    %cst_74 = arith.constant dense<0.000000e+00> : vector<10x8xf32>
    %210 = tpu.matmul %209, %195, %cst_74 {dimension_numbers = #tpu.dot_dimension_numbers<[1], [0], [0], [1], [0, 0, 1, 1], [], []>} : vector<10x10xf32>, vector<10x8xf32>, vector<10x8xf32> -> vector<10x8xf32>
    %211 = tpu.concatenate %156, %174, %192, %210 in 1 : vector<10x8xf32>, vector<10x8xf32>, vector<10x8xf32>, vector<10x8xf32> -> vector<10x32xf32>
    %212 = tpu.concatenate %138, %211 in 0 : vector<10x32xf32>, vector<10x32xf32> -> vector<20x32xf32>
    %c0_75 = arith.constant 0 : index
    %c0_76 = arith.constant 0 : index
    %c0_77 = arith.constant 0 : index
    %213 = vector.load %arg13[%c0_75, %c0_76, %c0_77] : memref<2x32x32xf32, #tpu.memory_space<vmem>>, vector<1x32x32xf32>
    %214 = vector.shape_cast %213 : vector<1x32x32xf32> to vector<32x32xf32>
    %cst_78 = arith.constant dense<0.000000e+00> : vector<20x32xf32>
    %215 = tpu.matmul %212, %214, %cst_78 {dimension_numbers = #tpu.dot_dimension_numbers<[1], [0], [0], [1], [0, 0, 1, 1], [], []>} : vector<20x32xf32>, vector<32x32xf32>, vector<20x32xf32> -> vector<20x32xf32>
    %216 = arith.addf %37, %215 : vector<20x32xf32>
    %c0_79 = arith.constant 0 : index
    %c0_80 = arith.constant 0 : index
    %c0_81 = arith.constant 0 : index
    %217 = vector.load %arg14[%c0_79, %c0_80, %c0_81] : memref<2x1x32xf32, #tpu.memory_space<vmem>>, vector<1x1x32xf32>
    %218 = vector.shape_cast %217 : vector<1x1x32xf32> to vector<1x32xf32>
    %c0_82 = arith.constant 0 : index
    %c0_83 = arith.constant 0 : index
    %c0_84 = arith.constant 0 : index
    %219 = vector.load %arg15[%c0_82, %c0_83, %c0_84] : memref<2x1x32xf32, #tpu.memory_space<vmem>>, vector<1x1x32xf32>
    %220 = vector.shape_cast %219 : vector<1x1x32xf32> to vector<1x32xf32>
    %cst_85 = arith.constant dense<0.000000e+00> : vector<20xf32>
    %221 = vector.multi_reduction <add>, %216, %cst_85 [1] : vector<20x32xf32> to vector<20xf32>
    %222 = vector.shape_cast %221 : vector<20xf32> to vector<20x1xf32>
    %cst_86 = arith.constant 3.200000e+01 : f32
    %223 = vector.broadcast %cst_86 : f32 to vector<20x1xf32>
    %224 = arith.divf %222, %223 : vector<20x1xf32>
    %225 = vector.broadcast %224 : vector<20x1xf32> to vector<20x32xf32>
    %226 = arith.subf %216, %225 : vector<20x32xf32>
    %227 = arith.mulf %226, %226 : vector<20x32xf32>
    %cst_87 = arith.constant dense<0.000000e+00> : vector<20xf32>
    %228 = vector.multi_reduction <add>, %227, %cst_87 [1] : vector<20x32xf32> to vector<20xf32>
    %229 = vector.shape_cast %228 : vector<20xf32> to vector<20x1xf32>
    %cst_88 = arith.constant 3.200000e+01 : f32
    %230 = vector.broadcast %cst_88 : f32 to vector<20x1xf32>
    %231 = arith.divf %229, %230 : vector<20x1xf32>
    %cst_89 = arith.constant 9.99999974E-6 : f32
    %232 = vector.broadcast %cst_89 : f32 to vector<20x1xf32>
    %233 = arith.addf %231, %232 : vector<20x1xf32>
    %234 = math.rsqrt %233 : vector<20x1xf32>
    %235 = vector.broadcast %234 : vector<20x1xf32> to vector<20x32xf32>
    %236 = arith.mulf %226, %235 : vector<20x32xf32>
    %237 = vector.broadcast %218 : vector<1x32xf32> to vector<20x32xf32>
    %238 = arith.mulf %236, %237 : vector<20x32xf32>
    %239 = vector.broadcast %220 : vector<1x32xf32> to vector<20x32xf32>
    %240 = arith.addf %238, %239 : vector<20x32xf32>
    %c0_90 = arith.constant 0 : index
    %c0_91 = arith.constant 0 : index
    %c0_92 = arith.constant 0 : index
    %241 = vector.load %arg16[%c0_90, %c0_91, %c0_92] : memref<2x32x64xf32, #tpu.memory_space<vmem>>, vector<1x32x64xf32>
    %242 = vector.shape_cast %241 : vector<1x32x64xf32> to vector<32x64xf32>
    %cst_93 = arith.constant dense<0.000000e+00> : vector<20x64xf32>
    %243 = tpu.matmul %240, %242, %cst_93 {dimension_numbers = #tpu.dot_dimension_numbers<[1], [0], [0], [1], [0, 0, 1, 1], [], []>} : vector<20x32xf32>, vector<32x64xf32>, vector<20x64xf32> -> vector<20x64xf32>
    %c0_94 = arith.constant 0 : index
    %c0_95 = arith.constant 0 : index
    %c0_96 = arith.constant 0 : index
    %244 = vector.load %arg17[%c0_94, %c0_95, %c0_96] : memref<2x1x64xf32, #tpu.memory_space<vmem>>, vector<1x1x64xf32>
    %245 = vector.shape_cast %244 : vector<1x1x64xf32> to vector<1x64xf32>
    %246 = vector.broadcast %245 : vector<1x64xf32> to vector<20x64xf32>
    %247 = arith.addf %243, %246 : vector<20x64xf32>
    %cst_97 = arith.constant 5.000000e-01 : f32
    %248 = vector.broadcast %cst_97 : f32 to vector<20x64xf32>
    %249 = arith.mulf %248, %247 : vector<20x64xf32>
    %cst_98 = arith.constant 0.707106769 : f32
    %250 = vector.broadcast %cst_98 : f32 to vector<20x64xf32>
    %251 = arith.mulf %247, %250 : vector<20x64xf32>
    %252 = math.absf %251 : vector<20x64xf32>
    %cst_99 = arith.constant 0.327591091 : f32
    %253 = vector.broadcast %cst_99 : f32 to vector<20x64xf32>
    %254 = arith.mulf %253, %252 : vector<20x64xf32>
    %cst_100 = arith.constant 1.000000e+00 : f32
    %255 = vector.broadcast %cst_100 : f32 to vector<20x64xf32>
    %256 = arith.addf %255, %254 : vector<20x64xf32>
    %cst_101 = arith.constant 1.000000e+00 : f32
    %257 = vector.broadcast %cst_101 : f32 to vector<20x64xf32>
    %258 = arith.divf %257, %256 : vector<20x64xf32>
    %cst_102 = arith.constant 1.06140542 : f32
    %259 = vector.broadcast %cst_102 : f32 to vector<20x64xf32>
    %260 = arith.mulf %259, %258 : vector<20x64xf32>
    %cst_103 = arith.constant 1.45315206 : f32
    %261 = vector.broadcast %cst_103 : f32 to vector<20x64xf32>
    %262 = arith.subf %260, %261 : vector<20x64xf32>
    %263 = arith.mulf %262, %258 : vector<20x64xf32>
    %cst_104 = arith.constant 1.42141378 : f32
    %264 = vector.broadcast %cst_104 : f32 to vector<20x64xf32>
    %265 = arith.addf %263, %264 : vector<20x64xf32>
    %266 = arith.mulf %265, %258 : vector<20x64xf32>
    %cst_105 = arith.constant 0.284496725 : f32
    %267 = vector.broadcast %cst_105 : f32 to vector<20x64xf32>
    %268 = arith.subf %266, %267 : vector<20x64xf32>
    %269 = arith.mulf %268, %258 : vector<20x64xf32>
    %cst_106 = arith.constant 0.254829586 : f32
    %270 = vector.broadcast %cst_106 : f32 to vector<20x64xf32>
    %271 = arith.addf %269, %270 : vector<20x64xf32>
    %272 = arith.mulf %271, %258 : vector<20x64xf32>
    %cst_107 = arith.constant 0.000000e+00 : f32
    %273 = vector.broadcast %cst_107 : f32 to vector<20x64xf32>
    %274 = arith.subf %273, %252 : vector<20x64xf32>
    %275 = arith.mulf %274, %252 : vector<20x64xf32>
    %276 = math.exp %275 : vector<20x64xf32>
    %277 = arith.mulf %272, %276 : vector<20x64xf32>
    %cst_108 = arith.constant 1.000000e+00 : f32
    %278 = vector.broadcast %cst_108 : f32 to vector<20x64xf32>
    %279 = arith.subf %278, %277 : vector<20x64xf32>
    %cst_109 = arith.constant 0.000000e+00 : f32
    %280 = vector.broadcast %cst_109 : f32 to vector<20x64xf32>
    %281 = arith.cmpf oge, %251, %280 : vector<20x64xf32>
    %cst_110 = arith.constant 0.000000e+00 : f32
    %282 = vector.broadcast %cst_110 : f32 to vector<20x64xf32>
    %283 = arith.subf %282, %279 : vector<20x64xf32>
    %284 = arith.select %281, %279, %283 : vector<20x64xi1>, vector<20x64xf32>
    %cst_111 = arith.constant 1.000000e+00 : f32
    %285 = vector.broadcast %cst_111 : f32 to vector<20x64xf32>
    %286 = arith.addf %285, %284 : vector<20x64xf32>
    %287 = arith.mulf %249, %286 : vector<20x64xf32>
    %c0_112 = arith.constant 0 : index
    %c0_113 = arith.constant 0 : index
    %c0_114 = arith.constant 0 : index
    %288 = vector.load %arg18[%c0_112, %c0_113, %c0_114] : memref<2x64x32xf32, #tpu.memory_space<vmem>>, vector<1x64x32xf32>
    %289 = vector.shape_cast %288 : vector<1x64x32xf32> to vector<64x32xf32>
    %cst_115 = arith.constant dense<0.000000e+00> : vector<20x32xf32>
    %290 = tpu.matmul %287, %289, %cst_115 {dimension_numbers = #tpu.dot_dimension_numbers<[1], [0], [0], [1], [0, 0, 1, 1], [], []>} : vector<20x64xf32>, vector<64x32xf32>, vector<20x32xf32> -> vector<20x32xf32>
    %291 = arith.addf %216, %290 : vector<20x32xf32>
    %c0_116 = arith.constant 0 : index
    %c0_117 = arith.constant 0 : index
    %c0_118 = arith.constant 0 : index
    %292 = vector.load %arg19[%c0_116, %c0_117, %c0_118] : memref<2x1x32xf32, #tpu.memory_space<vmem>>, vector<1x1x32xf32>
    %293 = vector.shape_cast %292 : vector<1x1x32xf32> to vector<1x32xf32>
    %294 = vector.broadcast %293 : vector<1x32xf32> to vector<20x32xf32>
    %295 = arith.addf %291, %294 : vector<20x32xf32>
    %c1 = arith.constant 1 : index
    %c0_119 = arith.constant 0 : index
    %c0_120 = arith.constant 0 : index
    %296 = vector.load %arg10[%c1, %c0_119, %c0_120] : memref<2x1x32xf32, #tpu.memory_space<vmem>>, vector<1x1x32xf32>
    %297 = vector.shape_cast %296 : vector<1x1x32xf32> to vector<1x32xf32>
    %c1_121 = arith.constant 1 : index
    %c0_122 = arith.constant 0 : index
    %c0_123 = arith.constant 0 : index
    %298 = vector.load %arg11[%c1_121, %c0_122, %c0_123] : memref<2x1x32xf32, #tpu.memory_space<vmem>>, vector<1x1x32xf32>
    %299 = vector.shape_cast %298 : vector<1x1x32xf32> to vector<1x32xf32>
    %cst_124 = arith.constant dense<0.000000e+00> : vector<20xf32>
    %300 = vector.multi_reduction <add>, %295, %cst_124 [1] : vector<20x32xf32> to vector<20xf32>
    %301 = vector.shape_cast %300 : vector<20xf32> to vector<20x1xf32>
    %cst_125 = arith.constant 3.200000e+01 : f32
    %302 = vector.broadcast %cst_125 : f32 to vector<20x1xf32>
    %303 = arith.divf %301, %302 : vector<20x1xf32>
    %304 = vector.broadcast %303 : vector<20x1xf32> to vector<20x32xf32>
    %305 = arith.subf %295, %304 : vector<20x32xf32>
    %306 = arith.mulf %305, %305 : vector<20x32xf32>
    %cst_126 = arith.constant dense<0.000000e+00> : vector<20xf32>
    %307 = vector.multi_reduction <add>, %306, %cst_126 [1] : vector<20x32xf32> to vector<20xf32>
    %308 = vector.shape_cast %307 : vector<20xf32> to vector<20x1xf32>
    %cst_127 = arith.constant 3.200000e+01 : f32
    %309 = vector.broadcast %cst_127 : f32 to vector<20x1xf32>
    %310 = arith.divf %308, %309 : vector<20x1xf32>
    %cst_128 = arith.constant 9.99999974E-6 : f32
    %311 = vector.broadcast %cst_128 : f32 to vector<20x1xf32>
    %312 = arith.addf %310, %311 : vector<20x1xf32>
    %313 = math.rsqrt %312 : vector<20x1xf32>
    %314 = vector.broadcast %313 : vector<20x1xf32> to vector<20x32xf32>
    %315 = arith.mulf %305, %314 : vector<20x32xf32>
    %316 = vector.broadcast %297 : vector<1x32xf32> to vector<20x32xf32>
    %317 = arith.mulf %315, %316 : vector<20x32xf32>
    %318 = vector.broadcast %299 : vector<1x32xf32> to vector<20x32xf32>
    %319 = arith.addf %317, %318 : vector<20x32xf32>
    %c1_129 = arith.constant 1 : index
    %c0_130 = arith.constant 0 : index
    %c0_131 = arith.constant 0 : index
    %320 = vector.load %arg12[%c1_129, %c0_130, %c0_131] : memref<2x32x96xf32, #tpu.memory_space<vmem>>, vector<1x32x96xf32>
    %321 = vector.shape_cast %320 : vector<1x32x96xf32> to vector<32x96xf32>
    %cst_132 = arith.constant dense<0.000000e+00> : vector<20x96xf32>
    %322 = tpu.matmul %319, %321, %cst_132 {dimension_numbers = #tpu.dot_dimension_numbers<[1], [0], [0], [1], [0, 0, 1, 1], [], []>} : vector<20x32xf32>, vector<32x96xf32>, vector<20x96xf32> -> vector<20x96xf32>
    %323 = vector.extract_strided_slice %322 {offsets = [0, 0], sizes = [10, 8], strides = [1, 1]} : vector<20x96xf32> to vector<10x8xf32>
    %324 = vector.extract_strided_slice %322 {offsets = [0, 32], sizes = [10, 8], strides = [1, 1]} : vector<20x96xf32> to vector<10x8xf32>
    %325 = vector.extract_strided_slice %322 {offsets = [0, 64], sizes = [10, 8], strides = [1, 1]} : vector<20x96xf32> to vector<10x8xf32>
    %cst_133 = arith.constant dense<0.000000e+00> : vector<10x10xf32>
    %326 = tpu.matmul %323, %324, %cst_133 {dimension_numbers = #tpu.dot_dimension_numbers<[1], [1], [0], [0], [0, 0, 1, 0], [], []>} : vector<10x8xf32>, vector<10x8xf32>, vector<10x10xf32> -> vector<10x10xf32>
    %cst_134 = arith.constant 0.353553385 : f32
    %327 = vector.broadcast %cst_134 : f32 to vector<10x10xf32>
    %328 = arith.mulf %326, %327 : vector<10x10xf32>
    %329 = arith.addf %328, %38 : vector<10x10xf32>
    %cst_135 = arith.constant dense<0xFF800000> : vector<10xf32>
    %330 = vector.multi_reduction <maximumf>, %329, %cst_135 [1] : vector<10x10xf32> to vector<10xf32>
    %331 = vector.shape_cast %330 : vector<10xf32> to vector<10x1xf32>
    %332 = vector.broadcast %331 : vector<10x1xf32> to vector<10x10xf32>
    %333 = arith.subf %329, %332 : vector<10x10xf32>
    %334 = math.exp %333 : vector<10x10xf32>
    %cst_136 = arith.constant dense<0.000000e+00> : vector<10xf32>
    %335 = vector.multi_reduction <add>, %334, %cst_136 [1] : vector<10x10xf32> to vector<10xf32>
    %336 = vector.shape_cast %335 : vector<10xf32> to vector<10x1xf32>
    %337 = tpu.reciprocal %336 {approx = true} : vector<10x1xf32> -> vector<10x1xf32>
    %338 = vector.broadcast %337 : vector<10x1xf32> to vector<10x10xf32>
    %339 = arith.mulf %334, %338 : vector<10x10xf32>
    %cst_137 = arith.constant dense<0.000000e+00> : vector<10x8xf32>
    %340 = tpu.matmul %339, %325, %cst_137 {dimension_numbers = #tpu.dot_dimension_numbers<[1], [0], [0], [1], [0, 0, 1, 1], [], []>} : vector<10x10xf32>, vector<10x8xf32>, vector<10x8xf32> -> vector<10x8xf32>
    %341 = vector.extract_strided_slice %322 {offsets = [0, 8], sizes = [10, 8], strides = [1, 1]} : vector<20x96xf32> to vector<10x8xf32>
    %342 = vector.extract_strided_slice %322 {offsets = [0, 40], sizes = [10, 8], strides = [1, 1]} : vector<20x96xf32> to vector<10x8xf32>
    %343 = vector.extract_strided_slice %322 {offsets = [0, 72], sizes = [10, 8], strides = [1, 1]} : vector<20x96xf32> to vector<10x8xf32>
    %cst_138 = arith.constant dense<0.000000e+00> : vector<10x10xf32>
    %344 = tpu.matmul %341, %342, %cst_138 {dimension_numbers = #tpu.dot_dimension_numbers<[1], [1], [0], [0], [0, 0, 1, 0], [], []>} : vector<10x8xf32>, vector<10x8xf32>, vector<10x10xf32> -> vector<10x10xf32>
    %cst_139 = arith.constant 0.353553385 : f32
    %345 = vector.broadcast %cst_139 : f32 to vector<10x10xf32>
    %346 = arith.mulf %344, %345 : vector<10x10xf32>
    %347 = arith.addf %346, %38 : vector<10x10xf32>
    %cst_140 = arith.constant dense<0xFF800000> : vector<10xf32>
    %348 = vector.multi_reduction <maximumf>, %347, %cst_140 [1] : vector<10x10xf32> to vector<10xf32>
    %349 = vector.shape_cast %348 : vector<10xf32> to vector<10x1xf32>
    %350 = vector.broadcast %349 : vector<10x1xf32> to vector<10x10xf32>
    %351 = arith.subf %347, %350 : vector<10x10xf32>
    %352 = math.exp %351 : vector<10x10xf32>
    %cst_141 = arith.constant dense<0.000000e+00> : vector<10xf32>
    %353 = vector.multi_reduction <add>, %352, %cst_141 [1] : vector<10x10xf32> to vector<10xf32>
    %354 = vector.shape_cast %353 : vector<10xf32> to vector<10x1xf32>
    %355 = tpu.reciprocal %354 {approx = true} : vector<10x1xf32> -> vector<10x1xf32>
    %356 = vector.broadcast %355 : vector<10x1xf32> to vector<10x10xf32>
    %357 = arith.mulf %352, %356 : vector<10x10xf32>
    %cst_142 = arith.constant dense<0.000000e+00> : vector<10x8xf32>
    %358 = tpu.matmul %357, %343, %cst_142 {dimension_numbers = #tpu.dot_dimension_numbers<[1], [0], [0], [1], [0, 0, 1, 1], [], []>} : vector<10x10xf32>, vector<10x8xf32>, vector<10x8xf32> -> vector<10x8xf32>
    %359 = vector.extract_strided_slice %322 {offsets = [0, 16], sizes = [10, 8], strides = [1, 1]} : vector<20x96xf32> to vector<10x8xf32>
    %360 = vector.extract_strided_slice %322 {offsets = [0, 48], sizes = [10, 8], strides = [1, 1]} : vector<20x96xf32> to vector<10x8xf32>
    %361 = vector.extract_strided_slice %322 {offsets = [0, 80], sizes = [10, 8], strides = [1, 1]} : vector<20x96xf32> to vector<10x8xf32>
    %cst_143 = arith.constant dense<0.000000e+00> : vector<10x10xf32>
    %362 = tpu.matmul %359, %360, %cst_143 {dimension_numbers = #tpu.dot_dimension_numbers<[1], [1], [0], [0], [0, 0, 1, 0], [], []>} : vector<10x8xf32>, vector<10x8xf32>, vector<10x10xf32> -> vector<10x10xf32>
    %cst_144 = arith.constant 0.353553385 : f32
    %363 = vector.broadcast %cst_144 : f32 to vector<10x10xf32>
    %364 = arith.mulf %362, %363 : vector<10x10xf32>
    %365 = arith.addf %364, %38 : vector<10x10xf32>
    %cst_145 = arith.constant dense<0xFF800000> : vector<10xf32>
    %366 = vector.multi_reduction <maximumf>, %365, %cst_145 [1] : vector<10x10xf32> to vector<10xf32>
    %367 = vector.shape_cast %366 : vector<10xf32> to vector<10x1xf32>
    %368 = vector.broadcast %367 : vector<10x1xf32> to vector<10x10xf32>
    %369 = arith.subf %365, %368 : vector<10x10xf32>
    %370 = math.exp %369 : vector<10x10xf32>
    %cst_146 = arith.constant dense<0.000000e+00> : vector<10xf32>
    %371 = vector.multi_reduction <add>, %370, %cst_146 [1] : vector<10x10xf32> to vector<10xf32>
    %372 = vector.shape_cast %371 : vector<10xf32> to vector<10x1xf32>
    %373 = tpu.reciprocal %372 {approx = true} : vector<10x1xf32> -> vector<10x1xf32>
    %374 = vector.broadcast %373 : vector<10x1xf32> to vector<10x10xf32>
    %375 = arith.mulf %370, %374 : vector<10x10xf32>
    %cst_147 = arith.constant dense<0.000000e+00> : vector<10x8xf32>
    %376 = tpu.matmul %375, %361, %cst_147 {dimension_numbers = #tpu.dot_dimension_numbers<[1], [0], [0], [1], [0, 0, 1, 1], [], []>} : vector<10x10xf32>, vector<10x8xf32>, vector<10x8xf32> -> vector<10x8xf32>
    %377 = vector.extract_strided_slice %322 {offsets = [0, 24], sizes = [10, 8], strides = [1, 1]} : vector<20x96xf32> to vector<10x8xf32>
    %378 = vector.extract_strided_slice %322 {offsets = [0, 56], sizes = [10, 8], strides = [1, 1]} : vector<20x96xf32> to vector<10x8xf32>
    %379 = vector.extract_strided_slice %322 {offsets = [0, 88], sizes = [10, 8], strides = [1, 1]} : vector<20x96xf32> to vector<10x8xf32>
    %cst_148 = arith.constant dense<0.000000e+00> : vector<10x10xf32>
    %380 = tpu.matmul %377, %378, %cst_148 {dimension_numbers = #tpu.dot_dimension_numbers<[1], [1], [0], [0], [0, 0, 1, 0], [], []>} : vector<10x8xf32>, vector<10x8xf32>, vector<10x10xf32> -> vector<10x10xf32>
    %cst_149 = arith.constant 0.353553385 : f32
    %381 = vector.broadcast %cst_149 : f32 to vector<10x10xf32>
    %382 = arith.mulf %380, %381 : vector<10x10xf32>
    %383 = arith.addf %382, %38 : vector<10x10xf32>
    %cst_150 = arith.constant dense<0xFF800000> : vector<10xf32>
    %384 = vector.multi_reduction <maximumf>, %383, %cst_150 [1] : vector<10x10xf32> to vector<10xf32>
    %385 = vector.shape_cast %384 : vector<10xf32> to vector<10x1xf32>
    %386 = vector.broadcast %385 : vector<10x1xf32> to vector<10x10xf32>
    %387 = arith.subf %383, %386 : vector<10x10xf32>
    %388 = math.exp %387 : vector<10x10xf32>
    %cst_151 = arith.constant dense<0.000000e+00> : vector<10xf32>
    %389 = vector.multi_reduction <add>, %388, %cst_151 [1] : vector<10x10xf32> to vector<10xf32>
    %390 = vector.shape_cast %389 : vector<10xf32> to vector<10x1xf32>
    %391 = tpu.reciprocal %390 {approx = true} : vector<10x1xf32> -> vector<10x1xf32>
    %392 = vector.broadcast %391 : vector<10x1xf32> to vector<10x10xf32>
    %393 = arith.mulf %388, %392 : vector<10x10xf32>
    %cst_152 = arith.constant dense<0.000000e+00> : vector<10x8xf32>
    %394 = tpu.matmul %393, %379, %cst_152 {dimension_numbers = #tpu.dot_dimension_numbers<[1], [0], [0], [1], [0, 0, 1, 1], [], []>} : vector<10x10xf32>, vector<10x8xf32>, vector<10x8xf32> -> vector<10x8xf32>
    %395 = tpu.concatenate %340, %358, %376, %394 in 1 : vector<10x8xf32>, vector<10x8xf32>, vector<10x8xf32>, vector<10x8xf32> -> vector<10x32xf32>
    %396 = vector.extract_strided_slice %322 {offsets = [10, 0], sizes = [10, 8], strides = [1, 1]} : vector<20x96xf32> to vector<10x8xf32>
    %397 = vector.extract_strided_slice %322 {offsets = [10, 32], sizes = [10, 8], strides = [1, 1]} : vector<20x96xf32> to vector<10x8xf32>
    %398 = vector.extract_strided_slice %322 {offsets = [10, 64], sizes = [10, 8], strides = [1, 1]} : vector<20x96xf32> to vector<10x8xf32>
    %cst_153 = arith.constant dense<0.000000e+00> : vector<10x10xf32>
    %399 = tpu.matmul %396, %397, %cst_153 {dimension_numbers = #tpu.dot_dimension_numbers<[1], [1], [0], [0], [0, 0, 1, 0], [], []>} : vector<10x8xf32>, vector<10x8xf32>, vector<10x10xf32> -> vector<10x10xf32>
    %cst_154 = arith.constant 0.353553385 : f32
    %400 = vector.broadcast %cst_154 : f32 to vector<10x10xf32>
    %401 = arith.mulf %399, %400 : vector<10x10xf32>
    %402 = arith.addf %401, %38 : vector<10x10xf32>
    %cst_155 = arith.constant dense<0xFF800000> : vector<10xf32>
    %403 = vector.multi_reduction <maximumf>, %402, %cst_155 [1] : vector<10x10xf32> to vector<10xf32>
    %404 = vector.shape_cast %403 : vector<10xf32> to vector<10x1xf32>
    %405 = vector.broadcast %404 : vector<10x1xf32> to vector<10x10xf32>
    %406 = arith.subf %402, %405 : vector<10x10xf32>
    %407 = math.exp %406 : vector<10x10xf32>
    %cst_156 = arith.constant dense<0.000000e+00> : vector<10xf32>
    %408 = vector.multi_reduction <add>, %407, %cst_156 [1] : vector<10x10xf32> to vector<10xf32>
    %409 = vector.shape_cast %408 : vector<10xf32> to vector<10x1xf32>
    %410 = tpu.reciprocal %409 {approx = true} : vector<10x1xf32> -> vector<10x1xf32>
    %411 = vector.broadcast %410 : vector<10x1xf32> to vector<10x10xf32>
    %412 = arith.mulf %407, %411 : vector<10x10xf32>
    %cst_157 = arith.constant dense<0.000000e+00> : vector<10x8xf32>
    %413 = tpu.matmul %412, %398, %cst_157 {dimension_numbers = #tpu.dot_dimension_numbers<[1], [0], [0], [1], [0, 0, 1, 1], [], []>} : vector<10x10xf32>, vector<10x8xf32>, vector<10x8xf32> -> vector<10x8xf32>
    %414 = vector.extract_strided_slice %322 {offsets = [10, 8], sizes = [10, 8], strides = [1, 1]} : vector<20x96xf32> to vector<10x8xf32>
    %415 = vector.extract_strided_slice %322 {offsets = [10, 40], sizes = [10, 8], strides = [1, 1]} : vector<20x96xf32> to vector<10x8xf32>
    %416 = vector.extract_strided_slice %322 {offsets = [10, 72], sizes = [10, 8], strides = [1, 1]} : vector<20x96xf32> to vector<10x8xf32>
    %cst_158 = arith.constant dense<0.000000e+00> : vector<10x10xf32>
    %417 = tpu.matmul %414, %415, %cst_158 {dimension_numbers = #tpu.dot_dimension_numbers<[1], [1], [0], [0], [0, 0, 1, 0], [], []>} : vector<10x8xf32>, vector<10x8xf32>, vector<10x10xf32> -> vector<10x10xf32>
    %cst_159 = arith.constant 0.353553385 : f32
    %418 = vector.broadcast %cst_159 : f32 to vector<10x10xf32>
    %419 = arith.mulf %417, %418 : vector<10x10xf32>
    %420 = arith.addf %419, %38 : vector<10x10xf32>
    %cst_160 = arith.constant dense<0xFF800000> : vector<10xf32>
    %421 = vector.multi_reduction <maximumf>, %420, %cst_160 [1] : vector<10x10xf32> to vector<10xf32>
    %422 = vector.shape_cast %421 : vector<10xf32> to vector<10x1xf32>
    %423 = vector.broadcast %422 : vector<10x1xf32> to vector<10x10xf32>
    %424 = arith.subf %420, %423 : vector<10x10xf32>
    %425 = math.exp %424 : vector<10x10xf32>
    %cst_161 = arith.constant dense<0.000000e+00> : vector<10xf32>
    %426 = vector.multi_reduction <add>, %425, %cst_161 [1] : vector<10x10xf32> to vector<10xf32>
    %427 = vector.shape_cast %426 : vector<10xf32> to vector<10x1xf32>
    %428 = tpu.reciprocal %427 {approx = true} : vector<10x1xf32> -> vector<10x1xf32>
    %429 = vector.broadcast %428 : vector<10x1xf32> to vector<10x10xf32>
    %430 = arith.mulf %425, %429 : vector<10x10xf32>
    %cst_162 = arith.constant dense<0.000000e+00> : vector<10x8xf32>
    %431 = tpu.matmul %430, %416, %cst_162 {dimension_numbers = #tpu.dot_dimension_numbers<[1], [0], [0], [1], [0, 0, 1, 1], [], []>} : vector<10x10xf32>, vector<10x8xf32>, vector<10x8xf32> -> vector<10x8xf32>
    %432 = vector.extract_strided_slice %322 {offsets = [10, 16], sizes = [10, 8], strides = [1, 1]} : vector<20x96xf32> to vector<10x8xf32>
    %433 = vector.extract_strided_slice %322 {offsets = [10, 48], sizes = [10, 8], strides = [1, 1]} : vector<20x96xf32> to vector<10x8xf32>
    %434 = vector.extract_strided_slice %322 {offsets = [10, 80], sizes = [10, 8], strides = [1, 1]} : vector<20x96xf32> to vector<10x8xf32>
    %cst_163 = arith.constant dense<0.000000e+00> : vector<10x10xf32>
    %435 = tpu.matmul %432, %433, %cst_163 {dimension_numbers = #tpu.dot_dimension_numbers<[1], [1], [0], [0], [0, 0, 1, 0], [], []>} : vector<10x8xf32>, vector<10x8xf32>, vector<10x10xf32> -> vector<10x10xf32>
    %cst_164 = arith.constant 0.353553385 : f32
    %436 = vector.broadcast %cst_164 : f32 to vector<10x10xf32>
    %437 = arith.mulf %435, %436 : vector<10x10xf32>
    %438 = arith.addf %437, %38 : vector<10x10xf32>
    %cst_165 = arith.constant dense<0xFF800000> : vector<10xf32>
    %439 = vector.multi_reduction <maximumf>, %438, %cst_165 [1] : vector<10x10xf32> to vector<10xf32>
    %440 = vector.shape_cast %439 : vector<10xf32> to vector<10x1xf32>
    %441 = vector.broadcast %440 : vector<10x1xf32> to vector<10x10xf32>
    %442 = arith.subf %438, %441 : vector<10x10xf32>
    %443 = math.exp %442 : vector<10x10xf32>
    %cst_166 = arith.constant dense<0.000000e+00> : vector<10xf32>
    %444 = vector.multi_reduction <add>, %443, %cst_166 [1] : vector<10x10xf32> to vector<10xf32>
    %445 = vector.shape_cast %444 : vector<10xf32> to vector<10x1xf32>
    %446 = tpu.reciprocal %445 {approx = true} : vector<10x1xf32> -> vector<10x1xf32>
    %447 = vector.broadcast %446 : vector<10x1xf32> to vector<10x10xf32>
    %448 = arith.mulf %443, %447 : vector<10x10xf32>
    %cst_167 = arith.constant dense<0.000000e+00> : vector<10x8xf32>
    %449 = tpu.matmul %448, %434, %cst_167 {dimension_numbers = #tpu.dot_dimension_numbers<[1], [0], [0], [1], [0, 0, 1, 1], [], []>} : vector<10x10xf32>, vector<10x8xf32>, vector<10x8xf32> -> vector<10x8xf32>
    %450 = vector.extract_strided_slice %322 {offsets = [10, 24], sizes = [10, 8], strides = [1, 1]} : vector<20x96xf32> to vector<10x8xf32>
    %451 = vector.extract_strided_slice %322 {offsets = [10, 56], sizes = [10, 8], strides = [1, 1]} : vector<20x96xf32> to vector<10x8xf32>
    %452 = vector.extract_strided_slice %322 {offsets = [10, 88], sizes = [10, 8], strides = [1, 1]} : vector<20x96xf32> to vector<10x8xf32>
    %cst_168 = arith.constant dense<0.000000e+00> : vector<10x10xf32>
    %453 = tpu.matmul %450, %451, %cst_168 {dimension_numbers = #tpu.dot_dimension_numbers<[1], [1], [0], [0], [0, 0, 1, 0], [], []>} : vector<10x8xf32>, vector<10x8xf32>, vector<10x10xf32> -> vector<10x10xf32>
    %cst_169 = arith.constant 0.353553385 : f32
    %454 = vector.broadcast %cst_169 : f32 to vector<10x10xf32>
    %455 = arith.mulf %453, %454 : vector<10x10xf32>
    %456 = arith.addf %455, %38 : vector<10x10xf32>
    %cst_170 = arith.constant dense<0xFF800000> : vector<10xf32>
    %457 = vector.multi_reduction <maximumf>, %456, %cst_170 [1] : vector<10x10xf32> to vector<10xf32>
    %458 = vector.shape_cast %457 : vector<10xf32> to vector<10x1xf32>
    %459 = vector.broadcast %458 : vector<10x1xf32> to vector<10x10xf32>
    %460 = arith.subf %456, %459 : vector<10x10xf32>
    %461 = math.exp %460 : vector<10x10xf32>
    %cst_171 = arith.constant dense<0.000000e+00> : vector<10xf32>
    %462 = vector.multi_reduction <add>, %461, %cst_171 [1] : vector<10x10xf32> to vector<10xf32>
    %463 = vector.shape_cast %462 : vector<10xf32> to vector<10x1xf32>
    %464 = tpu.reciprocal %463 {approx = true} : vector<10x1xf32> -> vector<10x1xf32>
    %465 = vector.broadcast %464 : vector<10x1xf32> to vector<10x10xf32>
    %466 = arith.mulf %461, %465 : vector<10x10xf32>
    %cst_172 = arith.constant dense<0.000000e+00> : vector<10x8xf32>
    %467 = tpu.matmul %466, %452, %cst_172 {dimension_numbers = #tpu.dot_dimension_numbers<[1], [0], [0], [1], [0, 0, 1, 1], [], []>} : vector<10x10xf32>, vector<10x8xf32>, vector<10x8xf32> -> vector<10x8xf32>
    %468 = tpu.concatenate %413, %431, %449, %467 in 1 : vector<10x8xf32>, vector<10x8xf32>, vector<10x8xf32>, vector<10x8xf32> -> vector<10x32xf32>
    %469 = tpu.concatenate %395, %468 in 0 : vector<10x32xf32>, vector<10x32xf32> -> vector<20x32xf32>
    %c1_173 = arith.constant 1 : index
    %c0_174 = arith.constant 0 : index
    %c0_175 = arith.constant 0 : index
    %470 = vector.load %arg13[%c1_173, %c0_174, %c0_175] : memref<2x32x32xf32, #tpu.memory_space<vmem>>, vector<1x32x32xf32>
    %471 = vector.shape_cast %470 : vector<1x32x32xf32> to vector<32x32xf32>
    %cst_176 = arith.constant dense<0.000000e+00> : vector<20x32xf32>
    %472 = tpu.matmul %469, %471, %cst_176 {dimension_numbers = #tpu.dot_dimension_numbers<[1], [0], [0], [1], [0, 0, 1, 1], [], []>} : vector<20x32xf32>, vector<32x32xf32>, vector<20x32xf32> -> vector<20x32xf32>
    %473 = arith.addf %295, %472 : vector<20x32xf32>
    %c1_177 = arith.constant 1 : index
    %c0_178 = arith.constant 0 : index
    %c0_179 = arith.constant 0 : index
    %474 = vector.load %arg14[%c1_177, %c0_178, %c0_179] : memref<2x1x32xf32, #tpu.memory_space<vmem>>, vector<1x1x32xf32>
    %475 = vector.shape_cast %474 : vector<1x1x32xf32> to vector<1x32xf32>
    %c1_180 = arith.constant 1 : index
    %c0_181 = arith.constant 0 : index
    %c0_182 = arith.constant 0 : index
    %476 = vector.load %arg15[%c1_180, %c0_181, %c0_182] : memref<2x1x32xf32, #tpu.memory_space<vmem>>, vector<1x1x32xf32>
    %477 = vector.shape_cast %476 : vector<1x1x32xf32> to vector<1x32xf32>
    %cst_183 = arith.constant dense<0.000000e+00> : vector<20xf32>
    %478 = vector.multi_reduction <add>, %473, %cst_183 [1] : vector<20x32xf32> to vector<20xf32>
    %479 = vector.shape_cast %478 : vector<20xf32> to vector<20x1xf32>
    %cst_184 = arith.constant 3.200000e+01 : f32
    %480 = vector.broadcast %cst_184 : f32 to vector<20x1xf32>
    %481 = arith.divf %479, %480 : vector<20x1xf32>
    %482 = vector.broadcast %481 : vector<20x1xf32> to vector<20x32xf32>
    %483 = arith.subf %473, %482 : vector<20x32xf32>
    %484 = arith.mulf %483, %483 : vector<20x32xf32>
    %cst_185 = arith.constant dense<0.000000e+00> : vector<20xf32>
    %485 = vector.multi_reduction <add>, %484, %cst_185 [1] : vector<20x32xf32> to vector<20xf32>
    %486 = vector.shape_cast %485 : vector<20xf32> to vector<20x1xf32>
    %cst_186 = arith.constant 3.200000e+01 : f32
    %487 = vector.broadcast %cst_186 : f32 to vector<20x1xf32>
    %488 = arith.divf %486, %487 : vector<20x1xf32>
    %cst_187 = arith.constant 9.99999974E-6 : f32
    %489 = vector.broadcast %cst_187 : f32 to vector<20x1xf32>
    %490 = arith.addf %488, %489 : vector<20x1xf32>
    %491 = math.rsqrt %490 : vector<20x1xf32>
    %492 = vector.broadcast %491 : vector<20x1xf32> to vector<20x32xf32>
    %493 = arith.mulf %483, %492 : vector<20x32xf32>
    %494 = vector.broadcast %475 : vector<1x32xf32> to vector<20x32xf32>
    %495 = arith.mulf %493, %494 : vector<20x32xf32>
    %496 = vector.broadcast %477 : vector<1x32xf32> to vector<20x32xf32>
    %497 = arith.addf %495, %496 : vector<20x32xf32>
    %c1_188 = arith.constant 1 : index
    %c0_189 = arith.constant 0 : index
    %c0_190 = arith.constant 0 : index
    %498 = vector.load %arg16[%c1_188, %c0_189, %c0_190] : memref<2x32x64xf32, #tpu.memory_space<vmem>>, vector<1x32x64xf32>
    %499 = vector.shape_cast %498 : vector<1x32x64xf32> to vector<32x64xf32>
    %cst_191 = arith.constant dense<0.000000e+00> : vector<20x64xf32>
    %500 = tpu.matmul %497, %499, %cst_191 {dimension_numbers = #tpu.dot_dimension_numbers<[1], [0], [0], [1], [0, 0, 1, 1], [], []>} : vector<20x32xf32>, vector<32x64xf32>, vector<20x64xf32> -> vector<20x64xf32>
    %c1_192 = arith.constant 1 : index
    %c0_193 = arith.constant 0 : index
    %c0_194 = arith.constant 0 : index
    %501 = vector.load %arg17[%c1_192, %c0_193, %c0_194] : memref<2x1x64xf32, #tpu.memory_space<vmem>>, vector<1x1x64xf32>
    %502 = vector.shape_cast %501 : vector<1x1x64xf32> to vector<1x64xf32>
    %503 = vector.broadcast %502 : vector<1x64xf32> to vector<20x64xf32>
    %504 = arith.addf %500, %503 : vector<20x64xf32>
    %cst_195 = arith.constant 5.000000e-01 : f32
    %505 = vector.broadcast %cst_195 : f32 to vector<20x64xf32>
    %506 = arith.mulf %505, %504 : vector<20x64xf32>
    %cst_196 = arith.constant 0.707106769 : f32
    %507 = vector.broadcast %cst_196 : f32 to vector<20x64xf32>
    %508 = arith.mulf %504, %507 : vector<20x64xf32>
    %509 = math.absf %508 : vector<20x64xf32>
    %cst_197 = arith.constant 0.327591091 : f32
    %510 = vector.broadcast %cst_197 : f32 to vector<20x64xf32>
    %511 = arith.mulf %510, %509 : vector<20x64xf32>
    %cst_198 = arith.constant 1.000000e+00 : f32
    %512 = vector.broadcast %cst_198 : f32 to vector<20x64xf32>
    %513 = arith.addf %512, %511 : vector<20x64xf32>
    %cst_199 = arith.constant 1.000000e+00 : f32
    %514 = vector.broadcast %cst_199 : f32 to vector<20x64xf32>
    %515 = arith.divf %514, %513 : vector<20x64xf32>
    %cst_200 = arith.constant 1.06140542 : f32
    %516 = vector.broadcast %cst_200 : f32 to vector<20x64xf32>
    %517 = arith.mulf %516, %515 : vector<20x64xf32>
    %cst_201 = arith.constant 1.45315206 : f32
    %518 = vector.broadcast %cst_201 : f32 to vector<20x64xf32>
    %519 = arith.subf %517, %518 : vector<20x64xf32>
    %520 = arith.mulf %519, %515 : vector<20x64xf32>
    %cst_202 = arith.constant 1.42141378 : f32
    %521 = vector.broadcast %cst_202 : f32 to vector<20x64xf32>
    %522 = arith.addf %520, %521 : vector<20x64xf32>
    %523 = arith.mulf %522, %515 : vector<20x64xf32>
    %cst_203 = arith.constant 0.284496725 : f32
    %524 = vector.broadcast %cst_203 : f32 to vector<20x64xf32>
    %525 = arith.subf %523, %524 : vector<20x64xf32>
    %526 = arith.mulf %525, %515 : vector<20x64xf32>
    %cst_204 = arith.constant 0.254829586 : f32
    %527 = vector.broadcast %cst_204 : f32 to vector<20x64xf32>
    %528 = arith.addf %526, %527 : vector<20x64xf32>
    %529 = arith.mulf %528, %515 : vector<20x64xf32>
    %cst_205 = arith.constant 0.000000e+00 : f32
    %530 = vector.broadcast %cst_205 : f32 to vector<20x64xf32>
    %531 = arith.subf %530, %509 : vector<20x64xf32>
    %532 = arith.mulf %531, %509 : vector<20x64xf32>
    %533 = math.exp %532 : vector<20x64xf32>
    %534 = arith.mulf %529, %533 : vector<20x64xf32>
    %cst_206 = arith.constant 1.000000e+00 : f32
    %535 = vector.broadcast %cst_206 : f32 to vector<20x64xf32>
    %536 = arith.subf %535, %534 : vector<20x64xf32>
    %cst_207 = arith.constant 0.000000e+00 : f32
    %537 = vector.broadcast %cst_207 : f32 to vector<20x64xf32>
    %538 = arith.cmpf oge, %508, %537 : vector<20x64xf32>
    %cst_208 = arith.constant 0.000000e+00 : f32
    %539 = vector.broadcast %cst_208 : f32 to vector<20x64xf32>
    %540 = arith.subf %539, %536 : vector<20x64xf32>
    %541 = arith.select %538, %536, %540 : vector<20x64xi1>, vector<20x64xf32>
    %cst_209 = arith.constant 1.000000e+00 : f32
    %542 = vector.broadcast %cst_209 : f32 to vector<20x64xf32>
    %543 = arith.addf %542, %541 : vector<20x64xf32>
    %544 = arith.mulf %506, %543 : vector<20x64xf32>
    %c1_210 = arith.constant 1 : index
    %c0_211 = arith.constant 0 : index
    %c0_212 = arith.constant 0 : index
    %545 = vector.load %arg18[%c1_210, %c0_211, %c0_212] : memref<2x64x32xf32, #tpu.memory_space<vmem>>, vector<1x64x32xf32>
    %546 = vector.shape_cast %545 : vector<1x64x32xf32> to vector<64x32xf32>
    %cst_213 = arith.constant dense<0.000000e+00> : vector<20x32xf32>
    %547 = tpu.matmul %544, %546, %cst_213 {dimension_numbers = #tpu.dot_dimension_numbers<[1], [0], [0], [1], [0, 0, 1, 1], [], []>} : vector<20x64xf32>, vector<64x32xf32>, vector<20x32xf32> -> vector<20x32xf32>
    %548 = arith.addf %473, %547 : vector<20x32xf32>
    %c1_214 = arith.constant 1 : index
    %c0_215 = arith.constant 0 : index
    %c0_216 = arith.constant 0 : index
    %549 = vector.load %arg19[%c1_214, %c0_215, %c0_216] : memref<2x1x32xf32, #tpu.memory_space<vmem>>, vector<1x1x32xf32>
    %550 = vector.shape_cast %549 : vector<1x1x32xf32> to vector<1x32xf32>
    %551 = vector.broadcast %550 : vector<1x32xf32> to vector<20x32xf32>
    %552 = arith.addf %548, %551 : vector<20x32xf32>
    %c0_217 = arith.constant 0 : index
    %c0_218 = arith.constant 0 : index
    %553 = vector.load %arg20[%c0_217, %c0_218] : memref<1x32xf32, #tpu.memory_space<vmem>>, vector<1x32xf32>
    %c0_219 = arith.constant 0 : index
    %c0_220 = arith.constant 0 : index
    %554 = vector.load %arg21[%c0_219, %c0_220] : memref<1x32xf32, #tpu.memory_space<vmem>>, vector<1x32xf32>
    %cst_221 = arith.constant dense<0.000000e+00> : vector<20xf32>
    %555 = vector.multi_reduction <add>, %552, %cst_221 [1] : vector<20x32xf32> to vector<20xf32>
    %556 = vector.shape_cast %555 : vector<20xf32> to vector<20x1xf32>
    %cst_222 = arith.constant 3.200000e+01 : f32
    %557 = vector.broadcast %cst_222 : f32 to vector<20x1xf32>
    %558 = arith.divf %556, %557 : vector<20x1xf32>
    %559 = vector.broadcast %558 : vector<20x1xf32> to vector<20x32xf32>
    %560 = arith.subf %552, %559 : vector<20x32xf32>
    %561 = arith.mulf %560, %560 : vector<20x32xf32>
    %cst_223 = arith.constant dense<0.000000e+00> : vector<20xf32>
    %562 = vector.multi_reduction <add>, %561, %cst_223 [1] : vector<20x32xf32> to vector<20xf32>
    %563 = vector.shape_cast %562 : vector<20xf32> to vector<20x1xf32>
    %cst_224 = arith.constant 3.200000e+01 : f32
    %564 = vector.broadcast %cst_224 : f32 to vector<20x1xf32>
    %565 = arith.divf %563, %564 : vector<20x1xf32>
    %cst_225 = arith.constant 9.99999974E-6 : f32
    %566 = vector.broadcast %cst_225 : f32 to vector<20x1xf32>
    %567 = arith.addf %565, %566 : vector<20x1xf32>
    %568 = math.rsqrt %567 : vector<20x1xf32>
    %569 = vector.broadcast %568 : vector<20x1xf32> to vector<20x32xf32>
    %570 = arith.mulf %560, %569 : vector<20x32xf32>
    %571 = vector.broadcast %553 : vector<1x32xf32> to vector<20x32xf32>
    %572 = arith.mulf %570, %571 : vector<20x32xf32>
    %573 = vector.broadcast %554 : vector<1x32xf32> to vector<20x32xf32>
    %574 = arith.addf %572, %573 : vector<20x32xf32>
    %575 = vector.extract_strided_slice %574 {offsets = [7, 0], sizes = [3, 32], strides = [1, 1]} : vector<20x32xf32> to vector<3x32xf32>
    %576 = vector.extract_strided_slice %574 {offsets = [17, 0], sizes = [3, 32], strides = [1, 1]} : vector<20x32xf32> to vector<3x32xf32>
    %577 = tpu.concatenate %575, %576 in 0 : vector<3x32xf32>, vector<3x32xf32> -> vector<6x32xf32>
    %c0_226 = arith.constant 0 : index
    %c0_227 = arith.constant 0 : index
    %578 = vector.load %arg22[%c0_226, %c0_227] : memref<1x32xf32, #tpu.memory_space<vmem>>, vector<1x32xf32>
    %c0_228 = arith.constant 0 : index
    %c0_229 = arith.constant 0 : index
    %579 = vector.load %arg23[%c0_228, %c0_229] : memref<1x32xf32, #tpu.memory_space<vmem>>, vector<1x32xf32>
    %cst_230 = arith.constant dense<0.000000e+00> : vector<6xf32>
    %580 = vector.multi_reduction <add>, %577, %cst_230 [1] : vector<6x32xf32> to vector<6xf32>
    %581 = vector.shape_cast %580 : vector<6xf32> to vector<6x1xf32>
    %cst_231 = arith.constant 3.200000e+01 : f32
    %582 = vector.broadcast %cst_231 : f32 to vector<6x1xf32>
    %583 = arith.divf %581, %582 : vector<6x1xf32>
    %584 = vector.broadcast %583 : vector<6x1xf32> to vector<6x32xf32>
    %585 = arith.subf %577, %584 : vector<6x32xf32>
    %586 = arith.mulf %585, %585 : vector<6x32xf32>
    %cst_232 = arith.constant dense<0.000000e+00> : vector<6xf32>
    %587 = vector.multi_reduction <add>, %586, %cst_232 [1] : vector<6x32xf32> to vector<6xf32>
    %588 = vector.shape_cast %587 : vector<6xf32> to vector<6x1xf32>
    %cst_233 = arith.constant 3.200000e+01 : f32
    %589 = vector.broadcast %cst_233 : f32 to vector<6x1xf32>
    %590 = arith.divf %588, %589 : vector<6x1xf32>
    %cst_234 = arith.constant 9.99999974E-6 : f32
    %591 = vector.broadcast %cst_234 : f32 to vector<6x1xf32>
    %592 = arith.addf %590, %591 : vector<6x1xf32>
    %593 = math.rsqrt %592 : vector<6x1xf32>
    %594 = vector.broadcast %593 : vector<6x1xf32> to vector<6x32xf32>
    %595 = arith.mulf %585, %594 : vector<6x32xf32>
    %596 = vector.broadcast %578 : vector<1x32xf32> to vector<6x32xf32>
    %597 = arith.mulf %595, %596 : vector<6x32xf32>
    %598 = vector.broadcast %579 : vector<1x32xf32> to vector<6x32xf32>
    %599 = arith.addf %597, %598 : vector<6x32xf32>
    %c0_235 = arith.constant 0 : index
    %c0_236 = arith.constant 0 : index
    %600 = vector.load %arg24[%c0_235, %c0_236] : memref<32x32xf32, #tpu.memory_space<vmem>>, vector<32x32xf32>
    %cst_237 = arith.constant dense<0.000000e+00> : vector<6x32xf32>
    %601 = tpu.matmul %599, %600, %cst_237 {dimension_numbers = #tpu.dot_dimension_numbers<[1], [0], [0], [1], [0, 0, 1, 1], [], []>} : vector<6x32xf32>, vector<32x32xf32>, vector<6x32xf32> -> vector<6x32xf32>
    %c0_238 = arith.constant 0 : index
    %c0_239 = arith.constant 0 : index
    %602 = vector.load %arg25[%c0_238, %c0_239] : memref<1x32xf32, #tpu.memory_space<vmem>>, vector<1x32xf32>
    %603 = vector.broadcast %602 : vector<1x32xf32> to vector<6x32xf32>
    %604 = arith.addf %601, %603 : vector<6x32xf32>
    %cst_240 = arith.constant 5.000000e-01 : f32
    %605 = vector.broadcast %cst_240 : f32 to vector<6x32xf32>
    %606 = arith.mulf %605, %604 : vector<6x32xf32>
    %cst_241 = arith.constant 0.707106769 : f32
    %607 = vector.broadcast %cst_241 : f32 to vector<6x32xf32>
    %608 = arith.mulf %604, %607 : vector<6x32xf32>
    %609 = math.absf %608 : vector<6x32xf32>
    %cst_242 = arith.constant 0.327591091 : f32
    %610 = vector.broadcast %cst_242 : f32 to vector<6x32xf32>
    %611 = arith.mulf %610, %609 : vector<6x32xf32>
    %cst_243 = arith.constant 1.000000e+00 : f32
    %612 = vector.broadcast %cst_243 : f32 to vector<6x32xf32>
    %613 = arith.addf %612, %611 : vector<6x32xf32>
    %cst_244 = arith.constant 1.000000e+00 : f32
    %614 = vector.broadcast %cst_244 : f32 to vector<6x32xf32>
    %615 = arith.divf %614, %613 : vector<6x32xf32>
    %cst_245 = arith.constant 1.06140542 : f32
    %616 = vector.broadcast %cst_245 : f32 to vector<6x32xf32>
    %617 = arith.mulf %616, %615 : vector<6x32xf32>
    %cst_246 = arith.constant 1.45315206 : f32
    %618 = vector.broadcast %cst_246 : f32 to vector<6x32xf32>
    %619 = arith.subf %617, %618 : vector<6x32xf32>
    %620 = arith.mulf %619, %615 : vector<6x32xf32>
    %cst_247 = arith.constant 1.42141378 : f32
    %621 = vector.broadcast %cst_247 : f32 to vector<6x32xf32>
    %622 = arith.addf %620, %621 : vector<6x32xf32>
    %623 = arith.mulf %622, %615 : vector<6x32xf32>
    %cst_248 = arith.constant 0.284496725 : f32
    %624 = vector.broadcast %cst_248 : f32 to vector<6x32xf32>
    %625 = arith.subf %623, %624 : vector<6x32xf32>
    %626 = arith.mulf %625, %615 : vector<6x32xf32>
    %cst_249 = arith.constant 0.254829586 : f32
    %627 = vector.broadcast %cst_249 : f32 to vector<6x32xf32>
    %628 = arith.addf %626, %627 : vector<6x32xf32>
    %629 = arith.mulf %628, %615 : vector<6x32xf32>
    %cst_250 = arith.constant 0.000000e+00 : f32
    %630 = vector.broadcast %cst_250 : f32 to vector<6x32xf32>
    %631 = arith.subf %630, %609 : vector<6x32xf32>
    %632 = arith.mulf %631, %609 : vector<6x32xf32>
    %633 = math.exp %632 : vector<6x32xf32>
    %634 = arith.mulf %629, %633 : vector<6x32xf32>
    %cst_251 = arith.constant 1.000000e+00 : f32
    %635 = vector.broadcast %cst_251 : f32 to vector<6x32xf32>
    %636 = arith.subf %635, %634 : vector<6x32xf32>
    %cst_252 = arith.constant 0.000000e+00 : f32
    %637 = vector.broadcast %cst_252 : f32 to vector<6x32xf32>
    %638 = arith.cmpf oge, %608, %637 : vector<6x32xf32>
    %cst_253 = arith.constant 0.000000e+00 : f32
    %639 = vector.broadcast %cst_253 : f32 to vector<6x32xf32>
    %640 = arith.subf %639, %636 : vector<6x32xf32>
    %641 = arith.select %638, %636, %640 : vector<6x32xi1>, vector<6x32xf32>
    %cst_254 = arith.constant 1.000000e+00 : f32
    %642 = vector.broadcast %cst_254 : f32 to vector<6x32xf32>
    %643 = arith.addf %642, %641 : vector<6x32xf32>
    %644 = arith.mulf %606, %643 : vector<6x32xf32>
    %c0_255 = arith.constant 0 : index
    %c0_256 = arith.constant 0 : index
    %645 = vector.load %arg26[%c0_255, %c0_256] : memref<32x128xf32, #tpu.memory_space<vmem>>, vector<32x128xf32>
    %cst_257 = arith.constant dense<0.000000e+00> : vector<6x128xf32>
    %646 = tpu.matmul %644, %645, %cst_257 {dimension_numbers = #tpu.dot_dimension_numbers<[1], [0], [0], [1], [0, 0, 1, 1], [], []>} : vector<6x32xf32>, vector<32x128xf32>, vector<6x128xf32> -> vector<6x128xf32>
    %c0_258 = arith.constant 0 : index
    %c0_259 = arith.constant 0 : index
    %647 = vector.load %arg27[%c0_258, %c0_259] : memref<1x128xf32, #tpu.memory_space<vmem>>, vector<1x128xf32>
    %648 = vector.broadcast %647 : vector<1x128xf32> to vector<6x128xf32>
    %649 = arith.addf %646, %648 : vector<6x128xf32>
    %c0_260 = arith.constant 0 : index
    %c0_261 = arith.constant 0 : index
    %650 = vector.load %arg28[%c0_260, %c0_261] : memref<6x128xf32, #tpu.memory_space<vmem>>, vector<6x128xf32>
    tpu.vector_store %arg28[%c0_260, %c0_261], %649 {strides = array<i32>} : memref<6x128xf32, #tpu.memory_space<vmem>>, vector<6x128xf32>,
    return
  }
}

</mosaic_0001>

<bundles_post_ra>
// kernel: tpu_custom_call.1
= control target key start
LH: loop header
LB: loop body
LE: loop exit
PB: predicated region body
PF: predicated region fallthrough
CT: control target
= control target key end

     0   :  { %s8940_s0 = inlined_call_operand.hbm [shape: f32[8,16], index: 0, kind: input, shape index: {}]   ;;  %s8941_s1 = inlined_call_operand.vmem [shape: f32[2,6], index: 1, kind: input, shape index: {}]   ;;  %s8942_s2 = inlined_call_operand.hbm [shape: f32[4,32], index: 2, kind: input, shape index: {}]   ;;  %s8943_s3 = inlined_call_operand.hbm [shape: f32[10,10], index: 3, kind: input, shape index: {}]   ;;  %s8944_s4 = inlined_call_operand.hbm [shape: f32[16,32], index: 4, kind: input, shape index: {}]   ;;  %s8945_s5 = inlined_call_operand.hbm [shape: f32[1,32], index: 5, kind: input, shape index: {}]   ;;  %s8946_s6 = inlined_call_operand.hbm [shape: f32[6,32], index: 6, kind: input, shape index: {}]   ;;  %s8947_s7 = inlined_call_operand.hbm [shape: f32[1,32], index: 7, kind: input, shape index: {}]   ;;  %s8948_s8 = inlined_call_operand.hbm [shape: f32[3,32], index: 8, kind: input, shape index: {}]   ;;  %s8949_s9 = inlined_call_operand.hbm [shape: f32[10,32], index: 9, kind: input, shape index: {}]   ;;  %s8950_s10 = inlined_call_operand.hbm [shape: f32[2,1,32], index: 10, kind: input, shape index: {}]   ;;  %s8951_s11 = inlined_call_operand.hbm [shape: f32[2,1,32], index: 11, kind: input, shape index: {}]   ;;  %s8952_s12 = inlined_call_operand.vmem [shape: f32[2,32,96], index: 12, kind: input, shape index: {}]   ;;  %s8953_s13 = inlined_call_operand.vmem [shape: f32[2,32,32], index: 13, kind: input, shape index: {}]   ;;  %s8954_s14 = inlined_call_operand.hbm [shape: f32[2,1,32], index: 14, kind: input, shape index: {}]   ;;  %s8955_s15 = inlined_call_operand.hbm [shape: f32[2,1,32], index: 15, kind: input, shape index: {}]   ;;  %s8956_s16 = inlined_call_operand.vmem [shape: f32[2,32,64], index: 16, kind: input, shape index: {}]   ;;  %s8957_s17 = inlined_call_operand.hbm [shape: f32[2,1,64], index: 17, kind: input, shape index: {}]   ;;  %s8958_s18 = inlined_call_operand.vmem [shape: f32[2,64,32], index: 18, kind: input, shape index: {}]   ;;  %s8959_s19 = inlined_call_operand.hbm [shape: f32[2,1,32], index: 19, kind: input, shape index: {}]   ;;  %s8960_s20 = inlined_call_operand.hbm [shape: f32[1,32], index: 20, kind: input, shape index: {}]   ;;  %s8961_s21 = inlined_call_operand.hbm [shape: f32[1,32], index: 21, kind: input, shape index: {}]   ;;  %s8962_s22 = inlined_call_operand.hbm [shape: f32[1,32], index: 22, kind: input, shape index: {}]   ;;  %s8963_s23 = inlined_call_operand.hbm [shape: f32[1,32], index: 23, kind: input, shape index: {}]   ;;  %s8964_s24 = inlined_call_operand.hbm [shape: f32[32,32], index: 24, kind: input, shape index: {}]   ;;  %s8965_s25 = inlined_call_operand.hbm [shape: f32[1,32], index: 25, kind: input, shape index: {}]   ;;  %s8966_s26 = inlined_call_operand.vmem [shape: f32[32,128], index: 26, kind: input, shape index: {}]   ;;  %s8967_s27 = inlined_call_operand.vmem [shape: f32[1,128], index: 27, kind: input, shape index: {}]   ;;  %s8968_s28 = inlined_call_operand.hbm [shape: f32[6,128], index: 28, kind: output, shape index: {}]  }
   0x1   :  { %8986 = sst [smem:[#allocation48_spill]] %s8940_s0 }
   0x2   :  { %8987 = sst [smem:[#allocation49_spill]] %s8941_s1 }
   0x3   :  { %8988 = sst [smem:[#allocation50_spill]] %s8942_s2 }
   0x4   :  { %8989 = sst [smem:[#allocation51_spill]] %s8943_s3 }
   0x5   :  { %8990 = sst [smem:[#allocation52_spill]] %s8944_s4 }
   0x6   :  { %8991 = sst [smem:[#allocation53_spill]] %s8945_s5 }
   0x7   :  { %8992 = sst [smem:[#allocation54_spill]] %s8946_s6 }
   0x8   :  { %8993 = sst [smem:[#allocation55_spill]] %s8947_s7 }
   0x9   :  { %8994 = sst [smem:[#allocation56_spill]] %s8948_s8 }
   0xa   :  { %8995 = sst [smem:[#allocation57_spill]] %s8949_s9 }
   0xb   :  { %8996 = sst [smem:[#allocation58_spill]] %s8950_s10 }
   0xc   :  { %8997 = sst [smem:[#allocation59_spill]] %s8951_s11 }
   0xd   :  { %8998 = sst [smem:[#allocation60_spill]] %s8952_s12 }
   0xe   :  { %8999 = sst [smem:[#allocation61_spill]] %s8967_s27 }
   0xf   :  { %9000 = sst [smem:[#allocation62_spill]] %s8968_s28 }
  0x10   :  { %33 = vsyncpa [#allocation3], 0 }
  0x11   :  { %34 = vsyncpa [#allocation6], 0 }
  0x12   :  { %35 = vsyncpa [#allocation9], 0 }
  0x13   :  { %36 = vsyncpa [#allocation12], 0 }
  0x14   :  { %37 = vsyncpa [#allocation15], 0 }
  0x15   :  { %38 = vsyncpa [#allocation18], 0 }
  0x16   :  { %39 = vsyncpa [#allocation21], 0 }
  0x17   :  { %40 = vsyncpa [#allocation24], 0 }
  0x18   :  { %41 = vsyncpa [#allocation27], 0 }
  0x19   :  { %42 = vsyncpa [#allocation30], 0 }
  0x1a   :  { %43 = vsyncpa [#allocation33], 0 }
  0x1b   :  { %44 = vsyncpa [#allocation4], 0  ;;  %s7494_s8 = smov [#allocation5]   ;;  %s9001_s3 = sld [smem:[#allocation50_spill]] }
  0x1c   :  { %s63_s5 = sshll.u32 %s7494_s8, 4  ;;  %s64_s5 = int_to_ptr.vmem [resolvable:$true] %s63_s5 }
  0x21   :  { %s6986_s6 = scalar_lea.hbm %s9001_s3, 64 }
  0x22   :  { %p6987_p0 = scmp.ne.s32.totalorder %s9001_s3, %s6986_s6  ;;  %p6990_p1 = scmp.lt.u32.totalorder %s6986_s6, %s9001_s3 }
  0x24   :  { %p6992_p2 = pnand %p6990_p1, %p6987_p0 }
  0x26   :  { %6995 = shalt.err (!%p6992_p2)
}
  0x27   :  { %s6996_s2 = scalar_lea.vmem %s64_s5, 64  ;;  %p7001_p4 = scmp.lt.s32.totalorder %s64_s5, %s64_s5 }
  0x28   :  { %p6997_p3 = scmp.ne.s32.totalorder %s64_s5, %s6996_s2  ;;  %p7002_p5 = scmp.lt.s32.totalorder %s6996_s2, %s6996_s2 }
  0x2a   :  { %p7003_p6 = por %p7002_p5, %p7001_p4 }
  0x2c   :  { %p7004_p7 = pnand %p7003_p6, %p6997_p3 }
  0x2e   :  { %7007 = shalt.err (!%p7004_p7)
}
  0x2f   :  { %66 = dma.hbm_to_vmem [thread:$0]  %s9001_s3, 64, %s64_s5, [#allocation6]  }
  0x30   :  { %s7495_s1 = smov [#allocation8]   ;;  %s7496_s8 = smov [#allocation11]  }
  0x31   :  { %s84_s4 = sshll.u32 %s7495_s1, 4  ;;  %s107_s9 = sshll.u32 %s7496_s8, 4  ;;  %s85_s4 = int_to_ptr.vmem [resolvable:$true] %s84_s4  ;;  %s108_s9 = int_to_ptr.vmem [resolvable:$true] %s107_s9 }
  0x32   :  { %s9002_s10 = sld [smem:[#allocation52_spill]] }
  0x38   :  { %s7008_s0 = scalar_lea.hbm %s9002_s10, 256 }
  0x39   :  { %p7009_p8 = scmp.ne.s32.totalorder %s9002_s10, %s7008_s0  ;;  %p7012_p9 = scmp.lt.u32.totalorder %s7008_s0, %s9002_s10 }
  0x3b   :  { %p7014_p10 = pnand %p7012_p9, %p7009_p8 }
  0x3d   :  { %7017 = shalt.err (!%p7014_p10)
}
  0x3e   :  { %s7018_s5 = scalar_lea.vmem %s85_s4, 256  ;;  %p7023_p12 = scmp.lt.s32.totalorder %s85_s4, %s85_s4 }
  0x3f   :  { %p7019_p11 = scmp.ne.s32.totalorder %s85_s4, %s7018_s5  ;;  %p7024_p13 = scmp.lt.s32.totalorder %s7018_s5, %s7018_s5 }
  0x41   :  { %p7025_p0 = por %p7024_p13, %p7023_p12 }
  0x43   :  { %p7026_p1 = pnand %p7025_p0, %p7019_p11 }
  0x45   :  { %7029 = shalt.err (!%p7026_p1)
}
  0x46   :  { %s8982_s3 = smov 128   ;;  %s8984_s7 = smov 8  }
  0x47   :  { %90 = dma.hbm_to_vmem [thread:$0]  %s9002_s10, 256, %s85_s4, [#allocation9], %s8982_s3, %s8982_s3, %s8984_s7  }
  0x48   :  { %s9003_s30 = sld [smem:[#allocation54_spill]] }
  0x4e   :  { %s7030_s6 = scalar_lea.hbm %s9003_s30, 128 }
  0x4f   :  { %p7031_p2 = scmp.ne.s32.totalorder %s9003_s30, %s7030_s6  ;;  %p7034_p3 = scmp.lt.u32.totalorder %s7030_s6, %s9003_s30 }
  0x51   :  { %p7036_p4 = pnand %p7034_p3, %p7031_p2 }
  0x53   :  { %7039 = shalt.err (!%p7036_p4)
}
  0x54   :  { %s7040_s5 = scalar_lea.vmem %s108_s9, 128  ;;  %p7045_p6 = scmp.lt.s32.totalorder %s108_s9, %s108_s9 }
  0x55   :  { %p7041_p5 = scmp.ne.s32.totalorder %s108_s9, %s7040_s5  ;;  %p7046_p7 = scmp.lt.s32.totalorder %s7040_s5, %s7040_s5 }
  0x57   :  { %p7047_p8 = por %p7046_p7, %p7045_p6 }
  0x59   :  { %p7048_p9 = pnand %p7047_p8, %p7041_p5 }
  0x5b   :  { %7051 = shalt.err (!%p7048_p9)
}
  0x5c   :  { %110 = dma.hbm_to_vmem [thread:$0]  %s9003_s30, 128, %s108_s9, [#allocation12]  }
  0x5d   :  { %s7499_s12 = smov [#allocation14]   ;;  %s7500_s28 = smov [#allocation17]  }
  0x5e   :  { %s127_s1 = sshll.u32 %s7499_s12, 4  ;;  %s148_s8 = sshll.u32 %s7500_s28, 4  ;;  %s128_s1 = int_to_ptr.vmem [resolvable:$true] %s127_s1  ;;  %s149_s8 = int_to_ptr.vmem [resolvable:$true] %s148_s8 }
  0x5f   :  { %s9004_s11 = sld [smem:[#allocation56_spill]] }
  0x65   :  { %s7052_s29 = scalar_lea.hbm %s9004_s11, 64 }
  0x66   :  { %p7053_p10 = scmp.ne.s32.totalorder %s9004_s11, %s7052_s29  ;;  %p7056_p11 = scmp.lt.u32.totalorder %s7052_s29, %s9004_s11 }
  0x68   :  { %p7058_p12 = pnand %p7056_p11, %p7053_p10 }
  0x6a   :  { %7061 = shalt.err (!%p7058_p12)
}
  0x6b   :  { %s7062_s9 = scalar_lea.vmem %s128_s1, 64  ;;  %p7067_p0 = scmp.lt.s32.totalorder %s128_s1, %s128_s1 }
  0x6c   :  { %p7063_p13 = scmp.ne.s32.totalorder %s128_s1, %s7062_s9  ;;  %p7068_p1 = scmp.lt.s32.totalorder %s7062_s9, %s7062_s9 }
  0x6e   :  { %p7069_p2 = por %p7068_p1, %p7067_p0 }
  0x70   :  { %p7070_p3 = pnand %p7069_p2, %p7063_p13 }
  0x72   :  { %7073 = shalt.err (!%p7070_p3)
}
  0x73   :  { %130 = dma.hbm_to_vmem [thread:$0]  %s9004_s11, 64, %s128_s1, [#allocation15]  }
  0x74   :  { %s9005_s12 = sld [smem:[#allocation58_spill]] }
  0x7a   :  { %s7074_s28 = scalar_lea.hbm %s9005_s12, 32 }
  0x7b   :  { %p7075_p4 = scmp.ne.s32.totalorder %s9005_s12, %s7074_s28  ;;  %p7078_p5 = scmp.lt.u32.totalorder %s7074_s28, %s9005_s12 }
  0x7d   :  { %p7080_p6 = pnand %p7078_p5, %p7075_p4 }
  0x7f   :  { %7083 = shalt.err (!%p7080_p6)
}
  0x80   :  { %s7084_s2 = scalar_lea.vmem %s149_s8, 32  ;;  %p7089_p8 = scmp.lt.s32.totalorder %s149_s8, %s149_s8 }
  0x81   :  { %p7085_p7 = scmp.ne.s32.totalorder %s149_s8, %s7084_s2  ;;  %p7090_p9 = scmp.lt.s32.totalorder %s7084_s2, %s7084_s2 }
  0x83   :  { %p7091_p10 = por %p7090_p9, %p7089_p8 }
  0x85   :  { %p7092_p11 = pnand %p7091_p10, %p7085_p7 }
  0x87   :  { %7095 = shalt.err (!%p7092_p11)
}
  0x88   :  { %s7501_s1 = smov 16   ;;  %s7502_s11 = smov 1  }
  0x89   :  { %154 = dma.hbm_to_vmem [thread:$0]  %s9005_s12, 32, %s149_s8, [#allocation18], %s7501_s1, %s7501_s1, %s7502_s11  }
  0x8a   :  { %s7503_s30 = smov [#allocation20]   ;;  %s7504_s3 = smov [#allocation23]  }
  0x8b   :  { %s176_s4 = sshll.u32 %s7503_s30, 4  ;;  %s202_s10 = sshll.u32 %s7504_s3, 4  ;;  %s177_s4 = int_to_ptr.vmem [resolvable:$true] %s176_s4  ;;  %s203_s10 = int_to_ptr.vmem [resolvable:$true] %s202_s10 }
  0x8c   :  { %s7096_s0 = scalar_lea.hbm %s8954_s14, 32 }
  0x8d   :  { %p7097_p12 = scmp.ne.s32.totalorder %s8954_s14, %s7096_s0  ;;  %p7100_p13 = scmp.lt.u32.totalorder %s7096_s0, %s8954_s14 }
  0x8f   :  { %p7102_p0 = pnand %p7100_p13, %p7097_p12 }
  0x91   :  { %7105 = shalt.err (!%p7102_p0)
}
  0x92   :  { %s7106_s8 = scalar_lea.vmem %s177_s4, 32  ;;  %p7111_p2 = scmp.lt.s32.totalorder %s177_s4, %s177_s4 }
  0x93   :  { %p7107_p1 = scmp.ne.s32.totalorder %s177_s4, %s7106_s8  ;;  %p7112_p3 = scmp.lt.s32.totalorder %s7106_s8, %s7106_s8 }
  0x95   :  { %p7113_p4 = por %p7112_p3, %p7111_p2 }
  0x97   :  { %p7114_p5 = pnand %p7113_p4, %p7107_p1 }
  0x99   :  { %7117 = shalt.err (!%p7114_p5)
}
  0x9a   :  { %182 = dma.hbm_to_vmem [thread:$0]  %s8954_s14, 32, %s177_s4, [#allocation21], %s7501_s1, %s7501_s1, %s7502_s11  }
  0x9b   :  { %s7118_s30 = scalar_lea.hbm %s8957_s17, 32 }
  0x9c   :  { %p7119_p6 = scmp.ne.s32.totalorder %s8957_s17, %s7118_s30  ;;  %p7122_p7 = scmp.lt.u32.totalorder %s7118_s30, %s8957_s17 }
  0x9e   :  { %p7124_p8 = pnand %p7122_p7, %p7119_p6 }
  0xa0   :  { %7127 = shalt.err (!%p7124_p8)
}
  0xa1   :  { %s7128_s6 = scalar_lea.vmem %s203_s10, 32  ;;  %p7133_p10 = scmp.lt.s32.totalorder %s203_s10, %s203_s10 }
  0xa2   :  { %p7129_p9 = scmp.ne.s32.totalorder %s203_s10, %s7128_s6  ;;  %p7134_p11 = scmp.lt.s32.totalorder %s7128_s6, %s7128_s6 }
  0xa4   :  { %p7135_p12 = por %p7134_p11, %p7133_p10 }
  0xa6   :  { %p7136_p13 = pnand %p7135_p12, %p7129_p9 }
  0xa8   :  { %7139 = shalt.err (!%p7136_p13)
}
  0xa9   :  { %208 = dma.hbm_to_vmem [thread:$0]  %s8957_s17, 32, %s203_s10, [#allocation24], %s7501_s1, %s7501_s1, %s7502_s11  }
  0xaa   :  { %s7505_s29 = smov [#allocation26]   ;;  %s7506_s8 = smov [#allocation29]  }
  0xab   :  { %s229_s2 = sshll.u32 %s7505_s29, 4  ;;  %s249_s12 = sshll.u32 %s7506_s8, 4  ;;  %s230_s2 = int_to_ptr.vmem [resolvable:$true] %s229_s2  ;;  %s250_s12 = int_to_ptr.vmem [resolvable:$true] %s249_s12 }
  0xac   :  { %s7140_s27 = scalar_lea.hbm %s8960_s20, 16 }
  0xad   :  { %p7141_p0 = scmp.ne.s32.totalorder %s8960_s20, %s7140_s27  ;;  %p7144_p1 = scmp.lt.u32.totalorder %s7140_s27, %s8960_s20 }
  0xaf   :  { %p7146_p2 = pnand %p7144_p1, %p7141_p0 }
  0xb1   :  { %7149 = shalt.err (!%p7146_p2)
}
  0xb2   :  { %s7150_s17 = scalar_lea.vmem %s230_s2, 16  ;;  %s7154_s10 = scalar_lea.vmem %s230_s2, 32 }
  0xb3   :  { %p7151_p3 = scmp.ne.s32.totalorder %s230_s2, %s7150_s17  ;;  %p7155_p4 = scmp.lt.s32.totalorder %s230_s2, %s230_s2 }
  0xb4   :  { %p7156_p5 = scmp.lt.s32.totalorder %s7154_s10, %s7150_s17 }
  0xb6   :  { %p7157_p6 = por %p7156_p5, %p7155_p4 }
  0xb8   :  { %p7158_p7 = pnand %p7157_p6, %p7151_p3 }
  0xba   :  { %7161 = shalt.err (!%p7158_p7)
}
  0xbb   :  { %232 = dma.hbm_to_vmem [thread:$0]  %s8960_s20, 16, %s230_s2, [#allocation27]  }
  0xbc   :  { %s7162_s29 = scalar_lea.hbm %s8962_s22, 16 }
  0xbd   :  { %p7163_p8 = scmp.ne.s32.totalorder %s8962_s22, %s7162_s29  ;;  %p7166_p9 = scmp.lt.u32.totalorder %s7162_s29, %s8962_s22 }
  0xbf   :  { %p7168_p10 = pnand %p7166_p9, %p7163_p8 }
  0xc1   :  { %7171 = shalt.err (!%p7168_p10)
}
  0xc2   :  { %s7172_s30 = scalar_lea.vmem %s250_s12, 16  ;;  %s7176_s3 = scalar_lea.vmem %s250_s12, 32 }
  0xc3   :  { %p7173_p11 = scmp.ne.s32.totalorder %s250_s12, %s7172_s30  ;;  %p7177_p12 = scmp.lt.s32.totalorder %s250_s12, %s250_s12 }
  0xc4   :  { %p7178_p13 = scmp.lt.s32.totalorder %s7176_s3, %s7172_s30 }
  0xc6   :  { %p7179_p0 = por %p7178_p13, %p7177_p12 }
  0xc8   :  { %p7180_p1 = pnand %p7179_p0, %p7173_p11 }
  0xca   :  { %7183 = shalt.err (!%p7180_p1)
}
  0xcb   :  { %252 = dma.hbm_to_vmem [thread:$0]  %s8962_s22, 16, %s250_s12, [#allocation30]  }
  0xcc   :  { %s7507_s28 = smov [#allocation32]   ;;  %s7508_s17 = smov [#allocation2]  }
  0xcd   :  { %s268_s7 = sshll.u32 %s7507_s28, 4  ;;  %s51_s10 = sshll.u32 %s7508_s17, 4  ;;  %s269_s7 = int_to_ptr.vmem [resolvable:$true] %s268_s7  ;;  %s52_s10 = int_to_ptr.vmem [resolvable:$true] %s51_s10 }
  0xce   :  { %s7184_s14 = scalar_lea.hbm %s8964_s24, 512 }
  0xcf   :  { %p7185_p2 = scmp.ne.s32.totalorder %s8964_s24, %s7184_s14  ;;  %p7188_p3 = scmp.lt.u32.totalorder %s7184_s14, %s8964_s24 }
  0xd1   :  { %p7190_p4 = pnand %p7188_p3, %p7185_p2 }
  0xd3   :  { %7193 = shalt.err (!%p7190_p4)
}
  0xd4   :  { %s7194_s22 = scalar_lea.vmem %s269_s7, 512  ;;  %p7199_p6 = scmp.lt.s32.totalorder %s269_s7, %s269_s7 }
  0xd5   :  { %p7195_p5 = scmp.ne.s32.totalorder %s269_s7, %s7194_s22  ;;  %p7200_p7 = scmp.lt.s32.totalorder %s7194_s22, %s7194_s22 }
  0xd7   :  { %p7201_p8 = por %p7200_p7, %p7199_p6 }
  0xd9   :  { %p7202_p9 = pnand %p7201_p8, %p7195_p5 }
  0xdb   :  { %7205 = shalt.err (!%p7202_p9)
}
  0xdc   :  { %s9006_s12 = smov 8   ;;  %s9007_s9 = smov 128  }
  0xdd   :  { %274 = dma.hbm_to_vmem [thread:$0]  %s8964_s24, 512, %s269_s7, [#allocation33], %s9007_s9, %s9007_s9, %s9006_s12  }
  0xde   :  { %s9008_s2 = sld [smem:[#allocation48_spill]] }
  0xe4   :  { %s7206_s28 = scalar_lea.hbm %s9008_s2, 128 }
  0xe5   :  { %p7207_p10 = scmp.ne.s32.totalorder %s9008_s2, %s7206_s28  ;;  %p7210_p11 = scmp.lt.u32.totalorder %s7206_s28, %s9008_s2 }
  0xe7   :  { %p7212_p12 = pnand %p7210_p11, %p7207_p10 }
  0xe9   :  { %7215 = shalt.err (!%p7212_p12)
}
  0xea   :  { %s7216_s4 = scalar_lea.vmem %s52_s10, 128  ;;  %p7221_p0 = scmp.lt.s32.totalorder %s52_s10, %s52_s10 }
  0xeb   :  { %p7217_p13 = scmp.ne.s32.totalorder %s52_s10, %s7216_s4  ;;  %p7222_p1 = scmp.lt.s32.totalorder %s7216_s4, %s7216_s4 }
  0xed   :  { %p7223_p2 = por %p7222_p1, %p7221_p0 }
  0xef   :  { %p7224_p3 = pnand %p7223_p2, %p7217_p13 }
  0xf1   :  { %7227 = shalt.err (!%p7224_p3)
}
  0xf2   :  { %54 = dma.hbm_to_vmem [thread:$0]  %s9008_s2, 128, %s52_s10, [#allocation3]  }
  0xf3   :  { %s7509_s29 = smov [#allocation7]   ;;  %s7510_s5 = smov [#allocation10]  }
  0xf4   :  { %s72_s8 = sshll.u32 %s7509_s29, 4  ;;  %s97_s22 = sshll.u32 %s7510_s5, 4  ;;  %s73_s8 = int_to_ptr.vmem [resolvable:$true] %s72_s8  ;;  %s98_s22 = int_to_ptr.vmem [resolvable:$true] %s97_s22 }
  0xf5   :  { %s9009_s3 = sld [smem:[#allocation51_spill]] }
  0xfb   :  { %s7228_s20 = scalar_lea.hbm %s9009_s3, 256 }
  0xfc   :  { %p7229_p4 = scmp.ne.s32.totalorder %s9009_s3, %s7228_s20  ;;  %p7232_p5 = scmp.lt.u32.totalorder %s7228_s20, %s9009_s3 }
  0xfe   :  { %p7234_p6 = pnand %p7232_p5, %p7229_p4 }
 0x100   :  { %7237 = shalt.err (!%p7234_p6)
}
 0x101   :  { %s7238_s10 = scalar_lea.vmem %s73_s8, 256  ;;  %p7243_p8 = scmp.lt.s32.totalorder %s73_s8, %s73_s8 }
 0x102   :  { %p7239_p7 = scmp.ne.s32.totalorder %s73_s8, %s7238_s10  ;;  %p7244_p9 = scmp.lt.s32.totalorder %s7238_s10, %s7238_s10 }
 0x104   :  { %p7245_p10 = por %p7244_p9, %p7243_p8 }
 0x106   :  { %p7246_p11 = pnand %p7245_p10, %p7239_p7 }
 0x108   :  { %7249 = shalt.err (!%p7246_p11)
}
 0x109   :  { %78 = dma.hbm_to_vmem [thread:$0]  %s9009_s3, 256, %s73_s8, [#allocation6], %s9007_s9, %s9007_s9, %s9006_s12  }
 0x10a   :  { %s9010_s7 = sld [smem:[#allocation53_spill]] }
 0x110   :  { %s7250_s29 = scalar_lea.hbm %s9010_s7, 16 }
 0x111   :  { %p7251_p12 = scmp.ne.s32.totalorder %s9010_s7, %s7250_s29  ;;  %p7254_p13 = scmp.lt.u32.totalorder %s7250_s29, %s9010_s7 }
 0x113   :  { %p7256_p0 = pnand %p7254_p13, %p7251_p12 }
 0x115   :  { %7259 = shalt.err (!%p7256_p0)
}
 0x116   :  { %s7260_s28 = scalar_lea.vmem %s98_s22, 16  ;;  %s7264_s17 = scalar_lea.vmem %s98_s22, 32 }
 0x117   :  { %p7261_p1 = scmp.ne.s32.totalorder %s98_s22, %s7260_s28  ;;  %p7265_p2 = scmp.lt.s32.totalorder %s98_s22, %s98_s22 }
 0x118   :  { %p7266_p3 = scmp.lt.s32.totalorder %s7264_s17, %s7260_s28 }
 0x11a   :  { %p7267_p4 = por %p7266_p3, %p7265_p2 }
 0x11c   :  { %p7268_p5 = pnand %p7267_p4, %p7261_p1 }
 0x11e   :  { %7271 = shalt.err (!%p7268_p5)
}
 0x11f   :  { %100 = dma.hbm_to_vmem [thread:$0]  %s9010_s7, 16, %s98_s22, [#allocation9]  }
 0x120   :  { %s7511_s0 = smov [#allocation13]   ;;  %s7512_s10 = smov [#allocation16]  }
 0x121   :  { %s117_s6 = sshll.u32 %s7511_s0, 4  ;;  %s136_s2 = sshll.u32 %s7512_s10, 4  ;;  %s118_s6 = int_to_ptr.vmem [resolvable:$true] %s117_s6  ;;  %s137_s2 = int_to_ptr.vmem [resolvable:$true] %s136_s2 }
 0x122   :  { %s9011_s24 = sld [smem:[#allocation55_spill]] }
 0x128   :  { %s7272_s29 = scalar_lea.hbm %s9011_s24, 16 }
 0x129   :  { %p7273_p6 = scmp.ne.s32.totalorder %s9011_s24, %s7272_s29  ;;  %p7276_p7 = scmp.lt.u32.totalorder %s7272_s29, %s9011_s24 }
 0x12b   :  { %p7278_p8 = pnand %p7276_p7, %p7273_p6 }
 0x12d   :  { %7281 = shalt.err (!%p7278_p8)
}
 0x12e   :  { %s7282_s22 = scalar_lea.vmem %s118_s6, 16  ;;  %s7286_s7 = scalar_lea.vmem %s118_s6, 32 }
 0x12f   :  { %p7283_p9 = scmp.ne.s32.totalorder %s118_s6, %s7282_s22  ;;  %p7287_p10 = scmp.lt.s32.totalorder %s118_s6, %s118_s6 }
 0x130   :  { %p7288_p11 = scmp.lt.s32.totalorder %s7286_s7, %s7282_s22 }
 0x132   :  { %p7289_p12 = por %p7288_p11, %p7287_p10 }
 0x134   :  { %p7290_p13 = pnand %p7289_p12, %p7283_p9 }
 0x136   :  { %7293 = shalt.err (!%p7290_p13)
}
 0x137   :  { %120 = dma.hbm_to_vmem [thread:$0]  %s9011_s24, 16, %s118_s6, [#allocation12]  }
 0x138   :  { %s9012_s0 = sld [smem:[#allocation57_spill]] }
 0x13e   :  { %s7294_s10 = scalar_lea.hbm %s9012_s0, 256 }
 0x13f   :  { %p7295_p0 = scmp.ne.s32.totalorder %s9012_s0, %s7294_s10  ;;  %p7298_p1 = scmp.lt.u32.totalorder %s7294_s10, %s9012_s0 }
 0x141   :  { %p7300_p2 = pnand %p7298_p1, %p7295_p0 }
 0x143   :  { %7303 = shalt.err (!%p7300_p2)
}
 0x144   :  { %s7304_s27 = scalar_lea.vmem %s137_s2, 256  ;;  %p7309_p4 = scmp.lt.s32.totalorder %s137_s2, %s137_s2 }
 0x145   :  { %p7305_p3 = scmp.ne.s32.totalorder %s137_s2, %s7304_s27  ;;  %p7310_p5 = scmp.lt.s32.totalorder %s7304_s27, %s7304_s27 }
 0x147   :  { %p7311_p6 = por %p7310_p5, %p7309_p4 }
 0x149   :  { %p7312_p7 = pnand %p7311_p6, %p7305_p3 }
 0x14b   :  { %7315 = shalt.err (!%p7312_p7)
}
 0x14c   :  { %142 = dma.hbm_to_vmem [thread:$0]  %s9012_s0, 256, %s137_s2, [#allocation15], %s9007_s9, %s9007_s9, %s9006_s12  }
 0x14d   :  { %s7513_s30 = smov [#allocation19]   ;;  %s7514_s22 = smov [#allocation22]  }
 0x14e   :  { %s160_s20 = sshll.u32 %s7513_s30, 4  ;;  %s188_s7 = sshll.u32 %s7514_s22, 4  ;;  %s161_s20 = int_to_ptr.vmem [resolvable:$true] %s160_s20  ;;  %s189_s7 = int_to_ptr.vmem [resolvable:$true] %s188_s7 }
 0x14f   :  { %s9013_s8 = sld [smem:[#allocation59_spill]] }
 0x155   :  { %s7316_s3 = scalar_lea.hbm %s9013_s8, 32 }
 0x156   :  { %p7317_p8 = scmp.ne.s32.totalorder %s9013_s8, %s7316_s3  ;;  %p7320_p9 = scmp.lt.u32.totalorder %s7316_s3, %s9013_s8 }
 0x158   :  { %p7322_p10 = pnand %p7320_p9, %p7317_p8 }
 0x15a   :  { %7325 = shalt.err (!%p7322_p10)
}
 0x15b   :  { %s7326_s9 = scalar_lea.vmem %s161_s20, 32  ;;  %p7331_p12 = scmp.lt.s32.totalorder %s161_s20, %s161_s20 }
 0x15c   :  { %p7327_p11 = scmp.ne.s32.totalorder %s161_s20, %s7326_s9  ;;  %p7332_p13 = scmp.lt.s32.totalorder %s7326_s9, %s7326_s9 }
 0x15e   :  { %p7333_p0 = por %p7332_p13, %p7331_p12 }
 0x160   :  { %p7334_p1 = pnand %p7333_p0, %p7327_p11 }
 0x162   :  { %7337 = shalt.err (!%p7334_p1)
}
 0x163   :  { %166 = dma.hbm_to_vmem [thread:$0]  %s9013_s8, 32, %s161_s20, [#allocation18], %s7501_s1, %s7501_s1, %s7502_s11  }
 0x164   :  { %s7338_s6 = scalar_lea.hbm %s8955_s15, 32 }
 0x165   :  { %p7339_p2 = scmp.ne.s32.totalorder %s8955_s15, %s7338_s6  ;;  %p7342_p3 = scmp.lt.u32.totalorder %s7338_s6, %s8955_s15 }
 0x167   :  { %p7344_p4 = pnand %p7342_p3, %p7339_p2 }
 0x169   :  { %7347 = shalt.err (!%p7344_p4)
}
 0x16a   :  { %s7348_s17 = scalar_lea.vmem %s189_s7, 32  ;;  %p7353_p6 = scmp.lt.s32.totalorder %s189_s7, %s189_s7 }
 0x16b   :  { %p7349_p5 = scmp.ne.s32.totalorder %s189_s7, %s7348_s17  ;;  %p7354_p7 = scmp.lt.s32.totalorder %s7348_s17, %s7348_s17 }
 0x16d   :  { %p7355_p8 = por %p7354_p7, %p7353_p6 }
 0x16f   :  { %p7356_p9 = pnand %p7355_p8, %p7349_p5 }
 0x171   :  { %7359 = shalt.err (!%p7356_p9)
}
 0x172   :  { %194 = dma.hbm_to_vmem [thread:$0]  %s8955_s15, 32, %s189_s7, [#allocation21], %s7501_s1, %s7501_s1, %s7502_s11  }
 0x173   :  { %s7515_s3 = smov [#allocation25]   ;;  %s7516_s14 = smov [#allocation28]  }
 0x174   :  { %s216_s10 = sshll.u32 %s7515_s3, 4  ;;  %s239_s4 = sshll.u32 %s7516_s14, 4  ;;  %s217_s10 = int_to_ptr.vmem [resolvable:$true] %s216_s10  ;;  %s240_s4 = int_to_ptr.vmem [resolvable:$true] %s239_s4 }
 0x175   :  { %s7360_s2 = scalar_lea.hbm %s8959_s19, 32 }
 0x176   :  { %p7361_p10 = scmp.ne.s32.totalorder %s8959_s19, %s7360_s2  ;;  %p7364_p11 = scmp.lt.u32.totalorder %s7360_s2, %s8959_s19 }
 0x178   :  { %p7366_p12 = pnand %p7364_p11, %p7361_p10 }
 0x17a   :  { %7369 = shalt.err (!%p7366_p12)
}
 0x17b   :  { %s7370_s15 = scalar_lea.vmem %s217_s10, 32  ;;  %p7375_p0 = scmp.lt.s32.totalorder %s217_s10, %s217_s10 }
 0x17c   :  { %p7371_p13 = scmp.ne.s32.totalorder %s217_s10, %s7370_s15  ;;  %p7376_p1 = scmp.lt.s32.totalorder %s7370_s15, %s7370_s15 }
 0x17e   :  { %p7377_p2 = por %p7376_p1, %p7375_p0 }
 0x180   :  { %p7378_p3 = pnand %p7377_p2, %p7371_p13 }
 0x182   :  { %7381 = shalt.err (!%p7378_p3)
}
 0x183   :  { %222 = dma.hbm_to_vmem [thread:$0]  %s8959_s19, 32, %s217_s10, [#allocation24], %s7501_s1, %s7501_s1, %s7502_s11  }
 0x184   :  { %s7382_s28 = scalar_lea.hbm %s8961_s21, 16 }
 0x185   :  { %p7383_p4 = scmp.ne.s32.totalorder %s8961_s21, %s7382_s28  ;;  %p7386_p5 = scmp.lt.u32.totalorder %s7382_s28, %s8961_s21 }
 0x187   :  { %p7388_p6 = pnand %p7386_p5, %p7383_p4 }
 0x189   :  { %7391 = shalt.err (!%p7388_p6)
}
 0x18a   :  { %s7392_s14 = scalar_lea.vmem %s240_s4, 16  ;;  %s7396_s29 = scalar_lea.vmem %s240_s4, 32 }
 0x18b   :  { %p7393_p7 = scmp.ne.s32.totalorder %s240_s4, %s7392_s14  ;;  %p7397_p8 = scmp.lt.s32.totalorder %s240_s4, %s240_s4 }
 0x18c   :  { %p7398_p9 = scmp.lt.s32.totalorder %s7396_s29, %s7392_s14 }
 0x18e   :  { %p7399_p10 = por %p7398_p9, %p7397_p8 }
 0x190   :  { %p7400_p11 = pnand %p7399_p10, %p7393_p7 }
 0x192   :  { %7403 = shalt.err (!%p7400_p11)
}
 0x193   :  { %242 = dma.hbm_to_vmem [thread:$0]  %s8961_s21, 16, %s240_s4, [#allocation27]  }
 0x194   :  { %s7517_s10 = smov [#allocation31]   ;;  %s7518_s2 = smov [#allocation34]  }
 0x195   :  { %s259_s9 = sshll.u32 %s7517_s10, 4  ;;  %s281_s0 = sshll.u32 %s7518_s2, 4  ;;  %s260_s9 = int_to_ptr.vmem [resolvable:$true] %s259_s9  ;;  %s282_s0 = int_to_ptr.vmem [resolvable:$true] %s281_s0 }
 0x196   :  { %s7404_s6 = scalar_lea.hbm %s8963_s23, 16 }
 0x197   :  { %p7405_p12 = scmp.ne.s32.totalorder %s8963_s23, %s7404_s6  ;;  %p7408_p13 = scmp.lt.u32.totalorder %s7404_s6, %s8963_s23 }
 0x199   :  { %p7410_p0 = pnand %p7408_p13, %p7405_p12 }
 0x19b   :  { %7413 = shalt.err (!%p7410_p0)
}
 0x19c   :  { %s7414_s21 = scalar_lea.vmem %s260_s9, 16  ;;  %s7418_s4 = scalar_lea.vmem %s260_s9, 32 }
 0x19d   :  { %p7415_p1 = scmp.ne.s32.totalorder %s260_s9, %s7414_s21  ;;  %p7419_p2 = scmp.lt.s32.totalorder %s260_s9, %s260_s9 }
 0x19e   :  { %p7420_p3 = scmp.lt.s32.totalorder %s7418_s4, %s7414_s21 }
 0x1a0   :  { %p7421_p4 = por %p7420_p3, %p7419_p2 }
 0x1a2   :  { %p7422_p5 = pnand %p7421_p4, %p7415_p1 }
 0x1a4   :  { %7425 = shalt.err (!%p7422_p5)
}
 0x1a5   :  { %262 = dma.hbm_to_vmem [thread:$0]  %s8963_s23, 16, %s260_s9, [#allocation30]  }
 0x1a6   :  { %s7426_s8 = scalar_lea.hbm %s8965_s25, 16 }
 0x1a7   :  { %p7427_p6 = scmp.ne.s32.totalorder %s8965_s25, %s7426_s8  ;;  %p7430_p7 = scmp.lt.u32.totalorder %s7426_s8, %s8965_s25 }
 0x1a9   :  { %p7432_p8 = pnand %p7430_p7, %p7427_p6 }
 0x1ab   :  { %7435 = shalt.err (!%p7432_p8)
}
 0x1ac   :  { %s7436_s11 = scalar_lea.vmem %s282_s0, 16  ;;  %s7440_s10 = scalar_lea.vmem %s282_s0, 32 }
 0x1ad   :  { %p7437_p9 = scmp.ne.s32.totalorder %s282_s0, %s7436_s11  ;;  %p7441_p10 = scmp.lt.s32.totalorder %s282_s0, %s282_s0 }
 0x1ae   :  { %p7442_p11 = scmp.lt.s32.totalorder %s7440_s10, %s7436_s11 }
 0x1b0   :  { %p7443_p12 = por %p7442_p11, %p7441_p10 }
 0x1b2   :  { %p7444_p13 = pnand %p7443_p12, %p7437_p9 }
 0x1b4   :  { %7447 = shalt.err (!%p7444_p13)
}
 0x1b5   :  { %284 = dma.hbm_to_vmem [thread:$0]  %s8965_s25, 16, %s282_s0, [#allocation33]  }
 0x1b6   :  { %7470 = dma.done.wait [#allocation3], 128  }
 0x1b7   :  { %7471 = vsyncadd [#allocation3], 4294967168 }
 0x1b8   :  { %7472 = dma.done.wait [#allocation6], 320  }
 0x1b9   :  { %7473 = vsyncadd [#allocation6], 4294966976 }
 0x1ba   :  { %7474 = dma.done.wait [#allocation9], 272  }
 0x1bb   :  { %7475 = vsyncadd [#allocation9], 4294967024 }
 0x1bc   :  { %7476 = dma.done.wait [#allocation12], 144  }
 0x1bd   :  { %7477 = vsyncadd [#allocation12], 4294967152 }
 0x1be   :  { %7478 = dma.done.wait [#allocation15], 320  }
 0x1bf   :  { %7479 = vsyncadd [#allocation15], 4294966976 }
 0x1c0   :  { %7480 = dma.done.wait [#allocation18], 64  }
 0x1c1   :  { %7481 = vsyncadd [#allocation18], 4294967232 }
 0x1c2   :  { %7482 = dma.done.wait [#allocation21], 64  }
 0x1c3   :  { %7483 = vsyncadd [#allocation21], 4294967232 }
 0x1c4   :  { %7484 = dma.done.wait [#allocation24], 64  }
 0x1c5   :  { %7485 = vsyncadd [#allocation24], 4294967232 }
 0x1c6   :  { %7486 = dma.done.wait [#allocation27], 32  }
 0x1c7   :  { %7487 = vsyncadd [#allocation27], 4294967264 }
 0x1c8   :  { %7488 = dma.done.wait [#allocation30], 32  }
 0x1c9   :  { %7489 = vsyncadd [#allocation30], 4294967264 }
 0x1ca   :  { %7490 = dma.done.wait [#allocation33], 528  }
 0x1cb   :  { %7491 = vsyncadd [#allocation33], 4294966768  ;;  %v7519_v0 = vmov 0.0|0.0   ;;  %v7520_v1 = vmov 0.0   ;;  %vm7521_vm0 = vmmov 0   ;;  %vm451_vm1 = vcmask 1045504  }
 0x1cc   :  { %6327 = vmatprep.subr.bf16.mxu0 %v7519_v0  ;;  %5924 = vmatprep.subr.mxu1 %v7520_v1  ;;  %vm447_vm2 = vcmask 48128   ;;  %v355_v2 = vld [vmem:[#allocation8] sm:$0xff]  ;;  %v356_v3 = vld [vmem:[#allocation8 + $0x8] sm:$0xff]  ;;  %v439_v4 = vld [vmem:[#allocation11] sm:$0x3f]  ;;  %s9014_s0 = sld [smem:[#allocation49_spill]] }
 0x1cd   :  { %5921 = vmatprep.mubr.msk.f32.mxu0 %vm7521_vm0, %v7520_v1  ;;  %5926 = vmatprep.mubr.msk.f32.mxu1 %vm7521_vm0, %v7520_v1  ;;  %v6328_v5 = vpack.c.bf16 %v356_v3, %v355_v2  ;;  %v354_v7 = vld [vmem:[#allocation2] sm:$0xff]  ;;  %vm364_vm3 = vcmask 130048   ;;  %v5517_v12 = vld [vmem:[#allocation13] ss:$0 sm:$0xff]  ;;  %vm536_vm4 = vcmask 1040384   ;;  %vm561_vm5 = vcmask 1041408  }
 0x1ce   :  { %5925 = vmatpush3.msk.msra.mxu1 %vm451_vm1, %v439_v4  ;;  %v352_v8 = vld [vmem:[#allocation16] sm:$0xff]  ;;  %v353_v9 = vld [vmem:[#allocation16 + $0x8] sm:$0x3]  ;;  %v526_v16 = vld [vmem:[#allocation14] sm:$0x7]  ;;  %vm564_vm6 = vcmask 1046528  }
 0x1cf   :  { %6330 = vmatprep.subr.bf16.mxu1 %v7519_v0  ;;  %6329 = vmatpush3.bf16.msra.mxu0 %v6328_v5  ;;  %v537_v10 = vrot.slane %v352_v8, 7  ;;  %v538_v11 = vrot.slane %v353_v9, 7  ;;  %v5515_v18 = vld [vmem:[#allocation10] ss:$0 sm:$0xff]  ;;  %v532_v19 = vrot.slane %v352_v8, 6  ;;  %v529_v20 = vrot.slane %v352_v8, 2 }
 0x1d0   :  { %v525_v26 = vld [vmem:[#allocation5] sm:$0xf]  ;;  %v544_v28 = vrot.slane %v352_v8, 5  ;;  %vm567_vm7 = vcmask 1043456   ;;  %vm574_vm8 = vcmask 261120   ;;  %vm581_vm9 = vcmask 257024  }
 0x1d1   :  { %v539_v17 = vsel %vm536_vm4, %v537_v10, %v538_v11  ;;  %v527_v29 = vadd.f32 %v525_v26, %v352_v8  ;;  %v542_v32 = vadd.f32 %v532_v19, %v525_v26  ;;  %s9015_s6 = sld [smem:[#allocation60_spill]]  ;;  %vm733_vm10 = vcmask 64512   ;;  %s7522_s22 = smov 96  }
 0x1d2   :  { %v438_v6 = vld [vmem:[%s9014_s0] sm:$0x3]  ;;  %5922 = vmatmul.mubr.msk.f32.vlgmr.msra.gmra.mrb[0].mxu0 %vm364_vm3, %v354_v7  ;;  %v541_v23 = vadd.f32 %v539_v17, %v526_v16  ;;  %v5520_v16 = vld [vmem:[#allocation17] ss:$0 sm:$0xff]  ;;  %s7523_s28 = smov 88   ;;  %s7524_s17 = smov 120   ;;  %vm8042_vm11 = vmpackc.low %vm733_vm10, %vm733_vm10 }
 0x1d3   :  { %5927 = vmatmul.mubr.msk.f32.vlgmr.msra.gmra.mrb[0].mxu1 %vm447_vm2, %v438_v6  ;;  %vm825_vm12 = vcmask 74752   ;;  %vm821_vm13 = vcmask 80896   ;;  %s7525_s20 = smov 56   ;;  %s7526_s8 = smov 64   ;;  %vm7529_vm14 = vmmov 1   ;;  %vm1576_vm2 = vcmask 195584  }
 0x1d4   :  { %5937 = vmatprep.mubr.msk.f32.mxu1 %vm7521_vm0, %v7520_v1  ;;  %v554_v31 = vrot.slane %v541_v23, 1  ;;  %v559_v43 = vrot.slane %v541_v23, 7  ;;  %s7527_s3 = smov 80   ;;  %s7528_s14 = smov 112   ;;  %vm8085_vm15 = vmpackc.low %vm561_vm5, %vm7529_vm14 }
 0x1d5   :  { %s7530_s29 = smov 48   ;;  %s7531_s19 = smov 104  }
 0x1d6   :  { %v566_v38 = vsel %vm561_vm5, %v554_v31, %v542_v32  ;;  %s7532_s11 = smov 72   ;;  %s7533_s10 = smov 40  }
 0x1d7   :  { %v634_v62 = vld [vmem:[%s9015_s6] sm:$0xff]  ;;  %v635_v63 = vld [vmem:[%s9015_s6 + $0x8] sm:$0xff]  ;;  %v636_v3 = vld [vmem:[%s9015_s6 + $0x10] sm:$0xff]  ;;  %s7534_s23 = smov 24  }
 0x1d8   :  { %v6331_v2 = vpack.c.bf16 %v635_v63, %v634_v62  ;;  %v637_v4 = vld [vmem:[%s9015_s6 + $0x18] sm:$0xff] }
 0x1d9   :  { %v6334_v5 = vpack.c.bf16 %v637_v4, %v636_v3 }
 0x1da   :  { %6332 = vmatpush3.bf16.msra.mxu1 %v6331_v2 }
 0x1db   :  { %6333 = vmatprep.subr.bf16.mxu1 %v7519_v0 }
 0x1de   :  { %6335 = vmatpush3.bf16.msra.mxu1 %v6334_v5 }
 0x2a5   :  { %v434_v21 = vpop.f32.mrb[0].mxu0 }
 0x2a6   :  { %v521_v13 = vpop.f32.mrb[0].mxu1  ;;  %v435_v24 = vadd.f32 %v5515_v18, %v434_v21  ;;  %v5923_v25 = vpop.f32.mrb[1].mxu0  ;;  %v5521_v18 = vld [vmem:[#allocation19] ss:$0 sm:$0xff] }
 0x2a7   :  { %v522_v14 = vadd.f32 %v5517_v12, %v521_v13  ;;  %v5928_v15 = vpop.f32.mrb[1].mxu1 }
 0x2a8   :  { %v531_v27 = vadd.f32 %v529_v20, %v435_v24  ;;  %v543_v34 = vadd.f32 %v532_v19, %v435_v24 }
 0x2a9   :  { %v534_v22 = vadd.f32 %v532_v19, %v522_v14  ;;  %v546_v35 = vadd.f32 %v544_v28, %v522_v14 }
 0x2aa   :  { %v548_v33 = vrot.slane %v531_v27, 6  ;;  %v7985_v42 = vsel %vm567_vm7, %v566_v38, %v543_v34  ;;  %vm2779_vm7 = vcmask 523264  }
 0x2ab   :  { %v551_v30 = vrot.slane %v534_v22, 2  ;;  %v557_v41 = vrot.slane %v546_v35, 1  ;;  %v578_v44 = vsel %vm574_vm8, %v7985_v42, 0.0 }
 0x2ac   :  { %v562_v36 = vsel %vm561_vm5, %v527_v29, %v548_v33 }
 0x2ad   :  { %v563_v37 = vsel %vm451_vm1, %v562_v36, %v551_v30  ;;  %v7990_v45 = vsel %vm536_vm4, %v557_v41, %v559_v43 }
 0x2ae   :  { %v7981_v39 = vsel %vm564_vm6, %v563_v37, %v554_v31  ;;  %v582_v46 = vsel %vm581_vm9, %v7990_v45, 0.0 }
 0x2af   :  { %v575_v40 = vsel %vm574_vm8, %v7981_v39, 0.0 }
 0x2b0   :  { %576 = vadd.xlane.f32.xlu0 %v575_v40 }
 0x2b4   :  { %579 = vadd.xlane.f32.xlu0 %v578_v44 }
 0x2b8   :  { %583 = vadd.xlane.f32.xlu0 %v582_v46 }
 0x33d   :  { %v577_v47 = vpop.xlane.xlu0 %576 }
 0x33e   :  { %v586_v48 = vmul.f32 0.03125, %v577_v47 }
 0x340   :  { %v589_v49 = vsub.f32 %v7981_v39, %v586_v48 }
 0x341   :  { %v580_v50 = vpop.xlane.xlu0 %579 }
 0x342   :  { %v587_v51 = vmul.f32 0.03125, %v580_v50  ;;  %v592_v52 = vmul.f32 %v589_v49, %v589_v49 }
 0x344   :  { %v590_v53 = vsub.f32 %v7985_v42, %v587_v51  ;;  %v595_v54 = vsel %vm574_vm8, %v592_v52, 0.0  ;;  %v8058_v51 = vld [vmem:[#allocation7 + $0x8] sm:$0x3] }
 0x345   :  { %596 = vadd.xlane.f32.xlu1 %v595_v54  ;;  %v584_v55 = vpop.xlane.xlu0 %583 }
 0x346   :  { %v588_v56 = vmul.f32 0.03125, %v584_v55  ;;  %v593_v57 = vmul.f32 %v590_v53, %v590_v53  ;;  %v8060_v55 = vld [vmem:[#allocation7] sm:$0xff] }
 0x348   :  { %v591_v58 = vsub.f32 %v7990_v45, %v588_v56  ;;  %v598_v59 = vsel %vm574_vm8, %v593_v57, 0.0 }
 0x349   :  { %599 = vadd.xlane.f32.xlu1 %v598_v59 }
 0x34a   :  { %v594_v60 = vmul.f32 %v591_v58, %v591_v58 }
 0x34c   :  { %v601_v61 = vsel %vm581_vm9, %v594_v60, 0.0 }
 0x34d   :  { %602 = vadd.xlane.f32.xlu1 %v601_v61 }
 0x3d2   :  { %v597_v6 = vpop.xlane.xlu1 %596 }
 0x3d3   :  { %v604_v7 = vmul.f32 0.03125, %v597_v6 }
 0x3d5   :  { %v607_v8 = vadd.f32 1e-05, %v604_v7 }
 0x3d6   :  { %v600_v9 = vpop.xlane.xlu1 %599 }
 0x3d7   :  { %6796 = vrsqrt.f32 %v607_v8  ;;  %v605_v10 = vmul.f32 0.03125, %v600_v9 }
 0x3d9   :  { %v608_v11 = vadd.f32 1e-05, %v605_v10 }
 0x3da   :  { %v603_v12 = vpop.xlane.xlu1 %602 }
 0x3db   :  { %6798 = vrsqrt.f32 %v608_v11  ;;  %v606_v13 = vmul.f32 0.03125, %v603_v12 }
 0x3dd   :  { %v609_v14 = vadd.f32 1e-05, %v606_v13 }
 0x3df   :  { %6800 = vrsqrt.f32 %v609_v14 }
 0x3e1   :  { %v6797_v15 = vpop.eup %6796 }
 0x3e2   :  { %v613_v17 = vmul.f32 %v6797_v15, %v589_v49 }
 0x3e4   :  { %v622_v19 = vmul.f32 %v5520_v16, %v613_v17 }
 0x3e5   :  { %v6799_v20 = vpop.eup %6798 }
 0x3e6   :  { %v631_v21 = vadd.f32 %v5521_v18, %v622_v19  ;;  %v614_v22 = vmul.f32 %v6799_v20, %v590_v53 }
 0x3e8   :  { %5938 = vmatmul.mubr.msk.f32.vlgmr.msra.gmra.mrb[2].mxu1 %vm574_vm8, %v631_v21  ;;  %v623_v23 = vmul.f32 %v5520_v16, %v614_v22 }
 0x3e9   :  { %v6801_v24 = vpop.eup %6800  ;;  %5940 = vmatprep.mubr.msk.f32.mxu1 %vm7521_vm0, %v7520_v1 }
 0x3ea   :  { %v632_v25 = vadd.f32 %v5521_v18, %v623_v23  ;;  %v615_v26 = vmul.f32 %v6801_v24, %v591_v58 }
 0x3ec   :  { %5941 = vmatmul.mubr.msk.f32.gmra.mrb[4].mxu1 %vm574_vm8, %v632_v25  ;;  %v624_v27 = vmul.f32 %v5520_v16, %v615_v26 }
 0x3ed   :  { %5943 = vmatprep.mubr.msk.f32.mxu1 %vm7521_vm0, %v7520_v1 }
 0x3ee   :  { %v633_v28 = vadd.f32 %v5521_v18, %v624_v27 }
 0x3f0   :  { %5944 = vmatmul.mubr.msk.f32.gmra.mrb[6].mxu1 %vm574_vm8, %v633_v28 }
 0x4bb   :  { %v8020_v29 = vpop.f32.mrb[2].mxu1 }
 0x4bc   :  { %v5939_v30 = vpop.f32.mrb[3].mxu1  ;;  %5950 = vmatprep.mubr.msk.f32.mxu0 %vm733_vm10, %v8020_v29 }
 0x4bf   :  { %v8024_v31 = vpop.f32.mrb[4].mxu1 }
 0x4c0   :  { %v5942_v32 = vpop.f32.mrb[5].mxu1  ;;  %v8028_v33 = vpack.i.bf16 %v8024_v31, %v8020_v29 }
 0x4c2   :  { %6637 = vrot.lane.b32.xlu0 %v8028_v33, %s7522_s22  ;;  %6642 = vrot.lane.b32.xlu1 %v8028_v33, %s7523_s28 }
 0x4c3   :  { %v8034_v34 = vpop.f32.mrb[6].mxu1 }
 0x4c4   :  { %v5945_v35 = vpop.f32.mrb[7].mxu1 }
 0x4c6   :  { %933 = vrot.lane.b32.xlu1 %v8020_v29, %s7524_s17 }
 0x4ca   :  { %935 = vrot.lane.b32.xlu1 %v8024_v31, %s7524_s17 }
 0x534   :  { %v6643_v36 = vpop.permute.xlu1 %6642  ;;  %v6638_v37 = vpop.permute.xlu0 %6637 }
 0x535   :  { %v6645_v38 = vunpack.i.h.bf16 %v6643_v36  ;;  %v6644_v40 = vunpack.i.l.bf16 %v6643_v36  ;;  %v6640_v41 = vunpack.i.h.bf16 %v6638_v37  ;;  %v6639_v43 = vunpack.i.l.bf16 %v6638_v37 }
 0x537   :  { %v6348_v46 = vpack.c.bf16 %v6645_v38, %v6644_v40  ;;  %v6336_v47 = vpack.c.bf16 %v6640_v41, %v6639_v43 }
 0x538   :  { %v934_v48 = vpop.permute.xlu1 %933 }
 0x539   :  { %6338 = vmatprep.subr.msk.bf16.mxu0 %vm8042_vm11, %v6336_v47  ;;  %6350 = vmatprep.subr.msk.bf16.mxu1 %vm8042_vm11, %v6348_v46 }
 0x53a   :  { %5964 = vmatprep.mubr.msk.f32.mxu1 %vm733_vm10, %v934_v48  ;;  %6341 = vmatpush3.bf16.xpose.msk.msra.mxu0 %vm8042_vm11, %v6336_v47 }
 0x53b   :  { %6353 = vmatpush3.bf16.xpose.msk.msra.mxu1 %vm8042_vm11, %v6348_v46 }
 0x53c   :  { %v936_v49 = vpop.permute.xlu1 %935 }
 0x541   :  { %5951 = vmatmul.mubr.msk.f32.vlgmr.msra.gmra.mrb[2].mxu0 %vm733_vm10, %v8024_v31 }
 0x542   :  { %5965 = vmatmul.mubr.msk.f32.vlgmr.msra.gmra.mrb[8].mxu1 %vm733_vm10, %v936_v49 }
 0x614   :  { %v5952_v50 = vpop.f32.mrb[2].mxu0 }
 0x615   :  { %v818_v52 = vmul.f32 0.35355338, %v5952_v50  ;;  %v5966_v53 = vpop.f32.mrb[8].mxu1  ;;  %v808_v54 = vpop.f32.mrb[3].mxu0 }
 0x616   :  { %v817_v56 = vmul.f32 0.35355338, %v808_v54  ;;  %v1015_v57 = vpop.f32.mrb[9].mxu1  ;;  %v1025_v62 = vmul.f32 0.35355338, %v5966_v53 }
 0x617   :  { %v1024_v58 = vmul.f32 0.35355338, %v1015_v57  ;;  %v820_v59 = vadd.f32 %v818_v52, %v8058_v51 }
 0x618   :  { %v819_v60 = vadd.f32 %v817_v56, %v8060_v55  ;;  %v1027_v4 = vadd.f32 %v1025_v62, %v8058_v51 }
 0x619   :  { %v826_v61 = vsel %vm825_vm12, %v820_v59, -inf  ;;  %v1026_v2 = vadd.f32 %v1024_v58, %v8060_v55 }
 0x61a   :  { %827 = vmax.xlane.f32.xlu1 %v826_v61  ;;  %v822_v63 = vsel %vm821_vm13, %v819_v60, -inf  ;;  %v1031_v5 = vsel %vm825_vm12, %v1027_v4, -inf }
 0x61b   :  { %823 = vmax.xlane.f32.xlu0 %v822_v63  ;;  %v1028_v3 = vsel %vm821_vm13, %v1026_v2, -inf }
 0x61f   :  { %1029 = vmax.xlane.f32.xlu0 %v1028_v3 }
 0x623   :  { %1032 = vmax.xlane.f32.xlu0 %v1031_v5 }
 0x6a7   :  { %v828_v6 = vpop.xlane.xlu1 %827 }
 0x6a8   :  { %v830_v7 = vsub.f32 %v820_v59, %v828_v6  ;;  %v824_v8 = vpop.xlane.xlu0 %823 }
 0x6a9   :  { %v829_v9 = vsub.f32 %v819_v60, %v824_v8 }
 0x6aa   :  { %v833_v10 = vmul.f32 1.442695, %v830_v7 }
 0x6ab   :  { %v831_v11 = vmul.f32 1.442695, %v829_v9 }
 0x6ac   :  { %6802 = vpow2.f32 %v833_v10  ;;  %v1030_v12 = vpop.xlane.xlu0 %1029 }
 0x6ad   :  { %6804 = vpow2.f32 %v831_v11  ;;  %v1034_v13 = vsub.f32 %v1026_v2, %v1030_v12 }
 0x6af   :  { %v1036_v14 = vmul.f32 1.442695, %v1034_v13 }
 0x6b0   :  { %v1033_v15 = vpop.xlane.xlu0 %1032 }
 0x6b1   :  { %6806 = vpow2.f32 %v1036_v14  ;;  %v1035_v16 = vsub.f32 %v1027_v4, %v1033_v15 }
 0x6b3   :  { %v1038_v17 = vmul.f32 1.442695, %v1035_v16 }
 0x6b5   :  { %6808 = vpow2.f32 %v1038_v17 }
 0x6b6   :  { %v6803_v18 = vpop.eup %6802 }
 0x6b7   :  { %v6805_v19 = vpop.eup %6804  ;;  %v838_v20 = vsel %vm825_vm12, %v6803_v18, 0.0 }
 0x6b8   :  { %839 = vadd.xlane.f32.xlu1 %v838_v20  ;;  %v835_v21 = vsel %vm821_vm13, %v6805_v19, 0.0 }
 0x6b9   :  { %836 = vadd.xlane.f32.xlu0 %v835_v21 }
 0x6bb   :  { %v6807_v22 = vpop.eup %6806 }
 0x6bc   :  { %v1040_v23 = vsel %vm821_vm13, %v6807_v22, 0.0 }
 0x6bd   :  { %1041 = vadd.xlane.f32.xlu0 %v1040_v23 }
 0x6bf   :  { %v6809_v24 = vpop.eup %6808 }
 0x6c0   :  { %v1043_v25 = vsel %vm825_vm12, %v6809_v24, 0.0 }
 0x6c1   :  { %1044 = vadd.xlane.f32.xlu1 %v1043_v25 }
 0x6d2   :  { %6652 = vrot.lane.b32.xlu1 %v8028_v33, %s7525_s20 }
 0x6d3   :  { %6647 = vrot.lane.b32.xlu0 %v8028_v33, %s7526_s8 }
 0x6d6   :  { %6657 = vrot.lane.b32.xlu1 %v8028_v33, %s7527_s3 }
 0x6d7   :  { %1140 = vrot.lane.b32.xlu0 %v8024_v31, %s7528_s14 }
 0x6da   :  { %1138 = vrot.lane.b32.xlu1 %v8020_v29, %s7528_s14 }
 0x745   :  { %v840_v26 = vpop.xlane.xlu1 %839 }
 0x746   :  { %v837_v27 = vpop.xlane.xlu0 %836 }
 0x747   :  { %6810 = vrcp.f32 %v837_v27 }
 0x748   :  { %6812 = vrcp.f32 %v840_v26 }
 0x74a   :  { %v1042_v28 = vpop.xlane.xlu0 %1041 }
 0x74b   :  { %6814 = vrcp.f32 %v1042_v28 }
 0x74e   :  { %v1045_v30 = vpop.xlane.xlu1 %1044  ;;  %v6648_v32 = vpop.permute.xlu0 %6647 }
 0x74f   :  { %6816 = vrcp.f32 %v1045_v30  ;;  %v6650_v35 = vunpack.i.h.bf16 %v6648_v32  ;;  %v6649_v36 = vunpack.i.l.bf16 %v6648_v32 }
 0x751   :  { %v6811_v38 = vpop.eup %6810  ;;  %v6342_v40 = vpack.c.bf16 %v6650_v35, %v6649_v36 }
 0x752   :  { %v6813_v41 = vpop.eup %6812  ;;  %v6653_v43 = vpop.permute.xlu1 %6652  ;;  %v843_v46 = vmul.f32 %v6811_v38, %v6805_v19 }
 0x753   :  { %v6655_v47 = vunpack.i.h.bf16 %v6653_v43  ;;  %v6654_v48 = vunpack.i.l.bf16 %v6653_v43  ;;  %6344 = vmatprep.subr.msk.bf16.mxu0 %vm8085_vm15, %v6342_v40  ;;  %v844_v52 = vmul.f32 %v6813_v41, %v6803_v18  ;;  %v1141_v62 = vpop.permute.xlu0 %1140 }
 0x754   :  { %6347 = vmatpush3.bf16.msk.msra.mxu0 %vm8085_vm15, %v6342_v40  ;;  %5957 = vmatprep.mubr.msk.f32.mxu0 %vm821_vm13, %v843_v46 }
 0x755   :  { %v6815_v49 = vpop.eup %6814  ;;  %v6354_v50 = vpack.c.bf16 %v6655_v47, %v6654_v48 }
 0x756   :  { %v6658_v53 = vpop.permute.xlu1 %6657  ;;  %v1048_v54 = vmul.f32 %v6815_v49, %v6807_v22 }
 0x757   :  { %v6660_v56 = vunpack.i.h.bf16 %v6658_v53  ;;  %v6659_v57 = vunpack.i.l.bf16 %v6658_v53  ;;  %5958 = vmatmul.mubr.msk.f32.vlgmr.msra.gmra.mrb[4].mxu0 %vm821_vm13, %v844_v52  ;;  %6356 = vmatprep.subr.msk.bf16.mxu0 %vm8085_vm15, %v6354_v50 }
 0x758   :  { %6359 = vmatpush3.bf16.msk.msra.mxu0 %vm8085_vm15, %v6354_v50  ;;  %5971 = vmatprep.mubr.msk.f32.mxu0 %vm821_vm13, %v1048_v54 }
 0x759   :  { %v6817_v58 = vpop.eup %6816  ;;  %v6360_v59 = vpack.c.bf16 %v6660_v56, %v6659_v57 }
 0x75a   :  { %v1049_v60 = vmul.f32 %v6817_v58, %v6809_v24  ;;  %v1139_v61 = vpop.permute.xlu1 %1138 }
 0x75b   :  { %6362 = vmatprep.subr.msk.bf16.mxu0 %vm8042_vm11, %v6360_v59 }
 0x75c   :  { %5972 = vmatmul.mubr.msk.f32.vlgmr.msra.gmra.mrb[6].mxu0 %vm821_vm13, %v1049_v60 }
 0x75d   :  { %5978 = vmatprep.mubr.msk.f32.mxu0 %vm733_vm10, %v1139_v61 }
 0x761   :  { %6365 = vmatpush3.bf16.xpose.msk.msra.mxu0 %vm8042_vm11, %v6360_v59 }
 0x768   :  { %5979 = vmatmul.mubr.msk.f32.vlgmr.msra.gmra.mrb[8].mxu0 %vm733_vm10, %v1141_v62 }
 0x82a   :  { %v8107_v63 = vpop.f32.mrb[4].mxu0 }
 0x82b   :  { %v8109_v2 = vpop.f32.mrb[5].mxu0 }
 0x82f   :  { %v8111_v3 = vpop.f32.mrb[6].mxu0 }
 0x830   :  { %v8113_v4 = vpop.f32.mrb[7].mxu0 }
 0x83b   :  { %v5980_v5 = vpop.f32.mrb[8].mxu0 }
 0x83c   :  { %v1230_v6 = vmul.f32 0.35355338, %v5980_v5  ;;  %v1220_v7 = vpop.f32.mrb[9].mxu0 }
 0x83d   :  { %v1229_v8 = vmul.f32 0.35355338, %v1220_v7 }
 0x83e   :  { %v1232_v9 = vadd.f32 %v1230_v6, %v8058_v51 }
 0x83f   :  { %v1231_v10 = vadd.f32 %v1229_v8, %v8060_v55 }
 0x840   :  { %v1236_v11 = vsel %vm825_vm12, %v1232_v9, -inf }
 0x841   :  { %1237 = vmax.xlane.f32.xlu0 %v1236_v11  ;;  %v1233_v12 = vsel %vm821_vm13, %v1231_v10, -inf }
 0x842   :  { %1234 = vmax.xlane.f32.xlu1 %v1233_v12 }
 0x853   :  { %6662 = vrot.lane.b32.xlu1 %v8028_v33, %s7530_s29 }
 0x857   :  { %1343 = vrot.lane.b32.xlu1 %v8020_v29, %s7531_s19 }
 0x85b   :  { %1345 = vrot.lane.b32.xlu1 %v8024_v31, %s7531_s19 }
 0x8ce   :  { %v1238_v13 = vpop.xlane.xlu0 %1237 }
 0x8cf   :  { %v1240_v14 = vsub.f32 %v1232_v9, %v1238_v13  ;;  %v1235_v15 = vpop.xlane.xlu1 %1234 }
 0x8d0   :  { %v1239_v16 = vsub.f32 %v1231_v10, %v1235_v15  ;;  %v1580_v15 = vrot.slane %v8024_v31, 2 }
 0x8d1   :  { %v1243_v17 = vmul.f32 1.442695, %v1240_v14  ;;  %v8158_v14 = vrot.slane %v8034_v34, 2 }
 0x8d2   :  { %v1241_v18 = vmul.f32 1.442695, %v1239_v16 }
 0x8d3   :  { %6818 = vpow2.f32 %v1243_v17  ;;  %v6663_v19 = vpop.permute.xlu1 %6662  ;;  %v8163_v16 = vsel %vm451_vm1, %v1580_v15, %v8158_v14 }
 0x8d4   :  { %v6665_v20 = vunpack.i.h.bf16 %v6663_v19  ;;  %v6664_v21 = vunpack.i.l.bf16 %v6663_v19  ;;  %6820 = vpow2.f32 %v1241_v18  ;;  %v8167_v17 = vpack.i.bf16 %v8158_v14, %v8163_v16 }
 0x8d6   :  { %v6366_v22 = vpack.c.bf16 %v6665_v20, %v6664_v21 }
 0x8d7   :  { %v1344_v43 = vpop.permute.xlu1 %1343 }
 0x8d8   :  { %6368 = vmatprep.subr.msk.bf16.mxu1 %vm8085_vm15, %v6366_v22 }
 0x8d9   :  { %6371 = vmatpush3.bf16.msk.msra.mxu1 %vm8085_vm15, %v6366_v22 }
 0x8db   :  { %v1346_v46 = vpop.permute.xlu1 %1345 }
 0x8dd   :  { %v6819_v29 = vpop.eup %6818 }
 0x8de   :  { %v1248_v23 = vsel %vm825_vm12, %v6819_v29, 0.0  ;;  %v6821_v24 = vpop.eup %6820 }
 0x8df   :  { %1249 = vadd.xlane.f32.xlu0 %v1248_v23  ;;  %v1245_v25 = vsel %vm821_vm13, %v6821_v24, 0.0 }
 0x8e3   :  { %1246 = vadd.xlane.f32.xlu0 %v1245_v25 }
 0x8f9   :  { %6667 = vrot.lane.b32.xlu0 %v8028_v33, %s7532_s11 }
 0x96c   :  { %v1250_v26 = vpop.xlane.xlu0 %1249 }
 0x96d   :  { %6822 = vrcp.f32 %v1250_v26 }
 0x970   :  { %v1247_v27 = vpop.xlane.xlu0 %1246 }
 0x971   :  { %6824 = vrcp.f32 %v1247_v27 }
 0x974   :  { %v6668_v28 = vpop.permute.xlu0 %6667 }
 0x975   :  { %v6670_v30 = vunpack.i.h.bf16 %v6668_v28  ;;  %v6669_v32 = vunpack.i.l.bf16 %v6668_v28 }
 0x977   :  { %v6372_v35 = vpack.c.bf16 %v6670_v30, %v6669_v32  ;;  %v6823_v36 = vpop.eup %6822 }
 0x978   :  { %v1254_v41 = vmul.f32 %v6823_v36, %v6819_v29 }
 0x979   :  { %6374 = vmatprep.subr.msk.bf16.mxu1 %vm8042_vm11, %v6372_v35 }
 0x97b   :  { %v6825_v38 = vpop.eup %6824 }
 0x97c   :  { %v1253_v40 = vmul.f32 %v6825_v38, %v6821_v24 }
 0x97e   :  { %5985 = vmatprep.mubr.msk.f32.mxu1 %vm821_vm13, %v1253_v40 }
 0x97f   :  { %5986 = vmatmul.mubr.msk.f32.vlgmr.msra.gmra.mrb[10].mxu1 %vm821_vm13, %v1254_v41 }
 0x980   :  { %6377 = vmatpush3.bf16.xpose.msk.msra.mxu1 %vm8042_vm11, %v6372_v35  ;;  %5992 = vmatprep.mubr.msk.f32.mxu1 %vm733_vm10, %v1344_v43 }
 0x987   :  { %5993 = vmatmul.mubr.msk.f32.vlgmr.msra.gmra.mrb[12].mxu1 %vm733_vm10, %v1346_v46 }
 0xa52   :  { %v8141_v47 = vpop.f32.mrb[10].mxu1 }
 0xa53   :  { %v8143_v48 = vpop.f32.mrb[11].mxu1 }
 0xa5a   :  { %v5994_v49 = vpop.f32.mrb[12].mxu1 }
 0xa5b   :  { %v1435_v50 = vmul.f32 0.35355338, %v5994_v49  ;;  %v1425_v52 = vpop.f32.mrb[13].mxu1 }
 0xa5c   :  { %v1434_v53 = vmul.f32 0.35355338, %v1425_v52 }
 0xa5d   :  { %v1437_v54 = vadd.f32 %v1435_v50, %v8058_v51 }
 0xa5e   :  { %v1436_v56 = vadd.f32 %v1434_v53, %v8060_v55 }
 0xa5f   :  { %v1441_v57 = vsel %vm825_vm12, %v1437_v54, -inf }
 0xa60   :  { %1442 = vmax.xlane.f32.xlu0 %v1441_v57  ;;  %v1438_v58 = vsel %vm821_vm13, %v1436_v56, -inf }
 0xa61   :  { %1439 = vmax.xlane.f32.xlu1 %v1438_v58 }
 0xa72   :  { %6672 = vrot.lane.b32.xlu1 %v8028_v33, %s7533_s10 }
 0xaed   :  { %v1443_v59 = vpop.xlane.xlu0 %1442 }
 0xaee   :  { %v1445_v60 = vsub.f32 %v1437_v54, %v1443_v59  ;;  %v1440_v61 = vpop.xlane.xlu1 %1439 }
 0xaef   :  { %v1444_v62 = vsub.f32 %v1436_v56, %v1440_v61 }
 0xaf0   :  { %v1448_v5 = vmul.f32 1.442695, %v1445_v60 }
 0xaf1   :  { %v1446_v6 = vmul.f32 1.442695, %v1444_v62 }
 0xaf2   :  { %6826 = vpow2.f32 %v1448_v5  ;;  %v6673_v7 = vpop.permute.xlu1 %6672 }
 0xaf3   :  { %v6675_v8 = vunpack.i.h.bf16 %v6673_v7  ;;  %v6674_v9 = vunpack.i.l.bf16 %v6673_v7  ;;  %6828 = vpow2.f32 %v1446_v6 }
 0xaf5   :  { %v6378_v10 = vpack.c.bf16 %v6675_v8, %v6674_v9 }
 0xaf7   :  { %6380 = vmatprep.subr.msk.bf16.mxu0 %vm8085_vm15, %v6378_v10 }
 0xaf8   :  { %6383 = vmatpush3.bf16.msk.msra.mxu0 %vm8085_vm15, %v6378_v10 }
 0xafc   :  { %v6827_v11 = vpop.eup %6826 }
 0xafd   :  { %v1453_v33 = vsel %vm825_vm12, %v6827_v11, 0.0  ;;  %v6829_v12 = vpop.eup %6828 }
 0xafe   :  { %1454 = vadd.xlane.f32.xlu0 %v1453_v33  ;;  %v1450_v13 = vsel %vm821_vm13, %v6829_v12, 0.0 }
 0xb02   :  { %1451 = vadd.xlane.f32.xlu0 %v1450_v13 }
 0xb18   :  { %6677 = vrot.lane.b32.xlu0 %v8167_v17, %s7522_s22 }
 0xb8b   :  { %v1455_v18 = vpop.xlane.xlu0 %1454 }
 0xb8c   :  { %6830 = vrcp.f32 %v1455_v18 }
 0xb8f   :  { %v1452_v19 = vpop.xlane.xlu0 %1451 }
 0xb90   :  { %6832 = vrcp.f32 %v1452_v19 }
 0xb93   :  { %v6678_v20 = vpop.permute.xlu0 %6677 }
 0xb94   :  { %v6680_v34 = vunpack.i.h.bf16 %v6678_v20  ;;  %v6679_v21 = vunpack.i.l.bf16 %v6678_v20 }
 0xb96   :  { %v6384_v22 = vpack.c.bf16 %v6680_v34, %v6679_v21  ;;  %v6831_v31 = vpop.eup %6830 }
 0xb97   :  { %v1459_v24 = vmul.f32 %v6831_v31, %v6827_v11 }
 0xb98   :  { %6386 = vmatprep.subr.msk.bf16.mxu0 %vm8042_vm11, %v6384_v22 }
 0xb9a   :  { %v6833_v29 = vpop.eup %6832 }
 0xb9b   :  { %v1458_v23 = vmul.f32 %v6833_v29, %v6829_v12 }
 0xb9d   :  { %5999 = vmatprep.mubr.msk.f32.mxu0 %vm821_vm13, %v1458_v23 }
 0xb9e   :  { %6000 = vmatmul.mubr.msk.f32.vlgmr.msra.gmra.mrb[10].mxu0 %vm821_vm13, %v1459_v24 }
 0xb9f   :  { %6389 = vmatpush3.bf16.xpose.msk.msra.mxu0 %vm8042_vm11, %v6384_v22  ;;  %6006 = vmatprep.mubr.msk.f32.mxu0 %vm733_vm10, %v8163_v16 }
 0xba6   :  { %6007 = vmatmul.mubr.msk.f32.vlgmr.msra.gmra.mrb[12].mxu0 %vm733_vm10, %v8158_v14 }
 0xc71   :  { %v8181_v25 = vpop.f32.mrb[10].mxu0 }
 0xc72   :  { %v8183_v26 = vpop.f32.mrb[11].mxu0 }
 0xc79   :  { %v6008_v27 = vpop.f32.mrb[12].mxu0 }
 0xc7a   :  { %v1671_v28 = vmul.f32 0.35355338, %v6008_v27  ;;  %v1661_v30 = vpop.f32.mrb[13].mxu0 }
 0xc7b   :  { %v1670_v32 = vmul.f32 0.35355338, %v1661_v30 }
 0xc7c   :  { %v1673_v35 = vadd.f32 %v1671_v28, %v8058_v51 }
 0xc7d   :  { %v1672_v36 = vadd.f32 %v1670_v32, %v8060_v55 }
 0xc7e   :  { %v1677_v38 = vsel %vm825_vm12, %v1673_v35, -inf }
 0xc7f   :  { %1678 = vmax.xlane.f32.xlu0 %v1677_v38  ;;  %v1674_v40 = vsel %vm821_vm13, %v1672_v36, -inf }
 0xc80   :  { %1675 = vmax.xlane.f32.xlu1 %v1674_v40 }
 0xc91   :  { %6682 = vrot.lane.b32.xlu1 %v8167_v17, %s7526_s8 }
 0xc95   :  { %1784 = vrot.lane.b32.xlu1 %v8163_v16, %s7524_s17 }
 0xd0c   :  { %v1679_v41 = vpop.xlane.xlu0 %1678 }
 0xd0d   :  { %v1681_v43 = vsub.f32 %v1673_v35, %v1679_v41  ;;  %v1676_v46 = vpop.xlane.xlu1 %1675 }
 0xd0e   :  { %v1680_v49 = vsub.f32 %v1672_v36, %v1676_v46 }
 0xd0f   :  { %v1684_v50 = vmul.f32 1.442695, %v1681_v43 }
 0xd10   :  { %v1682_v52 = vmul.f32 1.442695, %v1680_v49 }
 0xd11   :  { %6834 = vpow2.f32 %v1684_v50  ;;  %v6683_v53 = vpop.permute.xlu1 %6682 }
 0xd12   :  { %6836 = vpow2.f32 %v1682_v52  ;;  %v6685_v54 = vunpack.i.h.bf16 %v6683_v53  ;;  %v6684_v56 = vunpack.i.l.bf16 %v6683_v53 }
 0xd14   :  { %v6390_v57 = vpack.c.bf16 %v6685_v54, %v6684_v56 }
 0xd15   :  { %v1785_v62 = vpop.permute.xlu1 %1784 }
 0xd16   :  { %6392 = vmatprep.subr.msk.bf16.mxu1 %vm8085_vm15, %v6390_v57 }
 0xd17   :  { %6395 = vmatpush3.bf16.msk.msra.mxu1 %vm8085_vm15, %v6390_v57 }
 0xd1b   :  { %v6835_v58 = vpop.eup %6834 }
 0xd1c   :  { %v6837_v59 = vpop.eup %6836  ;;  %v1689_v60 = vsel %vm825_vm12, %v6835_v58, 0.0 }
 0xd1d   :  { %1690 = vadd.xlane.f32.xlu0 %v1689_v60  ;;  %v1686_v61 = vsel %vm821_vm13, %v6837_v59, 0.0 }
 0xd1e   :  { %1687 = vadd.xlane.f32.xlu1 %v1686_v61 }
 0xd2f   :  { %1786 = vrot.lane.b32.xlu1 %v8158_v14, %s7524_s17 }
 0xd33   :  { %6687 = vrot.lane.b32.xlu0 %v8167_v17, %s7523_s28 }
 0xdaa   :  { %v1691_v5 = vpop.xlane.xlu0 %1690 }
 0xdab   :  { %6838 = vrcp.f32 %v1691_v5  ;;  %v1688_v6 = vpop.xlane.xlu1 %1687 }
 0xdac   :  { %6840 = vrcp.f32 %v1688_v6 }
 0xdae   :  { %v6688_v7 = vpop.permute.xlu0 %6687 }
 0xdaf   :  { %v6690_v8 = vunpack.i.h.bf16 %v6688_v7  ;;  %v6689_v9 = vunpack.i.l.bf16 %v6688_v7  ;;  %v1787_v15 = vpop.permute.xlu1 %1786 }
 0xdb1   :  { %v6396_v10 = vpack.c.bf16 %v6690_v8, %v6689_v9 }
 0xdb3   :  { %6398 = vmatprep.subr.msk.bf16.mxu1 %vm8042_vm11, %v6396_v10 }
 0xdb5   :  { %v6839_v11 = vpop.eup %6838 }
 0xdb6   :  { %v6841_v33 = vpop.eup %6840  ;;  %v1695_v13 = vmul.f32 %v6839_v11, %v6835_v58 }
 0xdb7   :  { %v1694_v12 = vmul.f32 %v6841_v33, %v6837_v59 }
 0xdb9   :  { %6013 = vmatprep.mubr.msk.f32.mxu1 %vm821_vm13, %v1694_v12 }
 0xdba   :  { %6014 = vmatmul.mubr.msk.f32.vlgmr.msra.gmra.mrb[14].mxu1 %vm821_vm13, %v1695_v13 }
 0xdbb   :  { %6401 = vmatpush3.bf16.xpose.msk.msra.mxu1 %vm8042_vm11, %v6396_v10  ;;  %6020 = vmatprep.mubr.msk.f32.mxu1 %vm733_vm10, %v1785_v62 }
 0xdc2   :  { %6021 = vmatmul.mubr.msk.f32.vlgmr.msra.gmra.mrb[16].mxu1 %vm733_vm10, %v1787_v15 }
 0xe8d   :  { %v8211_v18 = vpop.f32.mrb[14].mxu1 }
 0xe8e   :  { %v8213_v19 = vpop.f32.mrb[15].mxu1 }
 0xe95   :  { %v6022_v20 = vpop.f32.mrb[16].mxu1 }
 0xe96   :  { %v1876_v34 = vmul.f32 0.35355338, %v6022_v20  ;;  %v1866_v21 = vpop.f32.mrb[17].mxu1 }
 0xe97   :  { %v1875_v22 = vmul.f32 0.35355338, %v1866_v21 }
 0xe98   :  { %v1878_v31 = vadd.f32 %v1876_v34, %v8058_v51 }
 0xe99   :  { %v1877_v29 = vadd.f32 %v1875_v22, %v8060_v55 }
 0xe9a   :  { %v1882_v23 = vsel %vm825_vm12, %v1878_v31, -inf }
 0xe9b   :  { %1883 = vmax.xlane.f32.xlu0 %v1882_v23  ;;  %v1879_v24 = vsel %vm821_vm13, %v1877_v29, -inf }
 0xe9c   :  { %1880 = vmax.xlane.f32.xlu1 %v1879_v24 }
 0xead   :  { %6692 = vrot.lane.b32.xlu1 %v8167_v17, %s7525_s20 }
 0xeb1   :  { %1989 = vrot.lane.b32.xlu1 %v8163_v16, %s7528_s14 }
 0xeb5   :  { %1991 = vrot.lane.b32.xlu1 %v8158_v14, %s7528_s14 }
 0xf28   :  { %v1884_v27 = vpop.xlane.xlu0 %1883 }
 0xf29   :  { %v1886_v28 = vsub.f32 %v1878_v31, %v1884_v27  ;;  %v1881_v30 = vpop.xlane.xlu1 %1880 }
 0xf2a   :  { %v1885_v32 = vsub.f32 %v1877_v29, %v1881_v30 }
 0xf2b   :  { %v1889_v35 = vmul.f32 1.442695, %v1886_v28 }
 0xf2c   :  { %v1887_v36 = vmul.f32 1.442695, %v1885_v32 }
 0xf2d   :  { %6842 = vpow2.f32 %v1889_v35  ;;  %v6693_v38 = vpop.permute.xlu1 %6692 }
 0xf2e   :  { %v6695_v40 = vunpack.i.h.bf16 %v6693_v38  ;;  %v6694_v41 = vunpack.i.l.bf16 %v6693_v38  ;;  %6844 = vpow2.f32 %v1887_v36 }
 0xf30   :  { %v6402_v43 = vpack.c.bf16 %v6695_v40, %v6694_v41 }
 0xf31   :  { %v1990_v6 = vpop.permute.xlu1 %1989 }
 0xf32   :  { %6404 = vmatprep.subr.msk.bf16.mxu0 %vm8085_vm15, %v6402_v43 }
 0xf33   :  { %6407 = vmatpush3.bf16.msk.msra.mxu0 %vm8085_vm15, %v6402_v43 }
 0xf35   :  { %v1992_v7 = vpop.permute.xlu1 %1991 }
 0xf37   :  { %v6843_v46 = vpop.eup %6842 }
 0xf38   :  { %v1894_v49 = vsel %vm825_vm12, %v6843_v46, 0.0  ;;  %v6845_v50 = vpop.eup %6844 }
 0xf39   :  { %1895 = vadd.xlane.f32.xlu0 %v1894_v49  ;;  %v1891_v52 = vsel %vm821_vm13, %v6845_v50, 0.0 }
 0xf3d   :  { %1892 = vadd.xlane.f32.xlu0 %v1891_v52 }
 0xf53   :  { %6697 = vrot.lane.b32.xlu0 %v8167_v17, %s7527_s3 }
 0xfc6   :  { %v1896_v53 = vpop.xlane.xlu0 %1895 }
 0xfc7   :  { %6846 = vrcp.f32 %v1896_v53 }
 0xfca   :  { %v1893_v54 = vpop.xlane.xlu0 %1892 }
 0xfcb   :  { %6848 = vrcp.f32 %v1893_v54 }
 0xfce   :  { %v6698_v56 = vpop.permute.xlu0 %6697 }
 0xfcf   :  { %v6700_v57 = vunpack.i.h.bf16 %v6698_v56  ;;  %v6699_v58 = vunpack.i.l.bf16 %v6698_v56 }
 0xfd1   :  { %v6408_v59 = vpack.c.bf16 %v6700_v57, %v6699_v58  ;;  %v6847_v60 = vpop.eup %6846 }
 0xfd2   :  { %v1900_v5 = vmul.f32 %v6847_v60, %v6843_v46 }
 0xfd3   :  { %6410 = vmatprep.subr.msk.bf16.mxu0 %vm8042_vm11, %v6408_v59 }
 0xfd5   :  { %v6849_v61 = vpop.eup %6848 }
 0xfd6   :  { %v1899_v62 = vmul.f32 %v6849_v61, %v6845_v50 }
 0xfd8   :  { %6027 = vmatprep.mubr.msk.f32.mxu0 %vm821_vm13, %v1899_v62 }
 0xfd9   :  { %6028 = vmatmul.mubr.msk.f32.vlgmr.msra.gmra.mrb[14].mxu0 %vm821_vm13, %v1900_v5 }
 0xfda   :  { %6413 = vmatpush3.bf16.xpose.msk.msra.mxu0 %vm8042_vm11, %v6408_v59  ;;  %6034 = vmatprep.mubr.msk.f32.mxu0 %vm733_vm10, %v1990_v6 }
 0xfe1   :  { %6035 = vmatmul.mubr.msk.f32.vlgmr.msra.gmra.mrb[16].mxu0 %vm733_vm10, %v1992_v7 }
0x10ac   :  { %v8241_v8 = vpop.f32.mrb[14].mxu0 }
0x10ad   :  { %v8243_v9 = vpop.f32.mrb[15].mxu0 }
0x10b4   :  { %v6036_v10 = vpop.f32.mrb[16].mxu0 }
0x10b5   :  { %v2081_v11 = vmul.f32 0.35355338, %v6036_v10  ;;  %v2071_v33 = vpop.f32.mrb[17].mxu0 }
0x10b6   :  { %v2080_v12 = vmul.f32 0.35355338, %v2071_v33 }
0x10b7   :  { %v2083_v13 = vadd.f32 %v2081_v11, %v8058_v51 }
0x10b8   :  { %v2082_v15 = vadd.f32 %v2080_v12, %v8060_v55 }
0x10b9   :  { %v2087_v20 = vsel %vm825_vm12, %v2083_v13, -inf }
0x10ba   :  { %2088 = vmax.xlane.f32.xlu0 %v2087_v20  ;;  %v2084_v34 = vsel %vm821_vm13, %v2082_v15, -inf }
0x10bb   :  { %2085 = vmax.xlane.f32.xlu1 %v2084_v34 }
0x10cc   :  { %6702 = vrot.lane.b32.xlu1 %v8167_v17, %s7530_s29 }
0x10d0   :  { %2194 = vrot.lane.b32.xlu1 %v8163_v16, %s7531_s19 }
0x10d4   :  { %2196 = vrot.lane.b32.xlu1 %v8158_v14, %s7531_s19 }
0x1147   :  { %v2089_v21 = vpop.xlane.xlu0 %2088 }
0x1148   :  { %v2091_v22 = vsub.f32 %v2083_v13, %v2089_v21  ;;  %v2086_v31 = vpop.xlane.xlu1 %2085 }
0x1149   :  { %v2090_v29 = vsub.f32 %v2082_v15, %v2086_v31 }
0x114a   :  { %v2094_v23 = vmul.f32 1.442695, %v2091_v22 }
0x114b   :  { %v2092_v24 = vmul.f32 1.442695, %v2090_v29 }
0x114c   :  { %6850 = vpow2.f32 %v2094_v23  ;;  %v6703_v27 = vpop.permute.xlu1 %6702 }
0x114d   :  { %v6705_v28 = vunpack.i.h.bf16 %v6703_v27  ;;  %v6704_v30 = vunpack.i.l.bf16 %v6703_v27  ;;  %6852 = vpow2.f32 %v2092_v24  ;;  %v2436_v24 = vld [vmem:[%s8953_s13] sm:$0xff]  ;;  %v2437_v27 = vld [vmem:[%s8953_s13 + $0x8] sm:$0xff] }
0x114f   :  { %v6414_v32 = vpack.c.bf16 %v6705_v28, %v6704_v30  ;;  %v6433_v28 = vpack.c.bf16 %v2437_v27, %v2436_v24  ;;  %v8378_v24 = vld [vmem:[#allocation22] ss:$0 sm:$0xff] }
0x1150   :  { %v2195_v56 = vpop.permute.xlu1 %2194 }
0x1151   :  { %6416 = vmatprep.subr.msk.bf16.mxu1 %vm8085_vm15, %v6414_v32 }
0x1152   :  { %6419 = vmatpush3.bf16.msk.msra.mxu1 %vm8085_vm15, %v6414_v32 }
0x1154   :  { %v2197_v57 = vpop.permute.xlu1 %2196 }
0x1156   :  { %v6851_v16 = vpop.eup %6850 }
0x1157   :  { %v2099_v14 = vsel %vm825_vm12, %v6851_v16, 0.0  ;;  %v6853_v35 = vpop.eup %6852 }
0x1158   :  { %2100 = vadd.xlane.f32.xlu0 %v2099_v14  ;;  %v2096_v36 = vsel %vm821_vm13, %v6853_v35, 0.0  ;;  %v2439_v14 = vld [vmem:[%s8953_s13 + $0x18] sm:$0xff] }
0x115c   :  { %2097 = vadd.xlane.f32.xlu0 %v2096_v36 }
0x1172   :  { %6707 = vrot.lane.b32.xlu0 %v8167_v17, %s7532_s11 }
0x11e5   :  { %v2101_v38 = vpop.xlane.xlu0 %2100 }
0x11e6   :  { %6854 = vrcp.f32 %v2101_v38 }
0x11e9   :  { %v2098_v40 = vpop.xlane.xlu0 %2097 }
0x11ea   :  { %6856 = vrcp.f32 %v2098_v40 }
0x11ed   :  { %v6708_v41 = vpop.permute.xlu0 %6707 }
0x11ee   :  { %v6710_v43 = vunpack.i.h.bf16 %v6708_v41  ;;  %v6709_v46 = vunpack.i.l.bf16 %v6708_v41 }
0x11f0   :  { %v6420_v49 = vpack.c.bf16 %v6710_v43, %v6709_v46  ;;  %v6855_v50 = vpop.eup %6854 }
0x11f1   :  { %v2105_v54 = vmul.f32 %v6855_v50, %v6851_v16  ;;  %v2438_v16 = vld [vmem:[%s8953_s13 + $0x10] sm:$0xff] }
0x11f2   :  { %6422 = vmatprep.subr.msk.bf16.mxu1 %vm8042_vm11, %v6420_v49  ;;  %v6436_v38 = vpack.c.bf16 %v2439_v14, %v2438_v16 }
0x11f4   :  { %v6857_v52 = vpop.eup %6856 }
0x11f5   :  { %v2104_v53 = vmul.f32 %v6857_v52, %v6853_v35 }
0x11f7   :  { %6041 = vmatprep.mubr.msk.f32.mxu1 %vm821_vm13, %v2104_v53 }
0x11f8   :  { %6042 = vmatmul.mubr.msk.f32.vlgmr.msra.gmra.mrb[18].mxu1 %vm821_vm13, %v2105_v54 }
0x11f9   :  { %6425 = vmatpush3.bf16.xpose.msk.msra.mxu1 %vm8042_vm11, %v6420_v49  ;;  %6048 = vmatprep.mubr.msk.f32.mxu1 %vm733_vm10, %v2195_v56 }
0x11fa   :  { %6438 = vmatprep.subr.bf16.mxu1 %v7519_v0 }
0x1200   :  { %6049 = vmatmul.mubr.msk.f32.vlgmr.msra.gmra.mrb[20].mxu1 %vm733_vm10, %v2197_v57 }
0x1201   :  { %6083 = vmatprep.mubr.msk.f32.mxu1 %vm7521_vm0, %v7520_v1 }
0x12cb   :  { %v8274_v58 = vpop.f32.mrb[18].mxu1 }
0x12cc   :  { %v2185_v59 = vpop.f32.mrb[19].mxu1 }
0x12d3   :  { %v6050_v60 = vpop.f32.mrb[20].mxu1 }
0x12d4   :  { %v2286_v61 = vmul.f32 0.35355338, %v6050_v60  ;;  %v2276_v62 = vpop.f32.mrb[21].mxu1 }
0x12d5   :  { %v2285_v5 = vmul.f32 0.35355338, %v2276_v62 }
0x12d6   :  { %v2288_v6 = vadd.f32 %v2286_v61, %v8058_v51 }
0x12d7   :  { %v2287_v7 = vadd.f32 %v2285_v5, %v8060_v55 }
0x12d8   :  { %v2292_v10 = vsel %vm825_vm12, %v2288_v6, -inf }
0x12d9   :  { %2293 = vmax.xlane.f32.xlu0 %v2292_v10  ;;  %v2289_v11 = vsel %vm821_vm13, %v2287_v7, -inf }
0x12da   :  { %2290 = vmax.xlane.f32.xlu1 %v2289_v11 }
0x12eb   :  { %6712 = vrot.lane.b32.xlu1 %v8167_v17, %s7533_s10 }
0x12ef   :  { %1558 = vrot.lane.b32.xlu1 %v8143_v48, %s7501_s1 }
0x12f3   :  { %2401 = vrot.lane.b32.xlu1 %v8243_v9, %s9006_s12 }
0x12f7   :  { %1566 = vrot.lane.b32.xlu1 %v8183_v26, %s7534_s23 }
0x12fb   :  { %1552 = vrot.lane.b32.xlu1 %v8111_v3, %s9006_s12 }
0x12ff   :  { %1560 = vrot.lane.b32.xlu1 %v8141_v47, %s7501_s1 }
0x1366   :  { %v2294_v51 = vpop.xlane.xlu0 %2293 }
0x1367   :  { %v2296_v55 = vsub.f32 %v2288_v6, %v2294_v51  ;;  %v2291_v33 = vpop.xlane.xlu1 %2290 }
0x1368   :  { %v2295_v17 = vsub.f32 %v2287_v7, %v2291_v33 }
0x1369   :  { %v2299_v12 = vmul.f32 1.442695, %v2296_v55 }
0x136a   :  { %v2297_v13 = vmul.f32 1.442695, %v2295_v17 }
0x136b   :  { %v6713_v48 = vpop.permute.xlu1 %6712 }
0x136c   :  { %6858 = vpow2.f32 %v2297_v13  ;;  %v6715_v15 = vunpack.i.h.bf16 %v6713_v48  ;;  %v6714_v9 = vunpack.i.l.bf16 %v6713_v48 }
0x136d   :  { %6860 = vpow2.f32 %v2299_v12 }
0x136e   :  { %v6426_v20 = vpack.c.bf16 %v6715_v15, %v6714_v9  ;;  %v2590_v15 = vld [vmem:[%s8956_s16] sm:$0xff]  ;;  %v2591_v9 = vld [vmem:[%s8956_s16 + $0x8] sm:$0xff] }
0x136f   :  { %v1559_v29 = vpop.permute.xlu1 %1558 }
0x1370   :  { %6428 = vmatprep.subr.msk.bf16.mxu0 %vm8085_vm15, %v6426_v20 }
0x1371   :  { %6431 = vmatpush3.bf16.msk.msra.mxu0 %vm8085_vm15, %v6426_v20  ;;  %v6439_v20 = vpack.c.bf16 %v2591_v9, %v2590_v15 }
0x1372   :  { %6432 = vmatprep.subr.bf16.mxu0 %v7519_v0 }
0x1373   :  { %v2402_v35 = vpop.permute.xlu1 %2401  ;;  %6440 = vmatpush3.bf16.msra.mxu1 %v6439_v20 }
0x1374   :  { %6441 = vmatprep.subr.bf16.mxu1 %v7519_v0 }
0x1376   :  { %v6859_v3 = vpop.eup %6858 }
0x1377   :  { %v2301_v47 = vsel %vm821_vm13, %v6859_v3, 0.0  ;;  %v6861_v26 = vpop.eup %6860  ;;  %v1567_v41 = vpop.permute.xlu1 %1566 }
0x1378   :  { %2302 = vadd.xlane.f32.xlu0 %v2301_v47  ;;  %v2304_v34 = vsel %vm825_vm12, %v6861_v26, 0.0  ;;  %v2593_v47 = vld [vmem:[%s8956_s16 + $0x18] sm:$0xff] }
0x137b   :  { %v1553_v54 = vpop.permute.xlu1 %1552 }
0x137c   :  { %2305 = vadd.xlane.f32.xlu0 %v2304_v34  ;;  %v1573_v60 = vsel %vm733_vm10, %v8107_v63, %v1553_v54  ;;  %v2778_v54 = vld [vmem:[%s8958_s18 + $0x38] sm:$0xff] }
0x1392   :  { %1550 = vrot.lane.b32.xlu0 %v8113_v4, %s9006_s12 }
0x1396   :  { %2409 = vrot.lane.b32.xlu0 %v2185_v59, %s7501_s1  ;;  %v1561_v59 = vpop.permute.xlu1 %1560 }
0x1397   :  { %v1575_v61 = vsel %vm364_vm3, %v1573_v60, %v1561_v59 }
0x1405   :  { %v2303_v21 = vpop.xlane.xlu0 %2302 }
0x1406   :  { %6862 = vrcp.f32 %v2303_v21 }
0x1409   :  { %v2306_v22 = vpop.xlane.xlu0 %2305 }
0x140a   :  { %6864 = vrcp.f32 %v2306_v22 }
0x140d   :  { %v1551_v30 = vpop.permute.xlu0 %1550 }
0x140e   :  { %v1572_v36 = vsel %vm733_vm10, %v8109_v2, %v1551_v30 }
0x140f   :  { %v1574_v40 = vsel %vm364_vm3, %v1572_v36, %v1559_v29  ;;  %v8376_v29 = vld [vmem:[#allocation20] ss:$0 sm:$0xff] }
0x1410   :  { %v6863_v31 = vpop.eup %6862  ;;  %v1577_v43 = vsel %vm1576_vm2, %v1574_v40, %v1567_v41  ;;  %v2771_v40 = vld [vmem:[%s8958_s18] sm:$0xff] }
0x1411   :  { %v2309_v23 = vmul.f32 %v6863_v31, %v6859_v3  ;;  %v2410_v56 = vpop.permute.xlu0 %2409  ;;  %v2592_v3 = vld [vmem:[%s8956_s16 + $0x10] sm:$0xff] }
0x1413   :  { %6055 = vmatprep.mubr.msk.f32.mxu0 %vm821_vm13, %v2309_v23 }
0x1414   :  { %v6865_v4 = vpop.eup %6864 }
0x1415   :  { %v2310_v32 = vmul.f32 %v6865_v4, %v6861_v26  ;;  %v6442_v26 = vpack.c.bf16 %v2593_v47, %v2592_v3 }
0x1417   :  { %6056 = vmatmul.mubr.msk.f32.vlgmr.msra.gmra.mrb[18].mxu0 %vm821_vm13, %v2310_v32  ;;  %6443 = vmatpush3.bf16.msra.mxu1 %v6442_v26 }
0x1418   :  { %6434 = vmatpush3.bf16.msra.mxu0 %v6433_v28  ;;  %6066 = vmatprep.mubr.msk.f32.mxu0 %vm7521_vm0, %v7520_v1 }
0x1419   :  { %6435 = vmatprep.subr.bf16.mxu0 %v7519_v0  ;;  %6456 = vmatprep.subr.bf16.mxu1 %v7519_v0 }
0x141c   :  { %6437 = vmatpush3.bf16.msra.mxu0 %v6436_v38 }
0x141d   :  { %6444 = vmatprep.subr.bf16.mxu0 %v7519_v0 }
0x141f   :  { %6067 = vmatmul.mubr.msk.f32.vlgmr.msra.gmra.mrb[20].mxu0 %vm574_vm8, %v1577_v43  ;;  %v2774_v43 = vld [vmem:[%s8958_s18 + $0x18] sm:$0xff] }
0x1420   :  { %6069 = vmatprep.mubr.msk.f32.mxu0 %vm7521_vm0, %v7520_v1 }
0x14ea   :  { %v6057_v2 = vpop.f32.mrb[18].mxu0 }
0x14eb   :  { %v2390_v46 = vpop.f32.mrb[19].mxu0 }
0x14ec   :  { %2417 = vrot.lane.b32.xlu0 %v2390_v46, %s7534_s23  ;;  %v2775_v46 = vld [vmem:[%s8958_s18 + $0x20] sm:$0xff] }
0x14f0   :  { %1568 = vrot.lane.b32.xlu0 %v8181_v25, %s7534_s23  ;;  %v2423_v25 = vsel %vm733_vm10, %v8213_v19, %v2402_v35 }
0x14f2   :  { %v2514_v49 = vpop.f32.mrb[20].mxu0 }
0x14f3   :  { %v8331_v50 = vadd.f32 %v2514_v49, %v7981_v39  ;;  %v6068_v52 = vpop.f32.mrb[21].mxu0  ;;  %v2425_v39 = vsel %vm364_vm3, %v2423_v25, %v2410_v56  ;;  %v2776_v49 = vld [vmem:[%s8958_s18 + $0x28] sm:$0xff] }
0x14f4   :  { %2403 = vrot.lane.b32.xlu0 %v8241_v8, %s9006_s12  ;;  %v6451_v52 = vpack.c.bf16 %v2776_v49, %v2775_v46 }
0x14f5   :  { %v2533_v53 = vsel %vm574_vm8, %v8331_v50, 0.0 }
0x14f6   :  { %2534 = vadd.xlane.f32.xlu1 %v2533_v53  ;;  %v2777_v53 = vld [vmem:[%s8958_s18 + $0x30] sm:$0xff] }
0x14f7   :  { %v6454_v56 = vpack.c.bf16 %v2778_v54, %v2777_v53 }
0x14f8   :  { %2411 = vrot.lane.b32.xlu0 %v8274_v58, %s7501_s1 }
0x14fc   :  { %2419 = vrot.lane.b32.xlu0 %v6057_v2, %s7534_s23 }
0x155e   :  { %v2418_v57 = vpop.permute.xlu0 %2417 }
0x155f   :  { %v2427_v8 = vsel %vm1576_vm2, %v2425_v39, %v2418_v57 }
0x1560   :  { %v2431_v62 = vrot.slane %v2427_v8, 6 }
0x1562   :  { %v1569_v58 = vpop.permute.xlu0 %1568 }
0x1563   :  { %v1578_v5 = vsel %vm1576_vm2, %v1575_v61, %v1569_v58 }
0x1564   :  { %v2435_v6 = vsel %vm561_vm5, %v1578_v5, %v2431_v62 }
0x1565   :  { %6070 = vmatmul.mubr.msk.f32.gmra.mrb[22].mxu0 %vm574_vm8, %v2435_v6  ;;  %v8426_v6 = vld [vmem:[#allocation23] ss:$0 sm:$0xff] }
0x1566   :  { %v2404_v19 = vpop.permute.xlu0 %2403  ;;  %6072 = vmatprep.mubr.msk.f32.mxu0 %vm7521_vm0, %v7520_v1 }
0x1567   :  { %v2424_v10 = vsel %vm733_vm10, %v8211_v18, %v2404_v19 }
0x156a   :  { %v2412_v7 = vpop.permute.xlu0 %2411 }
0x156b   :  { %v2426_v63 = vsel %vm364_vm3, %v2424_v10, %v2412_v7 }
0x156e   :  { %v2420_v11 = vpop.permute.xlu0 %2419 }
0x156f   :  { %v2428_v51 = vsel %vm1576_vm2, %v2426_v63, %v2420_v11 }
0x1570   :  { %v2432_v55 = vrot.slane %v2428_v51, 6 }
0x1572   :  { %v2433_v33 = vsel %vm561_vm5, %v2431_v62, %v2432_v55 }
0x1573   :  { %6073 = vmatmul.mubr.msk.f32.gmra.mrb[24].mxu0 %vm574_vm8, %v2433_v33 }
0x1574   :  { %6108 = vmatprep.mubr.msk.f32.mxu0 %vm7521_vm0, %v7520_v1 }
0x1583   :  { %v2535_v17 = vpop.xlane.xlu1 %2534 }
0x1584   :  { %v2542_v12 = vmul.f32 0.03125, %v2535_v17 }
0x1586   :  { %v2545_v13 = vsub.f32 %v8331_v50, %v2542_v12 }
0x1588   :  { %v2548_v48 = vmul.f32 %v2545_v13, %v2545_v13 }
0x158a   :  { %v2551_v18 = vsel %vm574_vm8, %v2548_v48, 0.0 }
0x158b   :  { %2552 = vadd.xlane.f32.xlu1 %v2551_v18 }
0x1618   :  { %v2553_v34 = vpop.xlane.xlu1 %2552 }
0x1619   :  { %v2560_v21 = vmul.f32 0.03125, %v2553_v34 }
0x161b   :  { %v2563_v22 = vadd.f32 1e-05, %v2560_v21 }
0x161d   :  { %6866 = vrsqrt.f32 %v2563_v22 }
0x1627   :  { %v6867_v31 = vpop.eup %6866 }
0x1628   :  { %v2569_v23 = vmul.f32 %v6867_v31, %v2545_v13 }
0x162a   :  { %v2578_v27 = vmul.f32 %v8376_v29, %v2569_v23 }
0x162c   :  { %v2587_v4 = vadd.f32 %v8378_v24, %v2578_v27 }
0x162e   :  { %6084 = vmatmul.mubr.msk.f32.vlgmr.msra.gmra.mrb[22].mxu1 %vm574_vm8, %v2587_v4 }
0x162f   :  { %6086 = vmatprep.mubr.msk.f32.mxu1 %vm7521_vm0, %v7520_v1 }
0x1638   :  { %v2519_v28 = vpop.f32.mrb[22].mxu0 }
0x1639   :  { %v8386_v30 = vadd.f32 %v2519_v28, %v7985_v42  ;;  %v6071_v32 = vpop.f32.mrb[23].mxu0  ;;  %v2772_v42 = vld [vmem:[%s8958_s18 + $0x8] sm:$0xff] }
0x163a   :  { %v6445_v41 = vpack.c.bf16 %v2772_v42, %v2771_v40 }
0x163b   :  { %v2536_v16 = vsel %vm574_vm8, %v8386_v30, 0.0 }
0x163c   :  { %2537 = vadd.xlane.f32.xlu0 %v2536_v16  ;;  %6446 = vmatpush3.bf16.msra.mxu0 %v6445_v41 }
0x163d   :  { %6447 = vmatprep.subr.bf16.mxu0 %v7519_v0 }
0x1646   :  { %v2524_v14 = vpop.f32.mrb[24].mxu0 }
0x1647   :  { %v8391_v35 = vadd.f32 %v2524_v14, %v7990_v45  ;;  %v6074_v36 = vpop.f32.mrb[25].mxu0  ;;  %v2773_v45 = vld [vmem:[%s8958_s18 + $0x10] sm:$0xff] }
0x1648   :  { %v6448_v2 = vpack.c.bf16 %v2774_v43, %v2773_v45 }
0x1649   :  { %v2539_v38 = vsel %vm581_vm9, %v8391_v35, 0.0 }
0x164a   :  { %2540 = vadd.xlane.f32.xlu0 %v2539_v38  ;;  %6449 = vmatpush3.bf16.msra.mxu0 %v6448_v2 }
0x164b   :  { %6450 = vmatprep.subr.bf16.mxu0 %v7519_v0 }
0x164e   :  { %6452 = vmatpush3.bf16.msra.mxu0 %v6451_v52 }
0x164f   :  { %6453 = vmatprep.subr.bf16.mxu0 %v7519_v0 }
0x1652   :  { %6455 = vmatpush3.bf16.msra.mxu0 %v6454_v56  ;;  %v8442_v56 = vld [vmem:[#allocation25] ss:$0 sm:$0xff] }
0x16c9   :  { %v2538_v25 = vpop.xlane.xlu0 %2537 }
0x16ca   :  { %v2543_v39 = vmul.f32 0.03125, %v2538_v25 }
0x16cc   :  { %v2546_v57 = vsub.f32 %v8386_v30, %v2543_v39 }
0x16ce   :  { %v2549_v59 = vmul.f32 %v2546_v57, %v2546_v57 }
0x16d0   :  { %v2554_v8 = vsel %vm574_vm8, %v2549_v59, 0.0 }
0x16d1   :  { %2555 = vadd.xlane.f32.xlu1 %v2554_v8 }
0x16d7   :  { %v2541_v60 = vpop.xlane.xlu0 %2540 }
0x16d8   :  { %v2544_v61 = vmul.f32 0.03125, %v2541_v60 }
0x16da   :  { %v2547_v62 = vsub.f32 %v8391_v35, %v2544_v61 }
0x16dc   :  { %v2550_v58 = vmul.f32 %v2547_v62, %v2547_v62 }
0x16de   :  { %v2557_v5 = vsel %vm581_vm9, %v2550_v58, 0.0 }
0x16df   :  { %2558 = vadd.xlane.f32.xlu1 %v2557_v5 }
0x1701   :  { %v2676_v19 = vpop.f32.mrb[22].mxu1 }
0x1702   :  { %v2677_v7 = vadd.f32 %v8426_v6, %v2676_v19  ;;  %v6085_v10 = vpop.f32.mrb[23].mxu1 }
0x1704   :  { %v2693_v63 = vmul.f32 0.70710677, %v2677_v7  ;;  %v2690_v4 = vmul.f32 0.5, %v2677_v7 }
0x1706   :  { %v2696_v11 = vand.u32 2147483647, %v2693_v63  ;;  %vm2756_vm6 = vcmp.ge.f32.partialorder %v2693_v63, 0.0 }
0x1708   :  { %v2699_v51 = vmul.f32 0.3275911, %v2696_v11  ;;  %v2738_v33 = vsub.f32 0.0, %v2696_v11 }
0x170a   :  { %v2702_v55 = vadd.f32 1.0, %v2699_v51  ;;  %v2741_v12 = vmul.f32 %v2738_v33, %v2696_v11 }
0x170c   :  { %6868 = vrcp.f32 %v2702_v55  ;;  %v2744_v18 = vmul.f32 1.442695, %v2741_v12 }
0x170e   :  { %6870 = vpow2.f32 %v2744_v18 }
0x1716   :  { %v6869_v17 = vpop.eup %6868 }
0x1717   :  { %v2711_v13 = vmul.f32 1.0614054, %v6869_v17 }
0x1718   :  { %v6871_v21 = vpop.eup %6870 }
0x1719   :  { %v5590_v48 = vadd.f32 -1.4531521, %v2711_v13 }
0x171b   :  { %v2717_v15 = vmul.f32 %v6869_v17, %v5590_v48 }
0x171d   :  { %v2720_v9 = vadd.f32 1.4214138, %v2717_v15 }
0x171f   :  { %v2723_v20 = vmul.f32 %v6869_v17, %v2720_v9 }
0x1721   :  { %v5593_v3 = vadd.f32 -0.28449672, %v2723_v20 }
0x1723   :  { %v2729_v47 = vmul.f32 %v6869_v17, %v5593_v3 }
0x1725   :  { %v2732_v26 = vadd.f32 0.2548296, %v2729_v47 }
0x1727   :  { %v2735_v34 = vmul.f32 %v6869_v17, %v2732_v26 }
0x1729   :  { %v2750_v22 = vmul.f32 %v6871_v21, %v2735_v34 }
0x172b   :  { %v2753_v31 = vsub.f32 1.0, %v2750_v22 }
0x172d   :  { %v2759_v23 = vsub.f32 0.0, %v2753_v31 }
0x172f   :  { %v2762_v27 = vsel %vm2756_vm6, %v2753_v31, %v2759_v23 }
0x1730   :  { %v2765_v28 = vadd.f32 1.0, %v2762_v27 }
0x1732   :  { %v2768_v32 = vmul.f32 %v2765_v28, %v2690_v4 }
0x1734   :  { %6109 = vmatmul.mubr.msk.f32.vlgmr.msra.gmra.mrb[26].mxu0 %vm2779_vm7, %v2768_v32 }
0x1735   :  { %6111 = vmatprep.mubr.msk.f32.mxu0 %vm7521_vm0, %v7520_v1 }
0x175e   :  { %v2556_v16 = vpop.xlane.xlu1 %2555 }
0x175f   :  { %v2561_v14 = vmul.f32 0.03125, %v2556_v16 }
0x1761   :  { %v2564_v36 = vadd.f32 1e-05, %v2561_v14 }
0x1763   :  { %6872 = vrsqrt.f32 %v2564_v36 }
0x176c   :  { %v2559_v38 = vpop.xlane.xlu1 %2558 }
0x176d   :  { %v6873_v40 = vpop.eup %6872  ;;  %v2562_v42 = vmul.f32 0.03125, %v2559_v38 }
0x176e   :  { %v2570_v41 = vmul.f32 %v6873_v40, %v2546_v57 }
0x176f   :  { %v2565_v45 = vadd.f32 1e-05, %v2562_v42 }
0x1770   :  { %v2579_v43 = vmul.f32 %v8376_v29, %v2570_v41 }
0x1771   :  { %6874 = vrsqrt.f32 %v2565_v45 }
0x1772   :  { %v2588_v2 = vadd.f32 %v8378_v24, %v2579_v43 }
0x1774   :  { %6087 = vmatmul.mubr.msk.f32.gmra.mrb[24].mxu1 %vm574_vm8, %v2588_v2 }
0x1775   :  { %6089 = vmatprep.mubr.msk.f32.mxu1 %vm7521_vm0, %v7520_v1 }
0x177b   :  { %v6875_v46 = vpop.eup %6874 }
0x177c   :  { %v2571_v49 = vmul.f32 %v6875_v46, %v2547_v62 }
0x177e   :  { %v2580_v52 = vmul.f32 %v8376_v29, %v2571_v49 }
0x1780   :  { %v2589_v53 = vadd.f32 %v8378_v24, %v2580_v52 }
0x1782   :  { %6090 = vmatmul.mubr.msk.f32.gmra.mrb[26].mxu1 %vm574_vm8, %v2589_v53 }
0x1783   :  { %6125 = vmatprep.mubr.msk.f32.mxu1 %vm7521_vm0, %v7520_v1 }
0x1807   :  { %v2855_v54 = vpop.f32.mrb[26].mxu0 }
0x1808   :  { %v2869_v25 = vadd.f32 %v2855_v54, %v8331_v50  ;;  %v6110_v39 = vpop.f32.mrb[27].mxu0 }
0x180a   :  { %v8446_v57 = vadd.f32 %v8442_v56, %v2869_v25 }
0x180c   :  { %v2886_v59 = vsel %vm574_vm8, %v8446_v57, 0.0 }
0x180d   :  { %2887 = vadd.xlane.f32.xlu0 %v2886_v59 }
0x1847   :  { %v2681_v29 = vpop.f32.mrb[24].mxu1 }
0x1848   :  { %v2682_v24 = vadd.f32 %v8426_v6, %v2681_v29  ;;  %v6088_v8 = vpop.f32.mrb[25].mxu1 }
0x184a   :  { %v2694_v60 = vmul.f32 0.70710677, %v2682_v24  ;;  %v2691_v40 = vmul.f32 0.5, %v2682_v24 }
0x184c   :  { %v2697_v61 = vand.u32 2147483647, %v2694_v60  ;;  %vm2757_vm14 = vcmp.ge.f32.partialorder %v2694_v60, 0.0 }
0x184e   :  { %v2700_v62 = vmul.f32 0.3275911, %v2697_v61  ;;  %v2739_v7 = vsub.f32 0.0, %v2697_v61 }
0x1850   :  { %v2703_v58 = vadd.f32 1.0, %v2700_v62  ;;  %v2742_v51 = vmul.f32 %v2739_v7, %v2697_v61  ;;  %v5602_v62 = vld [vmem:[%s9015_s6 + $0x20] sm:$0xff] }
0x1852   :  { %6876 = vrcp.f32 %v2703_v58  ;;  %v2746_v13 = vmul.f32 1.442695, %v2742_v51  ;;  %v5603_v58 = vld [vmem:[%s9015_s6 + $0x28] sm:$0xff] }
0x1855   :  { %v2686_v5 = vpop.f32.mrb[26].mxu1 }
0x1856   :  { %v2687_v50 = vadd.f32 %v8426_v6, %v2686_v5  ;;  %v6091_v19 = vpop.f32.mrb[27].mxu1  ;;  %v6457_v5 = vpack.c.bf16 %v5603_v58, %v5602_v62 }
0x1857   :  { %v5605_v19 = vld [vmem:[%s9015_s6 + $0x38] sm:$0xff] }
0x1858   :  { %v2695_v10 = vmul.f32 0.70710677, %v2687_v50  ;;  %v2692_v25 = vmul.f32 0.5, %v2687_v50  ;;  %6458 = vmatpush3.bf16.msra.mxu1 %v6457_v5  ;;  %v5604_v50 = vld [vmem:[%s9015_s6 + $0x30] sm:$0xff] }
0x1859   :  { %6459 = vmatprep.subr.bf16.mxu1 %v7519_v0  ;;  %v6460_v7 = vpack.c.bf16 %v5605_v19, %v5604_v50 }
0x185a   :  { %v2698_v63 = vand.u32 2147483647, %v2695_v10  ;;  %vm2758_vm6 = vcmp.ge.f32.partialorder %v2695_v10, 0.0 }
0x185c   :  { %v6877_v11 = vpop.eup %6876  ;;  %v2701_v55 = vmul.f32 0.3275911, %v2698_v63  ;;  %v2740_v9 = vsub.f32 0.0, %v2698_v63  ;;  %6461 = vmatpush3.bf16.msra.mxu1 %v6460_v7 }
0x185d   :  { %v2712_v33 = vmul.f32 1.0614054, %v6877_v11 }
0x185e   :  { %v2704_v17 = vadd.f32 1.0, %v2701_v55  ;;  %v2743_v47 = vmul.f32 %v2740_v9, %v2698_v63  ;;  %v5600_v55 = vld [vmem:[#allocation17 + $0x1] ss:$0 sm:$0xff] }
0x185f   :  { %v5591_v12 = vadd.f32 -1.4531521, %v2712_v33 }
0x1860   :  { %6878 = vrcp.f32 %v2704_v17  ;;  %v2748_v23 = vmul.f32 1.442695, %v2743_v47  ;;  %v5601_v17 = vld [vmem:[#allocation19 + $0x1] ss:$0 sm:$0xff] }
0x1861   :  { %v2718_v48 = vmul.f32 %v6877_v11, %v5591_v12  ;;  %6880 = vpow2.f32 %v2746_v13 }
0x1862   :  { %6882 = vpow2.f32 %v2748_v23 }
0x1863   :  { %v2721_v18 = vadd.f32 1.4214138, %v2718_v48 }
0x1865   :  { %v2724_v15 = vmul.f32 %v6877_v11, %v2721_v18 }
0x1867   :  { %v5594_v20 = vadd.f32 -0.28449672, %v2724_v15 }
0x1869   :  { %v2730_v3 = vmul.f32 %v6877_v11, %v5594_v20 }
0x186a   :  { %v6879_v6 = vpop.eup %6878 }
0x186b   :  { %v2733_v26 = vadd.f32 0.2548296, %v2730_v3  ;;  %v2713_v34 = vmul.f32 1.0614054, %v6879_v6  ;;  %v6881_v31 = vpop.eup %6880 }
0x186c   :  { %v6883_v46 = vpop.eup %6882 }
0x186d   :  { %v2736_v21 = vmul.f32 %v6877_v11, %v2733_v26  ;;  %v5592_v22 = vadd.f32 -1.4531521, %v2713_v34 }
0x186f   :  { %v2751_v27 = vmul.f32 %v6881_v31, %v2736_v21  ;;  %v2719_v4 = vmul.f32 %v6879_v6, %v5592_v22 }
0x1871   :  { %v2754_v28 = vsub.f32 1.0, %v2751_v27  ;;  %v2722_v32 = vadd.f32 1.4214138, %v2719_v4 }
0x1873   :  { %v2760_v16 = vsub.f32 0.0, %v2754_v28  ;;  %v2725_v14 = vmul.f32 %v6879_v6, %v2722_v32 }
0x1875   :  { %v2763_v36 = vsel %vm2757_vm14, %v2754_v28, %v2760_v16  ;;  %v5595_v38 = vadd.f32 -0.28449672, %v2725_v14 }
0x1876   :  { %v2766_v42 = vadd.f32 1.0, %v2763_v36 }
0x1877   :  { %v2731_v41 = vmul.f32 %v6879_v6, %v5595_v38 }
0x1878   :  { %v2769_v45 = vmul.f32 %v2766_v42, %v2691_v40 }
0x1879   :  { %v2734_v43 = vadd.f32 0.2548296, %v2731_v41 }
0x187a   :  { %6112 = vmatmul.mubr.msk.f32.gmra.mrb[28].mxu0 %vm2779_vm7, %v2769_v45 }
0x187b   :  { %v2737_v2 = vmul.f32 %v6879_v6, %v2734_v43  ;;  %6114 = vmatprep.mubr.msk.f32.mxu0 %vm7521_vm0, %v7520_v1 }
0x187d   :  { %v2752_v49 = vmul.f32 %v6883_v46, %v2737_v2 }
0x187f   :  { %v2755_v52 = vsub.f32 1.0, %v2752_v49 }
0x1881   :  { %v2761_v53 = vsub.f32 0.0, %v2755_v52 }
0x1883   :  { %v2764_v54 = vsel %vm2758_vm6, %v2755_v52, %v2761_v53 }
0x1884   :  { %v2767_v39 = vadd.f32 1.0, %v2764_v54 }
0x1886   :  { %v2770_v59 = vmul.f32 %v2767_v39, %v2692_v25 }
0x1888   :  { %6115 = vmatmul.mubr.msk.f32.gmra.mrb[30].mxu0 %vm2779_vm7, %v2770_v59 }
0x189a   :  { %v2888_v29 = vpop.xlane.xlu0 %2887 }
0x189b   :  { %v2895_v24 = vmul.f32 0.03125, %v2888_v29 }
0x189d   :  { %v2898_v8 = vsub.f32 %v8446_v57, %v2895_v24 }
0x189f   :  { %v2901_v60 = vmul.f32 %v2898_v8, %v2898_v8 }
0x18a1   :  { %v2904_v61 = vsel %vm574_vm8, %v2901_v60, 0.0 }
0x18a2   :  { %2905 = vadd.xlane.f32.xlu0 %v2904_v61 }
0x192f   :  { %v2906_v10 = vpop.xlane.xlu0 %2905 }
0x1930   :  { %v2913_v63 = vmul.f32 0.03125, %v2906_v10 }
0x1932   :  { %v2916_v11 = vadd.f32 1e-05, %v2913_v63 }
0x1934   :  { %6884 = vrsqrt.f32 %v2916_v11 }
0x193e   :  { %v6885_v51 = vpop.eup %6884 }
0x193f   :  { %v2922_v33 = vmul.f32 %v6885_v51, %v2898_v8 }
0x1941   :  { %v2931_v12 = vmul.f32 %v5600_v55, %v2922_v33  ;;  %v8526_v33 = vld [vmem:[#allocation7 + $0x8] sm:$0x3] }
0x1943   :  { %v2940_v13 = vadd.f32 %v5601_v17, %v2931_v12  ;;  %v8529_v12 = vld [vmem:[#allocation7] sm:$0xff] }
0x1945   :  { %6126 = vmatmul.mubr.msk.f32.vlgmr.msra.gmra.mrb[28].mxu1 %vm574_vm8, %v2940_v13 }
0x1946   :  { %6128 = vmatprep.mubr.msk.f32.mxu1 %vm7521_vm0, %v7520_v1 }
0x194d   :  { %v2860_v48 = vpop.f32.mrb[28].mxu0 }
0x194e   :  { %v2870_v18 = vadd.f32 %v2860_v48, %v8386_v30  ;;  %v6113_v15 = vpop.f32.mrb[29].mxu0 }
0x1950   :  { %v8476_v9 = vadd.f32 %v8442_v56, %v2870_v18 }
0x1952   :  { %v2889_v20 = vsel %vm574_vm8, %v8476_v9, 0.0 }
0x1953   :  { %2890 = vadd.xlane.f32.xlu1 %v2889_v20 }
0x195b   :  { %v2865_v3 = vpop.f32.mrb[30].mxu0 }
0x195c   :  { %v2871_v6 = vadd.f32 %v2865_v3, %v8391_v35  ;;  %v6116_v47 = vpop.f32.mrb[31].mxu0 }
0x195e   :  { %v8482_v26 = vadd.f32 %v8442_v56, %v2871_v6 }
0x1960   :  { %v2892_v34 = vsel %vm581_vm9, %v8482_v26, 0.0 }
0x1961   :  { %2893 = vadd.xlane.f32.xlu0 %v2892_v34 }
0x19e0   :  { %v2891_v30 = vpop.xlane.xlu1 %2890 }
0x19e1   :  { %v2896_v21 = vmul.f32 0.03125, %v2891_v30 }
0x19e3   :  { %v2899_v22 = vsub.f32 %v8476_v9, %v2896_v21 }
0x19e5   :  { %v2902_v31 = vmul.f32 %v2899_v22, %v2899_v22 }
0x19e7   :  { %v2907_v23 = vsel %vm574_vm8, %v2902_v31, 0.0 }
0x19e8   :  { %2908 = vadd.xlane.f32.xlu1 %v2907_v23 }
0x19ee   :  { %v2894_v27 = vpop.xlane.xlu0 %2893 }
0x19ef   :  { %v2897_v4 = vmul.f32 0.03125, %v2894_v27 }
0x19f1   :  { %v2900_v35 = vsub.f32 %v8482_v26, %v2897_v4 }
0x19f3   :  { %v2903_v28 = vmul.f32 %v2900_v35, %v2900_v35 }
0x19f5   :  { %v2910_v56 = vsel %vm581_vm9, %v2903_v28, 0.0 }
0x19f6   :  { %2911 = vadd.xlane.f32.xlu1 %v2910_v56 }
0x1a18   :  { %v8490_v32 = vpop.f32.mrb[28].mxu1 }
0x1a19   :  { %v6127_v16 = vpop.f32.mrb[29].mxu1 }
0x1a75   :  { %v2909_v14 = vpop.xlane.xlu1 %2908 }
0x1a76   :  { %v2914_v36 = vmul.f32 0.03125, %v2909_v14 }
0x1a78   :  { %v2917_v38 = vadd.f32 1e-05, %v2914_v36 }
0x1a7a   :  { %6886 = vrsqrt.f32 %v2917_v38 }
0x1a83   :  { %v2912_v40 = vpop.xlane.xlu1 %2911 }
0x1a84   :  { %v6887_v42 = vpop.eup %6886  ;;  %v2915_v41 = vmul.f32 0.03125, %v2912_v40 }
0x1a85   :  { %v2923_v45 = vmul.f32 %v6887_v42, %v2899_v22 }
0x1a86   :  { %v2918_v43 = vadd.f32 1e-05, %v2915_v41 }
0x1a87   :  { %v2932_v2 = vmul.f32 %v5600_v55, %v2923_v45 }
0x1a88   :  { %6888 = vrsqrt.f32 %v2918_v43 }
0x1a89   :  { %v2941_v46 = vadd.f32 %v5601_v17, %v2932_v2 }
0x1a8b   :  { %6129 = vmatmul.mubr.msk.f32.gmra.mrb[30].mxu1 %vm574_vm8, %v2941_v46 }
0x1a8c   :  { %6131 = vmatprep.mubr.msk.f32.mxu1 %vm7521_vm0, %v7520_v1 }
0x1a92   :  { %v6889_v49 = vpop.eup %6888 }
0x1a93   :  { %v2924_v52 = vmul.f32 %v6889_v49, %v2900_v35 }
0x1a95   :  { %v2933_v53 = vmul.f32 %v5600_v55, %v2924_v52 }
0x1a97   :  { %v2942_v54 = vadd.f32 %v5601_v17, %v2933_v53 }
0x1a99   :  { %6132 = vmatmul.mubr.msk.f32.gmra.mrb[32].mxu1 %vm574_vm8, %v2942_v54 }
0x1a9a   :  { %6138 = vmatprep.mubr.msk.f32.mxu1 %vm733_vm10, %v8490_v32 }
0x1b5e   :  { %v8498_v25 = vpop.f32.mrb[30].mxu1 }
0x1b5f   :  { %v6130_v39 = vpop.f32.mrb[31].mxu1  ;;  %v8502_v59 = vpack.i.bf16 %v8498_v25, %v8490_v32 }
0x1b61   :  { %6717 = vrot.lane.b32.xlu0 %v8502_v59, %s7522_s22  ;;  %6722 = vrot.lane.b32.xlu1 %v8502_v59, %s7523_s28 }
0x1b65   :  { %3240 = vrot.lane.b32.xlu1 %v8490_v32, %s7524_s17 }
0x1b69   :  { %3242 = vrot.lane.b32.xlu1 %v8498_v25, %s7524_s17 }
0x1b6c   :  { %v8512_v29 = vpop.f32.mrb[32].mxu1 }
0x1b6d   :  { %v6133_v24 = vpop.f32.mrb[33].mxu1 }
0x1bd3   :  { %v6723_v8 = vpop.permute.xlu1 %6722  ;;  %v6718_v60 = vpop.permute.xlu0 %6717 }
0x1bd4   :  { %v6725_v61 = vunpack.i.h.bf16 %v6723_v8  ;;  %v6724_v62 = vunpack.i.l.bf16 %v6723_v8  ;;  %v6720_v58 = vunpack.i.h.bf16 %v6718_v60  ;;  %v6719_v5 = vunpack.i.l.bf16 %v6718_v60 }
0x1bd6   :  { %v6462_v50 = vpack.c.bf16 %v6720_v58, %v6719_v5  ;;  %v6474_v19 = vpack.c.bf16 %v6725_v61, %v6724_v62 }
0x1bd7   :  { %v3241_v7 = vpop.permute.xlu1 %3240 }
0x1bd8   :  { %6464 = vmatprep.subr.msk.bf16.mxu1 %vm8042_vm11, %v6462_v50 }
0x1bd9   :  { %6467 = vmatpush3.bf16.xpose.msk.msra.mxu1 %vm8042_vm11, %v6462_v50 }
0x1bda   :  { %6476 = vmatprep.subr.msk.bf16.mxu1 %vm8042_vm11, %v6474_v19 }
0x1bdb   :  { %v3243_v10 = vpop.permute.xlu1 %3242 }
0x1be0   :  { %6139 = vmatmul.mubr.msk.f32.vlgmr.msra.gmra.mrb[34].mxu1 %vm733_vm10, %v8498_v25 }
0x1be1   :  { %6479 = vmatpush3.bf16.xpose.msk.msra.mxu1 %vm8042_vm11, %v6474_v19  ;;  %6152 = vmatprep.mubr.msk.f32.mxu1 %vm733_vm10, %v3241_v7 }
0x1be8   :  { %6153 = vmatmul.mubr.msk.f32.vlgmr.msra.gmra.mrb[36].mxu1 %vm733_vm10, %v3243_v10 }
0x1cb3   :  { %v6140_v63 = vpop.f32.mrb[34].mxu1 }
0x1cb4   :  { %v3127_v11 = vmul.f32 0.35355338, %v6140_v63  ;;  %v3117_v51 = vpop.f32.mrb[35].mxu1 }
0x1cb5   :  { %v3126_v55 = vmul.f32 0.35355338, %v3117_v51 }
0x1cb6   :  { %v3129_v17 = vadd.f32 %v8526_v33, %v3127_v11 }
0x1cb7   :  { %v3128_v13 = vadd.f32 %v8529_v12, %v3126_v55 }
0x1cb8   :  { %v3133_v48 = vsel %vm825_vm12, %v3129_v17, -inf }
0x1cb9   :  { %3134 = vmax.xlane.f32.xlu1 %v3133_v48  ;;  %v3130_v18 = vsel %vm821_vm13, %v3128_v13, -inf }
0x1cba   :  { %3131 = vmax.xlane.f32.xlu0 %v3130_v18 }
0x1cbb   :  { %v6154_v15 = vpop.f32.mrb[36].mxu1 }
0x1cbc   :  { %v3322_v20 = vpop.f32.mrb[37].mxu1  ;;  %v3332_v3 = vmul.f32 0.35355338, %v6154_v15 }
0x1cbd   :  { %v3331_v6 = vmul.f32 0.35355338, %v3322_v20 }
0x1cbe   :  { %v3334_v30 = vadd.f32 %v8526_v33, %v3332_v3 }
0x1cbf   :  { %v3333_v47 = vadd.f32 %v8529_v12, %v3331_v6 }
0x1cc0   :  { %v3338_v21 = vsel %vm825_vm12, %v3334_v30, -inf }
0x1cc1   :  { %v3335_v34 = vsel %vm821_vm13, %v3333_v47, -inf }
0x1cc2   :  { %3336 = vmax.xlane.f32.xlu0 %v3335_v34 }
0x1cc6   :  { %3339 = vmax.xlane.f32.xlu0 %v3338_v21 }
0x1d46   :  { %v3135_v22 = vpop.xlane.xlu1 %3134 }
0x1d47   :  { %v3137_v31 = vsub.f32 %v3129_v17, %v3135_v22  ;;  %v3132_v23 = vpop.xlane.xlu0 %3131 }
0x1d48   :  { %v3136_v27 = vsub.f32 %v3128_v13, %v3132_v23 }
0x1d49   :  { %v3140_v4 = vmul.f32 1.442695, %v3137_v31 }
0x1d4a   :  { %v3138_v35 = vmul.f32 1.442695, %v3136_v27 }
0x1d4b   :  { %6890 = vpow2.f32 %v3140_v4 }
0x1d4c   :  { %6892 = vpow2.f32 %v3138_v35 }
0x1d4f   :  { %v3337_v28 = vpop.xlane.xlu0 %3336 }
0x1d50   :  { %v3341_v56 = vsub.f32 %v3333_v47, %v3337_v28 }
0x1d52   :  { %v3343_v16 = vmul.f32 1.442695, %v3341_v56 }
0x1d53   :  { %v3340_v14 = vpop.xlane.xlu0 %3339 }
0x1d54   :  { %6894 = vpow2.f32 %v3343_v16  ;;  %v3342_v36 = vsub.f32 %v3334_v30, %v3340_v14 }
0x1d55   :  { %v6891_v38 = vpop.eup %6890 }
0x1d56   :  { %v6893_v40 = vpop.eup %6892  ;;  %v3345_v42 = vmul.f32 1.442695, %v3342_v36  ;;  %v3145_v41 = vsel %vm825_vm12, %v6891_v38, 0.0 }
0x1d57   :  { %3146 = vadd.xlane.f32.xlu1 %v3145_v41  ;;  %v3142_v45 = vsel %vm821_vm13, %v6893_v40, 0.0 }
0x1d58   :  { %6896 = vpow2.f32 %v3345_v42  ;;  %3143 = vadd.xlane.f32.xlu0 %v3142_v45 }
0x1d5e   :  { %v6895_v43 = vpop.eup %6894 }
0x1d5f   :  { %v3347_v2 = vsel %vm821_vm13, %v6895_v43, 0.0 }
0x1d60   :  { %3348 = vadd.xlane.f32.xlu0 %v3347_v2 }
0x1d62   :  { %v6897_v46 = vpop.eup %6896 }
0x1d63   :  { %v3350_v49 = vsel %vm825_vm12, %v6897_v46, 0.0 }
0x1d64   :  { %3351 = vadd.xlane.f32.xlu1 %v3350_v49 }
0x1d75   :  { %6732 = vrot.lane.b32.xlu1 %v8502_v59, %s7525_s20 }
0x1d76   :  { %6727 = vrot.lane.b32.xlu0 %v8502_v59, %s7526_s8 }
0x1d79   :  { %6737 = vrot.lane.b32.xlu1 %v8502_v59, %s7527_s3 }
0x1d7a   :  { %3447 = vrot.lane.b32.xlu0 %v8498_v25, %s7528_s14 }
0x1d7d   :  { %3445 = vrot.lane.b32.xlu1 %v8490_v32, %s7528_s14 }
0x1de4   :  { %v3147_v53 = vpop.xlane.xlu1 %3146 }
0x1de5   :  { %v3144_v52 = vpop.xlane.xlu0 %3143 }
0x1de6   :  { %6898 = vrcp.f32 %v3144_v52 }
0x1de7   :  { %6900 = vrcp.f32 %v3147_v53 }
0x1ded   :  { %v3349_v54 = vpop.xlane.xlu0 %3348 }
0x1dee   :  { %6902 = vrcp.f32 %v3349_v54 }
0x1df0   :  { %v6899_v39 = vpop.eup %6898 }
0x1df1   :  { %v3352_v24 = vpop.xlane.xlu1 %3351  ;;  %v6728_v8 = vpop.permute.xlu0 %6727  ;;  %v3150_v60 = vmul.f32 %v6899_v39, %v6893_v40 }
0x1df2   :  { %6904 = vrcp.f32 %v3352_v24  ;;  %v6730_v61 = vunpack.i.h.bf16 %v6728_v8  ;;  %v6729_v62 = vunpack.i.l.bf16 %v6728_v8  ;;  %v6901_v5 = vpop.eup %6900 }
0x1df3   :  { %6145 = vmatprep.mubr.msk.f32.mxu0 %vm821_vm13, %v3150_v60  ;;  %v3151_v63 = vmul.f32 %v6901_v5, %v6891_v38 }
0x1df4   :  { %v6468_v58 = vpack.c.bf16 %v6730_v61, %v6729_v62 }
0x1df5   :  { %v6733_v50 = vpop.permute.xlu1 %6732  ;;  %v3448_v3 = vpop.permute.xlu0 %3447 }
0x1df6   :  { %v6735_v19 = vunpack.i.h.bf16 %v6733_v50  ;;  %v6734_v7 = vunpack.i.l.bf16 %v6733_v50  ;;  %6470 = vmatprep.subr.msk.bf16.mxu0 %vm8085_vm15, %v6468_v58 }
0x1df7   :  { %6473 = vmatpush3.bf16.msk.msra.mxu0 %vm8085_vm15, %v6468_v58 }
0x1df8   :  { %v6903_v10 = vpop.eup %6902  ;;  %v6480_v11 = vpack.c.bf16 %v6735_v19, %v6734_v7 }
0x1df9   :  { %v6738_v51 = vpop.permute.xlu1 %6737  ;;  %v3355_v55 = vmul.f32 %v6903_v10, %v6895_v43 }
0x1dfa   :  { %v6740_v17 = vunpack.i.h.bf16 %v6738_v51  ;;  %v6739_v13 = vunpack.i.l.bf16 %v6738_v51  ;;  %6146 = vmatmul.mubr.msk.f32.vlgmr.msra.gmra.mrb[32].mxu0 %vm821_vm13, %v3151_v63  ;;  %6482 = vmatprep.subr.msk.bf16.mxu0 %vm8085_vm15, %v6480_v11 }
0x1dfb   :  { %6485 = vmatpush3.bf16.msk.msra.mxu0 %vm8085_vm15, %v6480_v11  ;;  %6159 = vmatprep.mubr.msk.f32.mxu0 %vm821_vm13, %v3355_v55 }
0x1dfc   :  { %v6905_v48 = vpop.eup %6904  ;;  %v6486_v18 = vpack.c.bf16 %v6740_v17, %v6739_v13 }
0x1dfd   :  { %v3356_v15 = vmul.f32 %v6905_v48, %v6897_v46  ;;  %v3446_v20 = vpop.permute.xlu1 %3445 }
0x1dfe   :  { %6488 = vmatprep.subr.msk.bf16.mxu0 %vm8042_vm11, %v6486_v18 }
0x1dff   :  { %6160 = vmatmul.mubr.msk.f32.vlgmr.msra.gmra.mrb[34].mxu0 %vm821_vm13, %v3356_v15 }
0x1e00   :  { %6166 = vmatprep.mubr.msk.f32.mxu0 %vm733_vm10, %v3446_v20 }
0x1e04   :  { %6491 = vmatpush3.bf16.xpose.msk.msra.mxu0 %vm8042_vm11, %v6486_v18 }
0x1e0b   :  { %6167 = vmatmul.mubr.msk.f32.vlgmr.msra.gmra.mrb[36].mxu0 %vm733_vm10, %v3448_v3 }
0x1ecd   :  { %v8570_v6 = vpop.f32.mrb[32].mxu0 }
0x1ece   :  { %v8572_v47 = vpop.f32.mrb[33].mxu0 }
0x1ed2   :  { %v8574_v34 = vpop.f32.mrb[34].mxu0 }
0x1ed3   :  { %v8576_v30 = vpop.f32.mrb[35].mxu0 }
0x1ede   :  { %v6168_v21 = vpop.f32.mrb[36].mxu0 }
0x1edf   :  { %v3537_v22 = vmul.f32 0.35355338, %v6168_v21  ;;  %v3527_v31 = vpop.f32.mrb[37].mxu0 }
0x1ee0   :  { %v3536_v23 = vmul.f32 0.35355338, %v3527_v31 }
0x1ee1   :  { %v3539_v27 = vadd.f32 %v8526_v33, %v3537_v22 }
0x1ee2   :  { %v3538_v4 = vadd.f32 %v8529_v12, %v3536_v23 }
0x1ee3   :  { %v3543_v35 = vsel %vm825_vm12, %v3539_v27, -inf }
0x1ee4   :  { %3544 = vmax.xlane.f32.xlu0 %v3543_v35  ;;  %v3540_v28 = vsel %vm821_vm13, %v3538_v4, -inf }
0x1ee5   :  { %3541 = vmax.xlane.f32.xlu1 %v3540_v28 }
0x1ef6   :  { %6742 = vrot.lane.b32.xlu1 %v8502_v59, %s7530_s29 }
0x1efa   :  { %3650 = vrot.lane.b32.xlu1 %v8490_v32, %s7531_s19 }
0x1efe   :  { %3652 = vrot.lane.b32.xlu1 %v8498_v25, %s7531_s19 }
0x1f71   :  { %v3545_v56 = vpop.xlane.xlu0 %3544 }
0x1f72   :  { %v3547_v16 = vsub.f32 %v3539_v27, %v3545_v56  ;;  %v3542_v14 = vpop.xlane.xlu1 %3541 }
0x1f73   :  { %v3546_v36 = vsub.f32 %v3538_v4, %v3542_v14  ;;  %v3886_v14 = vrot.slane %v8498_v25, 2 }
0x1f74   :  { %v3550_v38 = vmul.f32 1.442695, %v3547_v16  ;;  %v8621_v16 = vrot.slane %v8512_v29, 2 }
0x1f75   :  { %v3548_v40 = vmul.f32 1.442695, %v3546_v36 }
0x1f76   :  { %6906 = vpow2.f32 %v3550_v38  ;;  %v6743_v42 = vpop.permute.xlu1 %6742  ;;  %v8626_v36 = vsel %vm451_vm1, %v3886_v14, %v8621_v16 }
0x1f77   :  { %v6745_v41 = vunpack.i.h.bf16 %v6743_v42  ;;  %v6744_v45 = vunpack.i.l.bf16 %v6743_v42  ;;  %6908 = vpow2.f32 %v3548_v40  ;;  %v8630_v38 = vpack.i.bf16 %v8621_v16, %v8626_v36 }
0x1f79   :  { %v6492_v43 = vpack.c.bf16 %v6745_v41, %v6744_v45 }
0x1f7a   :  { %v3651_v5 = vpop.permute.xlu1 %3650 }
0x1f7b   :  { %6494 = vmatprep.subr.msk.bf16.mxu1 %vm8085_vm15, %v6492_v43 }
0x1f7c   :  { %6497 = vmatpush3.bf16.msk.msra.mxu1 %vm8085_vm15, %v6492_v43 }
0x1f7e   :  { %v3653_v50 = vpop.permute.xlu1 %3652 }
0x1f80   :  { %v6907_v32 = vpop.eup %6906 }
0x1f81   :  { %v3555_v2 = vsel %vm825_vm12, %v6907_v32, 0.0  ;;  %v6909_v46 = vpop.eup %6908 }
0x1f82   :  { %3556 = vadd.xlane.f32.xlu0 %v3555_v2  ;;  %v3552_v49 = vsel %vm821_vm13, %v6909_v46, 0.0 }
0x1f86   :  { %3553 = vadd.xlane.f32.xlu0 %v3552_v49 }
0x1f9c   :  { %6747 = vrot.lane.b32.xlu0 %v8502_v59, %s7532_s11 }
0x200f   :  { %v3557_v52 = vpop.xlane.xlu0 %3556 }
0x2010   :  { %6910 = vrcp.f32 %v3557_v52 }
0x2013   :  { %v3554_v53 = vpop.xlane.xlu0 %3553 }
0x2014   :  { %6912 = vrcp.f32 %v3554_v53 }
0x2017   :  { %v6748_v54 = vpop.permute.xlu0 %6747 }
0x2018   :  { %v6750_v39 = vunpack.i.h.bf16 %v6748_v54  ;;  %v6749_v24 = vunpack.i.l.bf16 %v6748_v54 }
0x201a   :  { %v6498_v8 = vpack.c.bf16 %v6750_v39, %v6749_v24  ;;  %v6911_v60 = vpop.eup %6910 }
0x201b   :  { %v3561_v58 = vmul.f32 %v6911_v60, %v6907_v32 }
0x201c   :  { %6500 = vmatprep.subr.msk.bf16.mxu1 %vm8042_vm11, %v6498_v8 }
0x201e   :  { %v6913_v61 = vpop.eup %6912 }
0x201f   :  { %v3560_v62 = vmul.f32 %v6913_v61, %v6909_v46 }
0x2021   :  { %6173 = vmatprep.mubr.msk.f32.mxu1 %vm821_vm13, %v3560_v62 }
0x2022   :  { %6174 = vmatmul.mubr.msk.f32.vlgmr.msra.gmra.mrb[38].mxu1 %vm821_vm13, %v3561_v58 }
0x2023   :  { %6503 = vmatpush3.bf16.xpose.msk.msra.mxu1 %vm8042_vm11, %v6498_v8  ;;  %6180 = vmatprep.mubr.msk.f32.mxu1 %vm733_vm10, %v3651_v5 }
0x202a   :  { %6181 = vmatmul.mubr.msk.f32.vlgmr.msra.gmra.mrb[40].mxu1 %vm733_vm10, %v3653_v50 }
0x20f5   :  { %v8604_v19 = vpop.f32.mrb[38].mxu1 }
0x20f6   :  { %v8606_v7 = vpop.f32.mrb[39].mxu1 }
0x20fd   :  { %v6182_v10 = vpop.f32.mrb[40].mxu1 }
0x20fe   :  { %v3742_v63 = vmul.f32 0.35355338, %v6182_v10  ;;  %v3732_v11 = vpop.f32.mrb[41].mxu1 }
0x20ff   :  { %v3741_v51 = vmul.f32 0.35355338, %v3732_v11 }
0x2100   :  { %v3744_v55 = vadd.f32 %v8526_v33, %v3742_v63 }
0x2101   :  { %v3743_v17 = vadd.f32 %v8529_v12, %v3741_v51 }
0x2102   :  { %v3748_v13 = vsel %vm825_vm12, %v3744_v55, -inf }
0x2103   :  { %3749 = vmax.xlane.f32.xlu0 %v3748_v13  ;;  %v3745_v48 = vsel %vm821_vm13, %v3743_v17, -inf }
0x2104   :  { %3746 = vmax.xlane.f32.xlu1 %v3745_v48 }
0x2115   :  { %6752 = vrot.lane.b32.xlu1 %v8502_v59, %s7533_s10 }
0x2190   :  { %v3750_v18 = vpop.xlane.xlu0 %3749 }
0x2191   :  { %v3752_v15 = vsub.f32 %v3744_v55, %v3750_v18  ;;  %v3747_v20 = vpop.xlane.xlu1 %3746 }
0x2192   :  { %v3751_v3 = vsub.f32 %v3743_v17, %v3747_v20 }
0x2193   :  { %v3755_v21 = vmul.f32 1.442695, %v3752_v15 }
0x2194   :  { %v3753_v22 = vmul.f32 1.442695, %v3751_v3 }
0x2195   :  { %6914 = vpow2.f32 %v3755_v21  ;;  %v6753_v31 = vpop.permute.xlu1 %6752 }
0x2196   :  { %v6755_v23 = vunpack.i.h.bf16 %v6753_v31  ;;  %v6754_v27 = vunpack.i.l.bf16 %v6753_v31  ;;  %6916 = vpow2.f32 %v3753_v22 }
0x2198   :  { %v6504_v4 = vpack.c.bf16 %v6755_v23, %v6754_v27 }
0x219a   :  { %6506 = vmatprep.subr.msk.bf16.mxu0 %vm8085_vm15, %v6504_v4 }
0x219b   :  { %6509 = vmatpush3.bf16.msk.msra.mxu0 %vm8085_vm15, %v6504_v4 }
0x219f   :  { %v6915_v35 = vpop.eup %6914 }
0x21a0   :  { %v3760_v59 = vsel %vm825_vm12, %v6915_v35, 0.0  ;;  %v6917_v28 = vpop.eup %6916 }
0x21a1   :  { %3761 = vadd.xlane.f32.xlu0 %v3760_v59  ;;  %v3757_v56 = vsel %vm821_vm13, %v6917_v28, 0.0 }
0x21a5   :  { %3758 = vadd.xlane.f32.xlu0 %v3757_v56 }
0x21bb   :  { %6757 = vrot.lane.b32.xlu0 %v8630_v38, %s7522_s22 }
0x222e   :  { %v3762_v40 = vpop.xlane.xlu0 %3761 }
0x222f   :  { %6918 = vrcp.f32 %v3762_v40 }
0x2232   :  { %v3759_v42 = vpop.xlane.xlu0 %3758 }
0x2233   :  { %6920 = vrcp.f32 %v3759_v42 }
0x2236   :  { %v6758_v41 = vpop.permute.xlu0 %6757 }
0x2237   :  { %v6760_v29 = vunpack.i.h.bf16 %v6758_v41  ;;  %v6759_v45 = vunpack.i.l.bf16 %v6758_v41 }
0x2239   :  { %v6510_v43 = vpack.c.bf16 %v6760_v29, %v6759_v45  ;;  %v6919_v25 = vpop.eup %6918 }
0x223a   :  { %v3766_v46 = vmul.f32 %v6919_v25, %v6915_v35 }
0x223b   :  { %6512 = vmatprep.subr.msk.bf16.mxu0 %vm8042_vm11, %v6510_v43 }
0x223d   :  { %v6921_v32 = vpop.eup %6920 }
0x223e   :  { %v3765_v2 = vmul.f32 %v6921_v32, %v6917_v28 }
0x2240   :  { %6187 = vmatprep.mubr.msk.f32.mxu0 %vm821_vm13, %v3765_v2 }
0x2241   :  { %6188 = vmatmul.mubr.msk.f32.vlgmr.msra.gmra.mrb[38].mxu0 %vm821_vm13, %v3766_v46 }
0x2242   :  { %6515 = vmatpush3.bf16.xpose.msk.msra.mxu0 %vm8042_vm11, %v6510_v43  ;;  %6194 = vmatprep.mubr.msk.f32.mxu0 %vm733_vm10, %v8626_v36 }
0x2249   :  { %6195 = vmatmul.mubr.msk.f32.vlgmr.msra.gmra.mrb[40].mxu0 %vm733_vm10, %v8621_v16 }
0x2314   :  { %v8644_v49 = vpop.f32.mrb[38].mxu0 }
0x2315   :  { %v8646_v52 = vpop.f32.mrb[39].mxu0 }
0x231c   :  { %v6196_v53 = vpop.f32.mrb[40].mxu0 }
0x231d   :  { %v3977_v54 = vmul.f32 0.35355338, %v6196_v53  ;;  %v3967_v39 = vpop.f32.mrb[41].mxu0 }
0x231e   :  { %v3976_v24 = vmul.f32 0.35355338, %v3967_v39 }
0x231f   :  { %v3979_v8 = vadd.f32 %v8526_v33, %v3977_v54 }
0x2320   :  { %v3978_v60 = vadd.f32 %v8529_v12, %v3976_v24 }
0x2321   :  { %v3983_v61 = vsel %vm825_vm12, %v3979_v8, -inf }
0x2322   :  { %3984 = vmax.xlane.f32.xlu0 %v3983_v61  ;;  %v3980_v62 = vsel %vm821_vm13, %v3978_v60, -inf }
0x2323   :  { %3981 = vmax.xlane.f32.xlu1 %v3980_v62 }
0x2334   :  { %6762 = vrot.lane.b32.xlu1 %v8630_v38, %s7526_s8 }
0x2338   :  { %4090 = vrot.lane.b32.xlu1 %v8626_v36, %s7524_s17 }
0x23af   :  { %v3985_v58 = vpop.xlane.xlu0 %3984 }
0x23b0   :  { %v3987_v5 = vsub.f32 %v3979_v8, %v3985_v58  ;;  %v3982_v50 = vpop.xlane.xlu1 %3981 }
0x23b1   :  { %v3986_v10 = vsub.f32 %v3978_v60, %v3982_v50 }
0x23b2   :  { %v3990_v63 = vmul.f32 1.442695, %v3987_v5 }
0x23b3   :  { %v3988_v11 = vmul.f32 1.442695, %v3986_v10 }
0x23b4   :  { %6922 = vpow2.f32 %v3990_v63  ;;  %v6763_v51 = vpop.permute.xlu1 %6762 }
0x23b5   :  { %6924 = vpow2.f32 %v3988_v11  ;;  %v6765_v55 = vunpack.i.h.bf16 %v6763_v51  ;;  %v6764_v17 = vunpack.i.l.bf16 %v6763_v51 }
0x23b7   :  { %v6516_v13 = vpack.c.bf16 %v6765_v55, %v6764_v17 }
0x23b8   :  { %v4091_v3 = vpop.permute.xlu1 %4090 }
0x23b9   :  { %6518 = vmatprep.subr.msk.bf16.mxu1 %vm8085_vm15, %v6516_v13 }
0x23ba   :  { %6521 = vmatpush3.bf16.msk.msra.mxu1 %vm8085_vm15, %v6516_v13 }
0x23be   :  { %v6923_v48 = vpop.eup %6922 }
0x23bf   :  { %v6925_v18 = vpop.eup %6924  ;;  %v3995_v15 = vsel %vm825_vm12, %v6923_v48, 0.0 }
0x23c0   :  { %3996 = vadd.xlane.f32.xlu0 %v3995_v15  ;;  %v3992_v20 = vsel %vm821_vm13, %v6925_v18, 0.0 }
0x23c1   :  { %3993 = vadd.xlane.f32.xlu1 %v3992_v20 }
0x23d2   :  { %4092 = vrot.lane.b32.xlu1 %v8621_v16, %s7524_s17 }
0x23d6   :  { %6767 = vrot.lane.b32.xlu0 %v8630_v38, %s7523_s28 }
0x244d   :  { %v3997_v21 = vpop.xlane.xlu0 %3996 }
0x244e   :  { %6926 = vrcp.f32 %v3997_v21  ;;  %v3994_v22 = vpop.xlane.xlu1 %3993 }
0x244f   :  { %6928 = vrcp.f32 %v3994_v22 }
0x2451   :  { %v6768_v31 = vpop.permute.xlu0 %6767 }
0x2452   :  { %v6770_v23 = vunpack.i.h.bf16 %v6768_v31  ;;  %v6769_v27 = vunpack.i.l.bf16 %v6768_v31  ;;  %v4093_v14 = vpop.permute.xlu1 %4092 }
0x2454   :  { %v6522_v4 = vpack.c.bf16 %v6770_v23, %v6769_v27 }
0x2456   :  { %6524 = vmatprep.subr.msk.bf16.mxu1 %vm8042_vm11, %v6522_v4 }
0x2458   :  { %v6927_v35 = vpop.eup %6926 }
0x2459   :  { %v6929_v59 = vpop.eup %6928  ;;  %v4001_v56 = vmul.f32 %v6927_v35, %v6923_v48 }
0x245a   :  { %v4000_v28 = vmul.f32 %v6929_v59, %v6925_v18 }
0x245c   :  { %6201 = vmatprep.mubr.msk.f32.mxu1 %vm821_vm13, %v4000_v28 }
0x245d   :  { %6202 = vmatmul.mubr.msk.f32.vlgmr.msra.gmra.mrb[42].mxu1 %vm821_vm13, %v4001_v56 }
0x245e   :  { %6527 = vmatpush3.bf16.xpose.msk.msra.mxu1 %vm8042_vm11, %v6522_v4  ;;  %6208 = vmatprep.mubr.msk.f32.mxu1 %vm733_vm10, %v4091_v3 }
0x2465   :  { %6209 = vmatmul.mubr.msk.f32.vlgmr.msra.gmra.mrb[44].mxu1 %vm733_vm10, %v4093_v14 }
0x2530   :  { %v8674_v40 = vpop.f32.mrb[42].mxu1 }
0x2531   :  { %v8676_v42 = vpop.f32.mrb[43].mxu1 }
0x2538   :  { %v6210_v41 = vpop.f32.mrb[44].mxu1 }
0x2539   :  { %v4182_v29 = vmul.f32 0.35355338, %v6210_v41  ;;  %v4172_v45 = vpop.f32.mrb[45].mxu1 }
0x253a   :  { %v4181_v43 = vmul.f32 0.35355338, %v4172_v45 }
0x253b   :  { %v4184_v25 = vadd.f32 %v8526_v33, %v4182_v29 }
0x253c   :  { %v4183_v32 = vadd.f32 %v8529_v12, %v4181_v43 }
0x253d   :  { %v4188_v2 = vsel %vm825_vm12, %v4184_v25, -inf }
0x253e   :  { %4189 = vmax.xlane.f32.xlu0 %v4188_v2  ;;  %v4185_v46 = vsel %vm821_vm13, %v4183_v32, -inf }
0x253f   :  { %4186 = vmax.xlane.f32.xlu1 %v4185_v46 }
0x2550   :  { %6772 = vrot.lane.b32.xlu1 %v8630_v38, %s7525_s20 }
0x2554   :  { %4295 = vrot.lane.b32.xlu1 %v8626_v36, %s7528_s14 }
0x2558   :  { %4297 = vrot.lane.b32.xlu1 %v8621_v16, %s7528_s14 }
0x25cb   :  { %v4190_v53 = vpop.xlane.xlu0 %4189 }
0x25cc   :  { %v4192_v54 = vsub.f32 %v4184_v25, %v4190_v53  ;;  %v4187_v39 = vpop.xlane.xlu1 %4186 }
0x25cd   :  { %v4191_v24 = vsub.f32 %v4183_v32, %v4187_v39 }
0x25ce   :  { %v4195_v8 = vmul.f32 1.442695, %v4192_v54 }
0x25cf   :  { %v4193_v60 = vmul.f32 1.442695, %v4191_v24 }
0x25d0   :  { %6930 = vpow2.f32 %v4195_v8  ;;  %v6773_v61 = vpop.permute.xlu1 %6772 }
0x25d1   :  { %v6775_v62 = vunpack.i.h.bf16 %v6773_v61  ;;  %v6774_v58 = vunpack.i.l.bf16 %v6773_v61  ;;  %6932 = vpow2.f32 %v4193_v60 }
0x25d3   :  { %v6528_v5 = vpack.c.bf16 %v6775_v62, %v6774_v58 }
0x25d4   :  { %v4296_v22 = vpop.permute.xlu1 %4295 }
0x25d5   :  { %6530 = vmatprep.subr.msk.bf16.mxu0 %vm8085_vm15, %v6528_v5 }
0x25d6   :  { %6533 = vmatpush3.bf16.msk.msra.mxu0 %vm8085_vm15, %v6528_v5 }
0x25d8   :  { %v4298_v31 = vpop.permute.xlu1 %4297 }
0x25da   :  { %v6931_v50 = vpop.eup %6930 }
0x25db   :  { %v4200_v10 = vsel %vm825_vm12, %v6931_v50, 0.0  ;;  %v6933_v63 = vpop.eup %6932 }
0x25dc   :  { %4201 = vadd.xlane.f32.xlu0 %v4200_v10  ;;  %v4197_v11 = vsel %vm821_vm13, %v6933_v63, 0.0 }
0x25e0   :  { %4198 = vadd.xlane.f32.xlu0 %v4197_v11 }
0x25f6   :  { %6777 = vrot.lane.b32.xlu0 %v8630_v38, %s7527_s3 }
0x2669   :  { %v4202_v51 = vpop.xlane.xlu0 %4201 }
0x266a   :  { %6934 = vrcp.f32 %v4202_v51 }
0x266d   :  { %v4199_v55 = vpop.xlane.xlu0 %4198 }
0x266e   :  { %6936 = vrcp.f32 %v4199_v55 }
0x2671   :  { %v6778_v17 = vpop.permute.xlu0 %6777 }
0x2672   :  { %v6780_v13 = vunpack.i.h.bf16 %v6778_v17  ;;  %v6779_v48 = vunpack.i.l.bf16 %v6778_v17 }
0x2674   :  { %v6534_v18 = vpack.c.bf16 %v6780_v13, %v6779_v48  ;;  %v6935_v15 = vpop.eup %6934 }
0x2675   :  { %v4206_v21 = vmul.f32 %v6935_v15, %v6931_v50 }
0x2676   :  { %6536 = vmatprep.subr.msk.bf16.mxu0 %vm8042_vm11, %v6534_v18 }
0x2678   :  { %v6937_v20 = vpop.eup %6936 }
0x2679   :  { %v4205_v3 = vmul.f32 %v6937_v20, %v6933_v63 }
0x267b   :  { %6215 = vmatprep.mubr.msk.f32.mxu0 %vm821_vm13, %v4205_v3 }
0x267c   :  { %6216 = vmatmul.mubr.msk.f32.vlgmr.msra.gmra.mrb[42].mxu0 %vm821_vm13, %v4206_v21 }
0x267d   :  { %6539 = vmatpush3.bf16.xpose.msk.msra.mxu0 %vm8042_vm11, %v6534_v18  ;;  %6222 = vmatprep.mubr.msk.f32.mxu0 %vm733_vm10, %v4296_v22 }
0x2684   :  { %6223 = vmatmul.mubr.msk.f32.vlgmr.msra.gmra.mrb[44].mxu0 %vm733_vm10, %v4298_v31 }
0x274f   :  { %v8704_v23 = vpop.f32.mrb[42].mxu0 }
0x2750   :  { %v8706_v27 = vpop.f32.mrb[43].mxu0 }
0x2757   :  { %v6224_v4 = vpop.f32.mrb[44].mxu0 }
0x2758   :  { %v4387_v35 = vmul.f32 0.35355338, %v6224_v4  ;;  %v4377_v59 = vpop.f32.mrb[45].mxu0 }
0x2759   :  { %v4386_v28 = vmul.f32 0.35355338, %v4377_v59 }
0x275a   :  { %v4389_v56 = vadd.f32 %v8526_v33, %v4387_v35 }
0x275b   :  { %v4388_v14 = vadd.f32 %v8529_v12, %v4386_v28 }
0x275c   :  { %v4393_v41 = vsel %vm825_vm12, %v4389_v56, -inf }
0x275d   :  { %4394 = vmax.xlane.f32.xlu0 %v4393_v41  ;;  %v4390_v29 = vsel %vm821_vm13, %v4388_v14, -inf }
0x275e   :  { %4391 = vmax.xlane.f32.xlu1 %v4390_v29 }
0x276f   :  { %6782 = vrot.lane.b32.xlu1 %v8630_v38, %s7530_s29  ;;  %s9020_s29 = sld [smem:[#allocation61_spill]] }
0x2773   :  { %4500 = vrot.lane.b32.xlu1 %v8626_v36, %s7531_s19 }
0x2777   :  { %4502 = vrot.lane.b32.xlu1 %v8621_v16, %s7531_s19  ;;  %s7535_s19 = smov [#allocation35]  }
0x27ea   :  { %v4395_v45 = vpop.xlane.xlu0 %4394 }
0x27eb   :  { %v4397_v43 = vsub.f32 %v4389_v56, %v4395_v45  ;;  %v4392_v25 = vpop.xlane.xlu1 %4391 }
0x27ec   :  { %v4396_v32 = vsub.f32 %v4388_v14, %v4392_v25 }
0x27ed   :  { %v4400_v2 = vmul.f32 1.442695, %v4397_v43 }
0x27ee   :  { %v4398_v46 = vmul.f32 1.442695, %v4396_v32  ;;  %v5665_v32 = vld [vmem:[%s8953_s13 + $0x20] sm:$0xff] }
0x27ef   :  { %6938 = vpow2.f32 %v4400_v2  ;;  %v6783_v53 = vpop.permute.xlu1 %6782  ;;  %v5666_v2 = vld [vmem:[%s8953_s13 + $0x28] sm:$0xff] }
0x27f0   :  { %v6785_v54 = vunpack.i.h.bf16 %v6783_v53  ;;  %v6784_v39 = vunpack.i.l.bf16 %v6783_v53  ;;  %6940 = vpow2.f32 %v4398_v46  ;;  %v6559_v46 = vpack.c.bf16 %v5666_v2, %v5665_v32 }
0x27f2   :  { %v6540_v24 = vpack.c.bf16 %v6785_v54, %v6784_v39  ;;  %v5667_v54 = vld [vmem:[%s8953_s13 + $0x30] sm:$0xff]  ;;  %v5668_v39 = vld [vmem:[%s8953_s13 + $0x38] sm:$0xff] }
0x27f3   :  { %v4501_v17 = vpop.permute.xlu1 %4500 }
0x27f4   :  { %6542 = vmatprep.subr.msk.bf16.mxu1 %vm8085_vm15, %v6540_v24 }
0x27f5   :  { %6545 = vmatpush3.bf16.msk.msra.mxu1 %vm8085_vm15, %v6540_v24 }
0x27f7   :  { %v4503_v13 = vpop.permute.xlu1 %4502 }
0x27f9   :  { %v6939_v36 = vpop.eup %6938 }
0x27fa   :  { %v4405_v16 = vsel %vm825_vm12, %v6939_v36, 0.0  ;;  %v6941_v8 = vpop.eup %6940 }
0x27fb   :  { %4406 = vadd.xlane.f32.xlu0 %v4405_v16  ;;  %v4402_v60 = vsel %vm821_vm13, %v6941_v8, 0.0 }
0x27ff   :  { %4403 = vadd.xlane.f32.xlu0 %v4402_v60 }
0x2815   :  { %6787 = vrot.lane.b32.xlu0 %v8630_v38, %s7532_s11  ;;  %s5496_s11 = sshll.u32 %s7535_s19, 4  ;;  %s5497_s11 = int_to_ptr.vmem [resolvable:$true] %s5496_s11 }
0x2816   :  { %p7453_p1 = scmp.lt.s32.totalorder %s5497_s11, %s5497_s11 }
0x2888   :  { %v4407_v61 = vpop.xlane.xlu0 %4406 }
0x2889   :  { %6942 = vrcp.f32 %v4407_v61 }
0x288c   :  { %v4404_v62 = vpop.xlane.xlu0 %4403 }
0x288d   :  { %6944 = vrcp.f32 %v4404_v62 }
0x2890   :  { %v6788_v58 = vpop.permute.xlu0 %6787 }
0x2891   :  { %v6790_v5 = vunpack.i.h.bf16 %v6788_v58  ;;  %v6789_v50 = vunpack.i.l.bf16 %v6788_v58 }
0x2893   :  { %v6546_v10 = vpack.c.bf16 %v6790_v5, %v6789_v50  ;;  %v6943_v63 = vpop.eup %6942 }
0x2894   :  { %v4411_v55 = vmul.f32 %v6943_v63, %v6939_v36  ;;  %v6562_v36 = vpack.c.bf16 %v5668_v39, %v5667_v54 }
0x2895   :  { %6548 = vmatprep.subr.msk.bf16.mxu1 %vm8042_vm11, %v6546_v10 }
0x2897   :  { %v6945_v11 = vpop.eup %6944 }
0x2898   :  { %v4410_v51 = vmul.f32 %v6945_v11, %v6941_v8 }
0x289a   :  { %6229 = vmatprep.mubr.msk.f32.mxu1 %vm821_vm13, %v4410_v51 }
0x289b   :  { %6230 = vmatmul.mubr.msk.f32.vlgmr.msra.gmra.mrb[46].mxu1 %vm821_vm13, %v4411_v55 }
0x289c   :  { %6551 = vmatpush3.bf16.xpose.msk.msra.mxu1 %vm8042_vm11, %v6546_v10  ;;  %6236 = vmatprep.mubr.msk.f32.mxu1 %vm733_vm10, %v4501_v17 }
0x289d   :  { %6564 = vmatprep.subr.bf16.mxu1 %v7519_v0 }
0x28a3   :  { %6237 = vmatmul.mubr.msk.f32.vlgmr.msra.gmra.mrb[48].mxu1 %vm733_vm10, %v4503_v13 }
0x28a4   :  { %6271 = vmatprep.mubr.msk.f32.mxu1 %vm7521_vm0, %v7520_v1 }
0x296e   :  { %v8737_v48 = vpop.f32.mrb[46].mxu1 }
0x296f   :  { %v4491_v18 = vpop.f32.mrb[47].mxu1 }
0x2976   :  { %v6238_v15 = vpop.f32.mrb[48].mxu1 }
0x2977   :  { %v4592_v20 = vmul.f32 0.35355338, %v6238_v15  ;;  %v4582_v3 = vpop.f32.mrb[49].mxu1 }
0x2978   :  { %v4591_v21 = vmul.f32 0.35355338, %v4582_v3 }
0x2979   :  { %v4594_v44 = vadd.f32 %v8526_v33, %v4592_v20 }
0x297a   :  { %v4593_v22 = vadd.f32 %v8529_v12, %v4591_v21 }
0x297b   :  { %v4598_v31 = vsel %vm825_vm12, %v4594_v44, -inf }
0x297c   :  { %4599 = vmax.xlane.f32.xlu0 %v4598_v31  ;;  %v4595_v4 = vsel %vm821_vm13, %v4593_v22, -inf }
0x297d   :  { %4596 = vmax.xlane.f32.xlu1 %v4595_v4 }
0x298e   :  { %6792 = vrot.lane.b32.xlu1 %v8630_v38, %s7533_s10  ;;  %s7448_s10 = scalar_lea.vmem %s5497_s11, 128 }
0x298f   :  { %p7449_p0 = scmp.ne.s32.totalorder %s5497_s11, %s7448_s10  ;;  %p7454_p2 = scmp.lt.s32.totalorder %s7448_s10, %s7448_s10 }
0x2991   :  { %p7455_p3 = por %p7454_p2, %p7453_p1 }
0x2992   :  { %3865 = vrot.lane.b32.xlu1 %v8606_v7, %s7501_s1 }
0x2993   :  { %p7456_p4 = pnand %p7455_p3, %p7449_p0 }
0x2996   :  { %4707 = vrot.lane.b32.xlu1 %v8706_v27, %s9006_s12 }
0x299a   :  { %3873 = vrot.lane.b32.xlu1 %v8646_v52, %s7534_s23 }
0x299e   :  { %3859 = vrot.lane.b32.xlu1 %v8574_v34, %s9006_s12 }
0x29a2   :  { %3867 = vrot.lane.b32.xlu1 %v8604_v19, %s7501_s1 }
0x29a6   :  { %4709 = vrot.lane.b32.xlu1 %v8704_v23, %s9006_s12 }
0x2a09   :  { %v4600_v33 = vpop.xlane.xlu0 %4599 }
0x2a0a   :  { %v4602_v12 = vsub.f32 %v4594_v44, %v4600_v33  ;;  %v4597_v38 = vpop.xlane.xlu1 %4596 }
0x2a0b   :  { %v4601_v35 = vsub.f32 %v4593_v22, %v4597_v38 }
0x2a0c   :  { %v4605_v7 = vmul.f32 1.442695, %v4602_v12 }
0x2a0d   :  { %v4603_v59 = vmul.f32 1.442695, %v4601_v35 }
0x2a0e   :  { %v6793_v28 = vpop.permute.xlu1 %6792 }
0x2a0f   :  { %6946 = vpow2.f32 %v4603_v59  ;;  %v6795_v27 = vunpack.i.h.bf16 %v6793_v28  ;;  %v6794_v56 = vunpack.i.l.bf16 %v6793_v28 }
0x2a10   :  { %6948 = vpow2.f32 %v4605_v7 }
0x2a11   :  { %v6552_v52 = vpack.c.bf16 %v6795_v27, %v6794_v56 }
0x2a12   :  { %v3866_v14 = vpop.permute.xlu1 %3865 }
0x2a13   :  { %6554 = vmatprep.subr.msk.bf16.mxu0 %vm8085_vm15, %v6552_v52 }
0x2a14   :  { %6557 = vmatpush3.bf16.msk.msra.mxu0 %vm8085_vm15, %v6552_v52 }
0x2a15   :  { %6558 = vmatprep.subr.bf16.mxu0 %v7519_v0 }
0x2a16   :  { %v4708_v34 = vpop.permute.xlu1 %4707 }
0x2a17   :  { %v4729_v19 = vsel %vm733_vm10, %v8676_v42, %v4708_v34 }
0x2a19   :  { %v6947_v23 = vpop.eup %6946 }
0x2a1a   :  { %v4607_v41 = vsel %vm821_vm13, %v6947_v23, 0.0  ;;  %v6949_v29 = vpop.eup %6948  ;;  %v3874_v8 = vpop.permute.xlu1 %3873 }
0x2a1b   :  { %4608 = vadd.xlane.f32.xlu0 %v4607_v41  ;;  %v4610_v45 = vsel %vm825_vm12, %v6949_v29, 0.0 }
0x2a1e   :  { %v3860_v10 = vpop.permute.xlu1 %3859 }
0x2a1f   :  { %4611 = vadd.xlane.f32.xlu0 %v4610_v45  ;;  %v3880_v13 = vsel %vm733_vm10, %v8570_v6, %v3860_v10 }
0x2a22   :  { %v3868_v11 = vpop.permute.xlu1 %3867 }
0x2a35   :  { %3857 = vrot.lane.b32.xlu0 %v8576_v30, %s9006_s12 }
0x2a39   :  { %4715 = vrot.lane.b32.xlu0 %v4491_v18, %s7501_s1 }
0x2a3d   :  { %3875 = vrot.lane.b32.xlu0 %v8644_v49, %s7534_s23 }
0x2aa8   :  { %v4609_v37 = vpop.xlane.xlu0 %4608 }
0x2aa9   :  { %6950 = vrcp.f32 %v4609_v37 }
0x2aac   :  { %v4612_v43 = vpop.xlane.xlu0 %4611 }
0x2aad   :  { %6952 = vrcp.f32 %v4612_v43 }
0x2ab0   :  { %v3858_v49 = vpop.permute.xlu0 %3857 }
0x2ab1   :  { %v3879_v24 = vsel %vm733_vm10, %v8572_v47, %v3858_v49 }
0x2ab2   :  { %v3881_v16 = vsel %vm364_vm3, %v3879_v24, %v3866_v14 }
0x2ab3   :  { %v6951_v42 = vpop.eup %6950  ;;  %v3883_v60 = vsel %vm1576_vm2, %v3881_v16, %v3874_v8  ;;  %v5672_v16 = vld [vmem:[#allocation20 + $0x1] ss:$0 sm:$0xff] }
0x2ab4   :  { %v4615_v25 = vmul.f32 %v6951_v42, %v6947_v23  ;;  %v4716_v63 = vpop.permute.xlu0 %4715  ;;  %v5675_v23 = vld [vmem:[%s8956_s16 + $0x28] sm:$0xff] }
0x2ab5   :  { %v4731_v55 = vsel %vm364_vm3, %v4729_v19, %v4716_v63  ;;  %v5674_v19 = vld [vmem:[%s8956_s16 + $0x20] sm:$0xff] }
0x2ab6   :  { %6243 = vmatprep.mubr.msk.f32.mxu0 %vm821_vm13, %v4615_v25  ;;  %v6565_v41 = vpack.c.bf16 %v5675_v23, %v5674_v19 }
0x2ab7   :  { %v6953_v30 = vpop.eup %6952 }
0x2ab8   :  { %v4616_v53 = vmul.f32 %v6953_v30, %v6949_v29  ;;  %v3876_v51 = vpop.permute.xlu0 %3875  ;;  %6566 = vmatpush3.bf16.msra.mxu1 %v6565_v41  ;;  %v5677_v29 = vld [vmem:[%s8956_s16 + $0x38] sm:$0xff] }
0x2ab9   :  { %6567 = vmatprep.subr.bf16.mxu1 %v7519_v0 }
0x2aba   :  { %6244 = vmatmul.mubr.msk.f32.vlgmr.msra.gmra.mrb[46].mxu0 %vm821_vm13, %v4616_v53 }
0x2abb   :  { %6560 = vmatpush3.bf16.msra.mxu0 %v6559_v46  ;;  %6254 = vmatprep.mubr.msk.f32.mxu0 %vm7521_vm0, %v7520_v1 }
0x2abc   :  { %6561 = vmatprep.subr.bf16.mxu0 %v7519_v0 }
0x2abf   :  { %6563 = vmatpush3.bf16.msra.mxu0 %v6562_v36 }
0x2ac0   :  { %6570 = vmatprep.subr.bf16.mxu0 %v7519_v0 }
0x2ac2   :  { %6255 = vmatmul.mubr.msk.f32.vlgmr.msra.gmra.mrb[48].mxu0 %vm574_vm8, %v3883_v60  ;;  %v5673_v60 = vld [vmem:[#allocation22 + $0x1] ss:$0 sm:$0xff] }
0x2ac3   :  { %6257 = vmatprep.mubr.msk.f32.mxu0 %vm7521_vm0, %v7520_v1 }
0x2b8d   :  { %v6245_v47 = vpop.f32.mrb[46].mxu0 }
0x2b8e   :  { %4725 = vrot.lane.b32.xlu1 %v6245_v47, %s7534_s23  ;;  %v4696_v61 = vpop.f32.mrb[47].mxu0 }
0x2b8f   :  { %4723 = vrot.lane.b32.xlu0 %v4696_v61, %s7534_s23 }
0x2b93   :  { %4717 = vrot.lane.b32.xlu0 %v8737_v48, %s7501_s1  ;;  %v4710_v48 = vpop.permute.xlu1 %4709 }
0x2b94   :  { %v4730_v3 = vsel %vm733_vm10, %v8674_v40, %v4710_v48  ;;  %vm5266_vm10 = vcmask 259072  }
0x2b95   :  { %v4821_v62 = vpop.f32.mrb[48].mxu0 }
0x2b96   :  { %v6256_v58 = vpop.f32.mrb[49].mxu0  ;;  %v8801_v5 = vadd.f32 %v4821_v62, %v8446_v57  ;;  %v3882_v57 = vsel %vm364_vm3, %v3880_v13, %v3868_v11  ;;  %v5688_v62 = vld [vmem:[%s8958_s18 + $0x40] sm:$0xff] }
0x2b97   :  { %v3884_v20 = vsel %vm1576_vm2, %v3882_v57, %v3876_v51  ;;  %v5689_v58 = vld [vmem:[%s8958_s18 + $0x48] sm:$0xff]  ;;  %v5690_v51 = vld [vmem:[%s8958_s18 + $0x50] sm:$0xff] }
0x2b98   :  { %v4842_v50 = vsel %vm574_vm8, %v8801_v5, 0.0  ;;  %v6571_v10 = vpack.c.bf16 %v5689_v58, %v5688_v62  ;;  %v5693_v57 = vld [vmem:[%s8958_s18 + $0x68] sm:$0xff] }
0x2b9a   :  { %6572 = vmatpush3.bf16.msra.mxu0 %v6571_v10 }
0x2b9b   :  { %6573 = vmatprep.subr.bf16.mxu0 %v7519_v0 }
0x2bb2   :  { %4843 = vadd.xlane.f32.xlu0 %v4842_v50 }
0x2c00   :  { %v4726_v22 = vpop.permute.xlu1 %4725 }
0x2c01   :  { %v4724_v17 = vpop.permute.xlu0 %4723 }
0x2c02   :  { %v4733_v18 = vsel %vm1576_vm2, %v4731_v55, %v4724_v17  ;;  %v5691_v55 = vld [vmem:[%s8958_s18 + $0x58] sm:$0xff] }
0x2c03   :  { %v4737_v15 = vrot.slane %v4733_v18, 6  ;;  %v6574_v17 = vpack.c.bf16 %v5691_v55, %v5690_v51  ;;  %v5692_v18 = vld [vmem:[%s8958_s18 + $0x60] sm:$0xff] }
0x2c05   :  { %v4718_v21 = vpop.permute.xlu0 %4717  ;;  %v4741_v44 = vsel %vm561_vm5, %v3884_v20, %v4737_v15  ;;  %6575 = vmatpush3.bf16.msra.mxu0 %v6574_v17  ;;  %v6577_v20 = vpack.c.bf16 %v5693_v57, %v5692_v18 }
0x2c06   :  { %v4732_v31 = vsel %vm364_vm3, %v4730_v3, %v4718_v21  ;;  %6258 = vmatmul.mubr.msk.f32.gmra.mrb[50].mxu0 %vm574_vm8, %v4741_v44  ;;  %6576 = vmatprep.subr.bf16.mxu0 %v7519_v0  ;;  %v5694_v3 = vld [vmem:[%s8958_s18 + $0x70] sm:$0xff]  ;;  %v5695_v21 = vld [vmem:[%s8958_s18 + $0x78] sm:$0xff] }
0x2c07   :  { %v4734_v6 = vsel %vm1576_vm2, %v4732_v31, %v4726_v22  ;;  %6260 = vmatprep.mubr.msk.f32.mxu0 %vm7521_vm0, %v7520_v1  ;;  %v6580_v44 = vpack.c.bf16 %v5695_v21, %v5694_v3 }
0x2c08   :  { %v4738_v4 = vrot.slane %v4734_v6, 6 }
0x2c09   :  { %6578 = vmatpush3.bf16.msra.mxu0 %v6577_v20 }
0x2c0a   :  { %v4739_v33 = vsel %vm561_vm5, %v4737_v15, %v4738_v4  ;;  %6579 = vmatprep.subr.bf16.mxu0 %v7519_v0 }
0x2c0b   :  { %6261 = vmatmul.mubr.msk.f32.gmra.mrb[52].mxu0 %vm574_vm8, %v4739_v33 }
0x2c0c   :  { %6296 = vmatprep.mubr.msk.f32.mxu0 %vm7521_vm0, %v7520_v1 }
0x2c0d   :  { %6581 = vmatpush3.bf16.msra.mxu0 %v6580_v44 }
0x2c3f   :  { %v4844_v40 = vpop.xlane.xlu0 %4843 }
0x2c40   :  { %v4851_v12 = vmul.f32 0.03125, %v4844_v40 }
0x2c42   :  { %v4854_v28 = vsub.f32 %v8801_v5, %v4851_v12 }
0x2c44   :  { %v4857_v34 = vmul.f32 %v4854_v28, %v4854_v28 }
0x2cd9   :  { %v4826_v38 = vpop.f32.mrb[50].mxu0 }
0x2cda   :  { %v8824_v35 = vadd.f32 %v4826_v38, %v8476_v9  ;;  %v6259_v7 = vpop.f32.mrb[51].mxu0  ;;  %v4860_v9 = vsel %vm574_vm8, %v4857_v34, 0.0 }
0x2cdb   :  { %v5678_v7 = vld [vmem:[#allocation23 + $0x1] ss:$0 sm:$0xff] }
0x2cdc   :  { %v4845_v59 = vsel %vm574_vm8, %v8824_v35, 0.0 }
0x2cdd   :  { %4846 = vadd.xlane.f32.xlu1 %v4845_v59 }
0x2cde   :  { %v4831_v27 = vpop.f32.mrb[52].mxu0 }
0x2cdf   :  { %v8830_v56 = vadd.f32 %v4831_v27, %v8482_v26  ;;  %v6262_v52 = vpop.f32.mrb[53].mxu0  ;;  %v5676_v26 = vld [vmem:[%s8956_s16 + $0x30] sm:$0xff] }
0x2ce0   :  { %v6568_v45 = vpack.c.bf16 %v5677_v29, %v5676_v26 }
0x2ce1   :  { %v4848_v14 = vsel %vm581_vm9, %v8830_v56, 0.0 }
0x2ce2   :  { %4849 = vadd.xlane.f32.xlu0 %v4848_v14  ;;  %6569 = vmatpush3.bf16.msra.mxu1 %v6568_v45 }
0x2ce3   :  { %6582 = vmatprep.subr.bf16.mxu1 %v7519_v0 }
0x2ce6   :  { %4861 = vadd.xlane.f32.xlu0 %v4860_v9 }
0x2d6a   :  { %v4847_v37 = vpop.xlane.xlu1 %4846 }
0x2d6b   :  { %v4852_v43 = vmul.f32 0.03125, %v4847_v37 }
0x2d6d   :  { %v4855_v42 = vsub.f32 %v8824_v35, %v4852_v43 }
0x2d6f   :  { %v4850_v25 = vpop.xlane.xlu0 %4849  ;;  %v4858_v32 = vmul.f32 %v4855_v42, %v4855_v42 }
0x2d70   :  { %v4853_v2 = vmul.f32 0.03125, %v4850_v25 }
0x2d71   :  { %v4863_v30 = vsel %vm574_vm8, %v4858_v32, 0.0 }
0x2d72   :  { %v4856_v46 = vsub.f32 %v8830_v56, %v4853_v2  ;;  %4864 = vadd.xlane.f32.xlu0 %v4863_v30 }
0x2d73   :  { %v4862_v53 = vpop.xlane.xlu0 %4861 }
0x2d74   :  { %v4869_v49 = vmul.f32 0.03125, %v4862_v53  ;;  %v4859_v54 = vmul.f32 %v4856_v46, %v4856_v46 }
0x2d76   :  { %v4872_v39 = vadd.f32 1e-05, %v4869_v49  ;;  %v4866_v24 = vsel %vm581_vm9, %v4859_v54, 0.0 }
0x2d77   :  { %4867 = vadd.xlane.f32.xlu1 %v4866_v24 }
0x2d78   :  { %6954 = vrsqrt.f32 %v4872_v39 }
0x2d82   :  { %v6955_v36 = vpop.eup %6954 }
0x2d83   :  { %v4878_v8 = vmul.f32 %v6955_v36, %v4854_v28 }
0x2d85   :  { %v4887_v47 = vmul.f32 %v5672_v16, %v4878_v8 }
0x2d87   :  { %v4896_v61 = vadd.f32 %v5673_v60, %v4887_v47 }
0x2d89   :  { %6272 = vmatmul.mubr.msk.f32.vlgmr.msra.gmra.mrb[50].mxu1 %vm574_vm8, %v4896_v61 }
0x2d8a   :  { %6274 = vmatprep.mubr.msk.f32.mxu1 %vm7521_vm0, %v7520_v1 }
0x2dff   :  { %v4865_v50 = vpop.xlane.xlu0 %4864 }
0x2e00   :  { %v4870_v63 = vmul.f32 0.03125, %v4865_v50 }
0x2e02   :  { %v4873_v11 = vadd.f32 1e-05, %v4870_v63 }
0x2e04   :  { %6956 = vrsqrt.f32 %v4873_v11  ;;  %v4868_v13 = vpop.xlane.xlu1 %4867 }
0x2e05   :  { %v4871_v48 = vmul.f32 0.03125, %v4868_v13 }
0x2e07   :  { %v4874_v15 = vadd.f32 1e-05, %v4871_v48 }
0x2e09   :  { %6958 = vrsqrt.f32 %v4874_v15 }
0x2e0e   :  { %v6957_v22 = vpop.eup %6956 }
0x2e0f   :  { %v4879_v31 = vmul.f32 %v6957_v22, %v4855_v42 }
0x2e11   :  { %v4888_v6 = vmul.f32 %v5672_v16, %v4879_v31 }
0x2e13   :  { %v6959_v4 = vpop.eup %6958  ;;  %v4897_v33 = vadd.f32 %v5673_v60, %v4888_v6 }
0x2e14   :  { %v4880_v40 = vmul.f32 %v6959_v4, %v4856_v46 }
0x2e15   :  { %6275 = vmatmul.mubr.msk.f32.gmra.mrb[52].mxu1 %vm574_vm8, %v4897_v33 }
0x2e16   :  { %6277 = vmatprep.mubr.msk.f32.mxu1 %vm7521_vm0, %v7520_v1  ;;  %v4889_v12 = vmul.f32 %v5672_v16, %v4880_v40 }
0x2e18   :  { %v4898_v38 = vadd.f32 %v5673_v60, %v4889_v12 }
0x2e1a   :  { %6278 = vmatmul.mubr.msk.f32.gmra.mrb[54].mxu1 %vm574_vm8, %v4898_v38 }
0x2e1b   :  { %6313 = vmatprep.mubr.msk.f32.mxu1 %vm7521_vm0, %v7520_v1 }
0x2e5c   :  { %v4987_v59 = vpop.f32.mrb[50].mxu1 }
0x2e5d   :  { %v4988_v28 = vadd.f32 %v5678_v7, %v4987_v59  ;;  %v6273_v27 = vpop.f32.mrb[51].mxu1 }
0x2e5f   :  { %v5004_v52 = vmul.f32 0.70710677, %v4988_v28  ;;  %v5001_v24 = vmul.f32 0.5, %v4988_v28 }
0x2e61   :  { %v5007_v14 = vand.u32 2147483647, %v5004_v52  ;;  %vm5067_vm1 = vcmp.ge.f32.partialorder %v5004_v52, 0.0 }
0x2e63   :  { %v5010_v34 = vmul.f32 0.3275911, %v5007_v14  ;;  %v5049_v19 = vsub.f32 0.0, %v5007_v14 }
0x2e65   :  { %v5013_v9 = vadd.f32 1.0, %v5010_v34  ;;  %v5052_v41 = vmul.f32 %v5049_v19, %v5007_v14 }
0x2e67   :  { %6960 = vrcp.f32 %v5013_v9  ;;  %v5055_v45 = vmul.f32 1.442695, %v5052_v41 }
0x2e69   :  { %6962 = vpow2.f32 %v5055_v45 }
0x2e71   :  { %v6961_v23 = vpop.eup %6960 }
0x2e72   :  { %v5022_v26 = vmul.f32 1.0614054, %v6961_v23 }
0x2e73   :  { %v6963_v46 = vpop.eup %6962 }
0x2e74   :  { %v5682_v29 = vadd.f32 -1.4531521, %v5022_v26 }
0x2e76   :  { %v5028_v37 = vmul.f32 %v6961_v23, %v5682_v29 }
0x2e78   :  { %v5031_v43 = vadd.f32 1.4214138, %v5028_v37 }
0x2e7a   :  { %v5034_v42 = vmul.f32 %v6961_v23, %v5031_v43 }
0x2e7c   :  { %v5685_v25 = vadd.f32 -0.28449672, %v5034_v42 }
0x2e7e   :  { %v5040_v32 = vmul.f32 %v6961_v23, %v5685_v25 }
0x2e80   :  { %v5043_v2 = vadd.f32 0.2548296, %v5040_v32 }
0x2e82   :  { %v5046_v30 = vmul.f32 %v6961_v23, %v5043_v2 }
0x2e84   :  { %v5061_v53 = vmul.f32 %v6963_v46, %v5046_v30 }
0x2e86   :  { %v5064_v49 = vsub.f32 1.0, %v5061_v53 }
0x2e88   :  { %v5070_v54 = vsub.f32 0.0, %v5064_v49 }
0x2e8a   :  { %v5073_v39 = vsel %vm5067_vm1, %v5064_v49, %v5070_v54 }
0x2e8b   :  { %v5076_v36 = vadd.f32 1.0, %v5073_v39 }
0x2e8d   :  { %v5079_v16 = vmul.f32 %v5076_v36, %v5001_v24  ;;  %v5699_v36 = vld [vmem:[#allocation25 + $0x1] ss:$0 sm:$0xff] }
0x2e8f   :  { %6297 = vmatmul.mubr.msk.f32.vlgmr.msra.gmra.mrb[54].mxu0 %vm2779_vm7, %v5079_v16 }
0x2e90   :  { %6299 = vmatprep.mubr.msk.f32.mxu0 %vm7521_vm0, %v7520_v1 }
0x2ee8   :  { %v4992_v8 = vpop.f32.mrb[52].mxu1 }
0x2ee9   :  { %v4993_v60 = vadd.f32 %v5678_v7, %v4992_v8  ;;  %v6276_v47 = vpop.f32.mrb[53].mxu1 }
0x2eeb   :  { %v5005_v61 = vmul.f32 0.70710677, %v4993_v60  ;;  %v5002_v25 = vmul.f32 0.5, %v4993_v60 }
0x2eed   :  { %v5008_v62 = vand.u32 2147483647, %v5005_v61  ;;  %v4997_v58 = vpop.f32.mrb[54].mxu1  ;;  %vm5068_vm3 = vcmp.ge.f32.partialorder %v5005_v61, 0.0 }
0x2eee   :  { %v4998_v50 = vadd.f32 %v5678_v7, %v4997_v58  ;;  %v6279_v10 = vpop.f32.mrb[55].mxu1 }
0x2eef   :  { %v5011_v63 = vmul.f32 0.3275911, %v5008_v62  ;;  %v5050_v48 = vsub.f32 0.0, %v5008_v62 }
0x2ef0   :  { %v5006_v11 = vmul.f32 0.70710677, %v4998_v50  ;;  %v5003_v49 = vmul.f32 0.5, %v4998_v50 }
0x2ef1   :  { %v5014_v51 = vadd.f32 1.0, %v5011_v63  ;;  %v5053_v57 = vmul.f32 %v5050_v48, %v5008_v62 }
0x2ef2   :  { %v5009_v55 = vand.u32 2147483647, %v5006_v11  ;;  %vm5069_vm5 = vcmp.ge.f32.partialorder %v5006_v11, 0.0 }
0x2ef3   :  { %6964 = vrcp.f32 %v5014_v51  ;;  %v5057_v21 = vmul.f32 1.442695, %v5053_v57 }
0x2ef4   :  { %v5012_v17 = vmul.f32 0.3275911, %v5009_v55  ;;  %v5051_v20 = vsub.f32 0.0, %v5009_v55 }
0x2ef6   :  { %v5015_v13 = vadd.f32 1.0, %v5012_v17  ;;  %v5054_v31 = vmul.f32 %v5051_v20, %v5009_v55 }
0x2ef8   :  { %6966 = vrcp.f32 %v5015_v13  ;;  %v5059_v12 = vmul.f32 1.442695, %v5054_v31 }
0x2ef9   :  { %6968 = vpow2.f32 %v5057_v21 }
0x2efa   :  { %6970 = vpow2.f32 %v5059_v12 }
0x2efd   :  { %v6965_v18 = vpop.eup %6964 }
0x2efe   :  { %v5023_v15 = vmul.f32 1.0614054, %v6965_v18 }
0x2f00   :  { %v5683_v3 = vadd.f32 -1.4531521, %v5023_v15 }
0x2f02   :  { %v6967_v44 = vpop.eup %6966  ;;  %v5029_v22 = vmul.f32 %v6965_v18, %v5683_v3 }
0x2f03   :  { %v5024_v6 = vmul.f32 1.0614054, %v6967_v44  ;;  %v6969_v9 = vpop.eup %6968 }
0x2f04   :  { %v5032_v4 = vadd.f32 1.4214138, %v5029_v22  ;;  %v6971_v45 = vpop.eup %6970 }
0x2f05   :  { %v5684_v33 = vadd.f32 -1.4531521, %v5024_v6 }
0x2f06   :  { %v5035_v40 = vmul.f32 %v6965_v18, %v5032_v4 }
0x2f07   :  { %v5030_v38 = vmul.f32 %v6967_v44, %v5684_v33 }
0x2f08   :  { %v5686_v7 = vadd.f32 -0.28449672, %v5035_v40 }
0x2f09   :  { %v5033_v59 = vadd.f32 1.4214138, %v5030_v38 }
0x2f0a   :  { %v5041_v28 = vmul.f32 %v6965_v18, %v5686_v7 }
0x2f0b   :  { %v5036_v27 = vmul.f32 %v6967_v44, %v5033_v59 }
0x2f0c   :  { %v5044_v52 = vadd.f32 0.2548296, %v5041_v28 }
0x2f0d   :  { %v5687_v14 = vadd.f32 -0.28449672, %v5036_v27 }
0x2f0e   :  { %v5047_v34 = vmul.f32 %v6965_v18, %v5044_v52 }
0x2f0f   :  { %v5042_v19 = vmul.f32 %v6967_v44, %v5687_v14 }
0x2f10   :  { %v5062_v23 = vmul.f32 %v6969_v9, %v5047_v34  ;;  %v5700_v9 = vld [vmem:[#allocation26] ss:$0 sm:$0xff] }
0x2f11   :  { %v5045_v41 = vadd.f32 0.2548296, %v5042_v19 }
0x2f12   :  { %v5065_v26 = vsub.f32 1.0, %v5062_v23 }
0x2f13   :  { %v5048_v29 = vmul.f32 %v6967_v44, %v5045_v41 }
0x2f14   :  { %v5071_v37 = vsub.f32 0.0, %v5065_v26 }
0x2f15   :  { %v5063_v43 = vmul.f32 %v6971_v45, %v5048_v29 }
0x2f16   :  { %v5074_v42 = vsel %vm5068_vm3, %v5065_v26, %v5071_v37  ;;  %v5701_v26 = vld [vmem:[#allocation28] ss:$0 sm:$0xff] }
0x2f17   :  { %v5077_v32 = vadd.f32 1.0, %v5074_v42  ;;  %v5066_v2 = vsub.f32 1.0, %v5063_v43 }
0x2f19   :  { %v5080_v30 = vmul.f32 %v5077_v32, %v5002_v25  ;;  %v5072_v46 = vsub.f32 0.0, %v5066_v2 }
0x2f1b   :  { %v5075_v53 = vsel %vm5069_vm5, %v5066_v2, %v5072_v46  ;;  %6300 = vmatmul.mubr.msk.f32.gmra.mrb[56].mxu0 %vm2779_vm7, %v5080_v30 }
0x2f1c   :  { %v5078_v54 = vadd.f32 1.0, %v5075_v53  ;;  %6302 = vmatprep.mubr.msk.f32.mxu0 %vm7521_vm0, %v7520_v1 }
0x2f1e   :  { %v5081_v39 = vmul.f32 %v5078_v54, %v5003_v49 }
0x2f20   :  { %6303 = vmatmul.mubr.msk.f32.gmra.mrb[58].mxu0 %vm2779_vm7, %v5081_v39 }
0x2f62   :  { %v5166_v24 = vpop.f32.mrb[54].mxu0 }
0x2f63   :  { %v5180_v16 = vadd.f32 %v5166_v24, %v8801_v5  ;;  %v6298_v8 = vpop.f32.mrb[55].mxu0 }
0x2f64   :  { %v5294_v8 = vld [vmem:[#allocation32] sm:$0xff] }
0x2f65   :  { %v5191_v60 = vadd.f32 %v5699_v36, %v5180_v16 }
0x2f67   :  { %v5196_v47 = vsel %vm574_vm8, %v5191_v60, 0.0 }
0x2f68   :  { %5197 = vadd.xlane.f32.xlu0 %v5196_v47 }
0x2fee   :  { %v5171_v61 = vpop.f32.mrb[56].mxu0 }
0x2fef   :  { %v5181_v62 = vadd.f32 %v5171_v61, %v8824_v35  ;;  %v6301_v58 = vpop.f32.mrb[57].mxu0  ;;  %v5296_v61 = vld [vmem:[#allocation32 + $0x10] sm:$0xff] }
0x2ff1   :  { %v5192_v50 = vadd.f32 %v5699_v36, %v5181_v62  ;;  %v5297_v62 = vld [vmem:[#allocation32 + $0x18] sm:$0xff] }
0x2ff2   :  { %v6586_v58 = vpack.c.bf16 %v5297_v62, %v5296_v61 }
0x2ff3   :  { %v5176_v10 = vpop.f32.mrb[58].mxu0  ;;  %v5199_v63 = vsel %vm574_vm8, %v5192_v50, 0.0 }
0x2ff4   :  { %v5182_v11 = vadd.f32 %v5176_v10, %v8830_v56  ;;  %5200 = vadd.xlane.f32.xlu1 %v5199_v63  ;;  %v6304_v51 = vpop.f32.mrb[59].mxu0 }
0x2ff5   :  { %v5198_v55 = vpop.xlane.xlu0 %5197  ;;  %v5702_v51 = vld [vmem:[#allocation29] ss:$0 sm:$0xff] }
0x2ff6   :  { %v5193_v17 = vadd.f32 %v5699_v36, %v5182_v11  ;;  %v5205_v5 = vmul.f32 0.03125, %v5198_v55 }
0x2ff8   :  { %v5208_v13 = vsub.f32 %v5191_v60, %v5205_v5  ;;  %v5202_v48 = vsel %vm581_vm9, %v5193_v17, 0.0  ;;  %v5295_v60 = vld [vmem:[#allocation32 + $0x8] sm:$0xff] }
0x2ff9   :  { %5203 = vadd.xlane.f32.xlu0 %v5202_v48  ;;  %v6583_v47 = vpack.c.bf16 %v5295_v60, %v5294_v8  ;;  %v5405_v48 = vld [vmem:[%s8966_s26] sm:$0xff] }
0x2ffa   :  { %v5211_v18 = vmul.f32 %v5208_v13, %v5208_v13 }
0x2ffb   :  { %6584 = vmatpush3.bf16.msra.mxu1 %v6583_v47 }
0x2ffc   :  { %v5214_v57 = vsel %vm574_vm8, %v5211_v18, 0.0  ;;  %6585 = vmatprep.subr.bf16.mxu1 %v7519_v0  ;;  %v5406_v18 = vld [vmem:[%s8966_s26 + $0x8] sm:$0xff] }
0x2ffd   :  { %5215 = vadd.xlane.f32.xlu1 %v5214_v57  ;;  %v6589_v57 = vpack.c.bf16 %v5406_v18, %v5405_v48 }
0x2fff   :  { %6587 = vmatpush3.bf16.msra.mxu1 %v6586_v58 }
0x3000   :  { %6588 = vmatprep.subr.bf16.mxu1 %v7519_v0 }
0x3081   :  { %v5201_v35 = vpop.xlane.xlu1 %5200 }
0x3082   :  { %v5206_v15 = vmul.f32 0.03125, %v5201_v35  ;;  %v5407_v35 = vld [vmem:[%s8966_s26 + $0x10] sm:$0xff] }
0x3084   :  { %v5209_v20 = vsub.f32 %v5192_v50, %v5206_v15 }
0x3086   :  { %v5204_v3 = vpop.xlane.xlu0 %5203  ;;  %v5212_v21 = vmul.f32 %v5209_v20, %v5209_v20 }
0x3087   :  { %v5207_v44 = vmul.f32 0.03125, %v5204_v3 }
0x3088   :  { %v5217_v56 = vsel %vm574_vm8, %v5212_v21, 0.0 }
0x3089   :  { %v5210_v22 = vsub.f32 %v5193_v17, %v5207_v44  ;;  %5218 = vadd.xlane.f32.xlu0 %v5217_v56  ;;  %v5703_v17 = vld [vmem:[#allocation31] ss:$0 sm:$0xff] }
0x308a   :  { %v5216_v4 = vpop.xlane.xlu1 %5215 }
0x308b   :  { %v5213_v31 = vmul.f32 %v5210_v22, %v5210_v22  ;;  %v5223_v33 = vmul.f32 0.03125, %v5216_v4 }
0x308d   :  { %v5220_v6 = vsel %vm581_vm9, %v5213_v31, 0.0  ;;  %v5226_v40 = vadd.f32 1e-05, %v5223_v33  ;;  %vm5262_vm9 = vcmask 1042432  }
0x308e   :  { %5221 = vadd.xlane.f32.xlu1 %v5220_v6 }
0x308f   :  { %6972 = vrsqrt.f32 %v5226_v40 }
0x3099   :  { %v6973_v52 = vpop.eup %6972 }
0x309a   :  { %v5232_v14 = vmul.f32 %v6973_v52, %v5208_v13 }
0x309c   :  { %v5241_v23 = vmul.f32 %v5700_v9, %v5232_v14 }
0x309e   :  { %v5250_v43 = vadd.f32 %v5701_v26, %v5241_v23 }
0x30a0   :  { %v5255_v2 = vrot.slane %v5250_v43, 7  ;;  %v5708_v43 = vld [vmem:[%s9020_s29] ss:$0 sm:$0xff] }
0x3116   :  { %v5219_v12 = vpop.xlane.xlu0 %5218 }
0x3117   :  { %v5224_v38 = vmul.f32 0.03125, %v5219_v12 }
0x3119   :  { %v5227_v7 = vadd.f32 1e-05, %v5224_v38 }
0x311b   :  { %6974 = vrsqrt.f32 %v5227_v7  ;;  %v5222_v59 = vpop.xlane.xlu1 %5221 }
0x311c   :  { %v5225_v28 = vmul.f32 0.03125, %v5222_v59 }
0x311e   :  { %v5228_v27 = vadd.f32 1e-05, %v5225_v28 }
0x3120   :  { %6976 = vrsqrt.f32 %v5228_v27 }
0x3125   :  { %v6975_v34 = vpop.eup %6974 }
0x3126   :  { %v5233_v19 = vmul.f32 %v6975_v34, %v5209_v20  ;;  %v5704_v20 = vld [vmem:[#allocation34] ss:$0 sm:$0xff] }
0x3128   :  { %v5242_v41 = vmul.f32 %v5700_v9, %v5233_v19 }
0x312a   :  { %v6977_v29 = vpop.eup %6976  ;;  %v5251_v45 = vadd.f32 %v5701_v26, %v5242_v41 }
0x312b   :  { %v5234_v37 = vmul.f32 %v6977_v29, %v5210_v22 }
0x312c   :  { %v5256_v25 = vrot.slane %v5251_v45, 7 }
0x312d   :  { %v5243_v42 = vmul.f32 %v5700_v9, %v5234_v37 }
0x312e   :  { %v5257_v46 = vsel %vm536_vm4, %v5255_v2, %v5256_v25 }
0x312f   :  { %v5252_v32 = vadd.f32 %v5701_v26, %v5243_v42 }
0x3131   :  { %v5260_v30 = vrot.slane %v5252_v32, 6 }
0x3133   :  { %v5263_v53 = vsel %vm5262_vm9, %v5257_v46, %v5260_v30 }
0x3134   :  { %v5267_v49 = vsel %vm5266_vm10, %v5263_v53, 0.0 }
0x3135   :  { %5268 = vadd.xlane.f32.xlu0 %v5267_v49 }
0x31c2   :  { %v5269_v54 = vpop.xlane.xlu0 %5268 }
0x31c3   :  { %v5270_v39 = vmul.f32 0.03125, %v5269_v54 }
0x31c5   :  { %v5271_v24 = vsub.f32 %v5263_v53, %v5270_v39 }
0x31c7   :  { %v5272_v36 = vmul.f32 %v5271_v24, %v5271_v24 }
0x31c9   :  { %v5273_v16 = vsel %vm5266_vm10, %v5272_v36, 0.0 }
0x31ca   :  { %5274 = vadd.xlane.f32.xlu1 %v5273_v16 }
0x3257   :  { %v5275_v50 = vpop.xlane.xlu1 %5274 }
0x3258   :  { %v5276_v10 = vmul.f32 0.03125, %v5275_v50 }
0x325a   :  { %v5277_v63 = vadd.f32 1e-05, %v5276_v10 }
0x325c   :  { %6978 = vrsqrt.f32 %v5277_v63 }
0x3266   :  { %v6979_v11 = vpop.eup %6978 }
0x3267   :  { %v5279_v55 = vmul.f32 %v6979_v11, %v5271_v24 }
0x3269   :  { %v5286_v5 = vmul.f32 %v5702_v51, %v5279_v55 }
0x326b   :  { %v5293_v13 = vadd.f32 %v5703_v17, %v5286_v5 }
0x326d   :  { %6314 = vmatmul.mubr.msk.f32.vlgmr.msra.gmra.mrb[56].mxu1 %vm574_vm8, %v5293_v13 }
0x326e   :  { %6324 = vmatprep.mubr.msk.f32.mxu1 %vm7521_vm0, %v7520_v1  ;;  %6590 = vmatpush3.bf16.msra.mxu1 %v6589_v57  ;;  %v5408_v1 = vld [vmem:[%s8966_s26 + $0x18] sm:$0xff] }
0x326f   :  { %6591 = vmatprep.subr.bf16.mxu1 %v7519_v0  ;;  %v6592_v15 = vpack.c.bf16 %v5408_v1, %v5407_v35 }
0x3272   :  { %6593 = vmatpush3.bf16.msra.mxu1 %v6592_v15 }
0x3340   :  { %v5374_v3 = vpop.f32.mrb[56].mxu1 }
0x3341   :  { %v5375_v21 = vadd.f32 %v5704_v20, %v5374_v3  ;;  %v6315_v44 = vpop.f32.mrb[57].mxu1 }
0x3343   :  { %v5379_v56 = vmul.f32 0.70710677, %v5375_v21  ;;  %v5378_v29 = vmul.f32 0.5, %v5375_v21 }
0x3345   :  { %v5380_v22 = vand.u32 2147483647, %v5379_v56  ;;  %vm5400_vm0 = vcmp.ge.f32.partialorder %v5379_v56, 0.0 }
0x3347   :  { %v5381_v31 = vmul.f32 0.3275911, %v5380_v22  ;;  %v5394_v0 = vsub.f32 0.0, %v5380_v22 }
0x3349   :  { %v5382_v6 = vadd.f32 1.0, %v5381_v31  ;;  %v5395_v33 = vmul.f32 %v5394_v0, %v5380_v22 }
0x334b   :  { %6980 = vrcp.f32 %v5382_v6  ;;  %v5396_v38 = vmul.f32 1.442695, %v5395_v33 }
0x334d   :  { %6982 = vpow2.f32 %v5396_v38 }
0x3355   :  { %v6981_v4 = vpop.eup %6980 }
0x3356   :  { %v5385_v40 = vmul.f32 1.0614054, %v6981_v4 }
0x3357   :  { %v6983_v9 = vpop.eup %6982 }
0x3358   :  { %v5706_v12 = vadd.f32 -1.4531521, %v5385_v40 }
0x335a   :  { %v5387_v7 = vmul.f32 %v6981_v4, %v5706_v12 }
0x335c   :  { %v5388_v59 = vadd.f32 1.4214138, %v5387_v7 }
0x335e   :  { %v5389_v28 = vmul.f32 %v6981_v4, %v5388_v59 }
0x3360   :  { %v5707_v27 = vadd.f32 -0.28449672, %v5389_v28 }
0x3362   :  { %v5391_v52 = vmul.f32 %v6981_v4, %v5707_v27 }
0x3364   :  { %v5392_v14 = vadd.f32 0.2548296, %v5391_v52 }
0x3366   :  { %v5393_v34 = vmul.f32 %v6981_v4, %v5392_v14 }
0x3368   :  { %v5398_v19 = vmul.f32 %v6983_v9, %v5393_v34 }
0x336a   :  { %v5399_v23 = vsub.f32 1.0, %v5398_v19 }
0x336c   :  { %v5401_v41 = vsub.f32 0.0, %v5399_v23 }
0x336e   :  { %v5402_v26 = vsel %vm5400_vm0, %v5399_v23, %v5401_v41 }
0x336f   :  { %v5403_v45 = vadd.f32 1.0, %v5402_v26 }
0x3371   :  { %v5404_v37 = vmul.f32 %v5403_v45, %v5378_v29 }
0x3373   :  { %6325 = vmatmul.mubr.msk.f32.vlgmr.msra.gmra.mrb[58].mxu1 %vm574_vm8, %v5404_v37 }
0x3446   :  { %v5485_v42 = vpop.f32.mrb[58].mxu1 }
0x3447   :  { %v5486_v25 = vadd.f32 %v5708_v43, %v5485_v42  ;;  %v6326_v32 = vpop.f32.mrb[59].mxu1 }
0x3449   :  { %5489 = vst [vmem:[#allocation35] sm:$0x3f] %v5486_v25 }
0x344a   :  { %7459 = shalt.err (!%p7456_p4)
}
0x344b   :  { %s9021_s5 = sld [smem:[#allocation62_spill]] }
0x3451   :  { %s7460_s27 = scalar_lea.hbm %s9021_s5, 128 }
0x3452   :  { %p7461_p5 = scmp.ne.s32.totalorder %s9021_s5, %s7460_s27  ;;  %p7464_p6 = scmp.lt.u32.totalorder %s7460_s27, %s9021_s5 }
0x3454   :  { %p7466_p7 = pnand %p7464_p6, %p7461_p5 }
0x3456   :  { %7469 = shalt.err (!%p7466_p7)
}
0x3457   :  { %5499 = dma.vmem_to_hbm [thread:$0]  %s5497_s11, 128, %s9021_s5, [#allocation4]  }
0x3458   :  { %7492 = dma.done.wait [#allocation4], 128  }
0x3459   :  { %7493 = vsyncadd [#allocation4], 4294967168 }
0x345a   :  { %5503 = vsyncpa [#allocation3], 1 }
0x345b   :  { %5504 = vsyncpa [#allocation6], 1 }
0x345c   :  { %5505 = vsyncpa [#allocation9], 1 }
0x345d   :  { %5506 = vsyncpa [#allocation12], 1 }
0x345e   :  { %5507 = vsyncpa [#allocation15], 1 }
0x345f   :  { %5508 = vsyncpa [#allocation18], 1 }
0x3460   :  { %5509 = vsyncpa [#allocation21], 1 }
0x3461   :  { %5510 = vsyncpa [#allocation24], 1 }
0x3462   :  { %5511 = vsyncpa [#allocation27], 1 }
0x3463   :  { %5512 = vsyncpa [#allocation30], 1 }
0x3464   :  { %5513 = vsyncpa [#allocation33], 1 }
0x3465   :  { %5514 = vsyncpa [#allocation4], 1 }

</bundles_post_ra>
